<compile_context>
chip_gen: v5e
topology: v5e:2x2
jax: 0.10.0
libtpu: 0.0.40
codegen_flags: <defaults>
</compile_context>

<pallas_src>
import functools

import numpy as np
import jax
import jax.numpy as jnp
from jax.experimental import pallas as pl
from jax.experimental.pallas import tpu as pltpu

NEG_SLOPE = 0.01  # nn.LeakyReLU default negative_slope
BN_EPS = 1e-5


def _leaky(x):
    return jnp.where(x >= 0, x, NEG_SLOPE * x)


def bottleneck_kernel(W, TH, x_ref, xt_ref, xb_ref, w1_ref, w2_ref, w3_ref,
                      b1_ref, b2_ref, b3_ref, o_ref, pad_ref):
    """One (image n, row-block h) step.

    x_ref : (1, TH*W, Cin) bf16   current row-block (also the residual)
    xt_ref: (1, W, Cin)     bf16   image row just above the block (clamped)
    xb_ref: (1, W, Cin)     bf16   image row just below the block (clamped)
    pad_ref: (base + (TH+2)*W + 16, P) bf16 scratch holding the conv1 output
             of the TH rows plus the two halo rows, flattened row-major.
    """
    P = w1_ref.shape[1]
    HW = TH * W
    base = 16                    # slack rows before the staged region (>= 1)
    ib = base + W                # start of the TH interior rows in the scratch

    h = pl.program_id(1)
    last_h = pl.num_programs(1) - 1

    # --- conv1 (1x1, BN1 scale folded into w1) + bias + LeakyReLU ------------
    xc = x_ref[0]                                              # (HW, Cin) bf16
    t1 = jnp.dot(xc, w1_ref[...], preferred_element_type=jnp.float32)
    t1 = _leaky(t1 + b1_ref[...])                              # (HW, P) f32

    # Halo rows: conv1 of the neighbouring image rows.
    t1_top = _leaky(jnp.dot(xt_ref[0], w1_ref[...],
                            preferred_element_type=jnp.float32) + b1_ref[...])
    t1_bot = _leaky(jnp.dot(xb_ref[0], w1_ref[...],
                            preferred_element_type=jnp.float32) + b1_ref[...])

    # --- stage conv1 output (+ halo rows) into the bf16 VMEM scratch ---------
    pad_ref[ib:ib + HW, :] = t1.astype(pad_ref.dtype)

    @pl.when(h != 0)
    def _():
        pad_ref[base:ib, :] = t1_top.astype(pad_ref.dtype)

    @pl.when(h == 0)                       # image top edge -> zero padding row
    def _():
        pad_ref[base:ib, :] = jnp.zeros((W, P), pad_ref.dtype)

    @pl.when(h != last_h)
    def _():
        pad_ref[ib + HW:ib + HW + W, :] = t1_bot.astype(pad_ref.dtype)

    @pl.when(h == last_h)                  # image bottom edge -> zero padding
    def _():
        pad_ref[ib + HW:ib + HW + W, :] = jnp.zeros((W, P), pad_ref.dtype)

    # --- conv2 (3x3, stride=1, pad=1) as ONE stacked matmul ------------------
    # Tap (dh, dw) is the contiguous slice of the staged region starting at
    # ib + dh*W + dw; row padding is handled by the halo rows above, only the
    # dw != 0 taps need a left/right column-edge mask.
    idx = jax.lax.broadcasted_iota(jnp.int32, (HW, 1), 0)
    if (W & (W - 1)) == 0:                                     # power-of-two W
        col = jnp.bitwise_and(idx, W - 1)
    else:
        col = jax.lax.rem(idx, jnp.full_like(idx, W))
    not_left = col != 0
    not_right = col != (W - 1)
    zero = jnp.zeros((), pad_ref.dtype)

    taps = []
    for dh in (-1, 0, 1):
        for dw in (-1, 0, 1):
            start = ib + dh * W + dw
            t = pad_ref[start:start + HW, :]                   # (HW, P) bf16
            if dw == -1:
                t = jnp.where(not_left, t, zero)
            elif dw == 1:
                t = jnp.where(not_right, t, zero)
            taps.append(t)
    lhs = jnp.concatenate(taps, axis=1)                        # (HW, 9P) bf16

    acc = jnp.dot(lhs, w2_ref[...], preferred_element_type=jnp.float32)
    t2 = _leaky(acc + b2_ref[...])                             # (HW, P) f32

    # --- conv3 (1x1) + bias + residual + LeakyReLU ----------------------------
    t3 = jnp.dot(t2.astype(jnp.bfloat16), w3_ref[...],
                 preferred_element_type=jnp.float32) + b3_ref[...]
    # Residual re-read late from the input ref; bf16 -> f32 in-register.
    o_ref[0] = _leaky(t3 + x_ref[0].astype(jnp.float32)).astype(o_ref.dtype)


def bottleneck_forward(x_nhwc, params, tile_h=8):
    """x_nhwc: (N, H, W, Cin) activations (cast to bf16 at the HBM boundary).
    Returns (N, H, W, 4*planes) bf16."""
    N, H, W, Cin = x_nhwc.shape
    P = params["w1"].shape[1]
    C4 = 4 * P
    assert Cin == C4, "downsample=None requires inplanes == planes * 4"
    assert H % tile_h == 0, "demo requires H divisible by tile_h"
    TH = tile_h
    HB = H // TH
    HW_blk = TH * W

    # bf16 activations at the HBM boundary; dim-merging reshape is free.
    x2 = x_nhwc.astype(jnp.bfloat16).reshape(N, H * W, Cin)

    base = 16
    pad_rows = base + (TH + 2) * W + 16

    def full(arr):
        shape = arr.shape
        return pl.BlockSpec(shape, lambda n, h, _s=shape: (0,) * len(_s))

    kernel = functools.partial(bottleneck_kernel, W, TH)

    out2 = pl.pallas_call(
        kernel,
        out_shape=jax.ShapeDtypeStruct((N, H * W, C4), jnp.bfloat16),
        grid=(N, HB),
        in_specs=[
            # current row-block (also the residual)
            pl.BlockSpec((1, HW_blk, Cin), lambda n, h: (n, h, 0)),
            # single image row above / below the block (clamped at the edges;
            # the kernel overwrites the edge case with zero padding rows).
            pl.BlockSpec((1, W, Cin),
                         lambda n, h: (n, jnp.maximum(h * TH - 1, 0), 0)),
            pl.BlockSpec((1, W, Cin),
                         lambda n, h: (n, jnp.minimum((h + 1) * TH, H - 1), 0)),
            full(params["w1"]), full(params["w2"]), full(params["w3"]),
            full(params["b1"]), full(params["b2"]), full(params["b3"]),
        ],
        out_specs=pl.BlockSpec((1, HW_blk, C4), lambda n, h: (n, h, 0)),
        scratch_shapes=[pltpu.VMEM((pad_rows, P), jnp.bfloat16)],
        compiler_params=pltpu.CompilerParams(
            dimension_semantics=("parallel", "parallel"),
            vmem_limit_bytes=32 * 1024 * 1024),
    )(x2, x2, x2, params["w1"], params["w2"], params["w3"],
      params["b1"], params["b2"], params["b3"])

    return out2.reshape(N, H, W, C4)


def init_params(key, inplanes, planes):
    P, C4 = planes, planes * 4
    ks = jax.random.split(key, 15)
    w1_t = 0.2 * jax.random.normal(ks[0], (P, inplanes, 1, 1), jnp.float32)
    w2_t = 0.2 * jax.random.normal(ks[1], (P, P, 3, 3), jnp.float32)
    w3_t = 0.2 * jax.random.normal(ks[2], (C4, P, 1, 1), jnp.float32)

    def make_bn(k0, k1, k2, k3, c):
        gamma = 1.0 + 0.1 * jax.random.normal(k0, (c,), jnp.float32)
        beta = 0.1 * jax.random.normal(k1, (c,), jnp.float32)
        mean = 0.1 * jax.random.normal(k2, (c,), jnp.float32)
        var = 0.5 + jax.random.uniform(k3, (c,), jnp.float32)
        scale = gamma / jnp.sqrt(var + BN_EPS)
        shift = beta - mean * scale
        return (gamma, beta, mean, var), scale, shift

    bn1, s1, sh1 = make_bn(ks[3], ks[4], ks[5], ks[6], P)
    bn2, s2, sh2 = make_bn(ks[7], ks[8], ks[9], ks[10], P)
    bn3, s3, sh3 = make_bn(ks[11], ks[12], ks[13], ks[14], C4)

    # Fold the BN scales into the conv weights (f32 math), then cast to bf16.
    w1 = (jnp.transpose(w1_t[:, :, 0, 0]) * s1[None, :]).astype(jnp.bfloat16)
    w2 = (jnp.transpose(w2_t, (2, 3, 1, 0)).reshape(9 * P, P)   # (kh,kw,in)->rows
          * s2[None, :]).astype(jnp.bfloat16)
    w3 = (jnp.transpose(w3_t[:, :, 0, 0]) * s3[None, :]).astype(jnp.bfloat16)

    return {
        # torch-layout weights (OIHW) + raw BN stats for the faithful reference
        "w1_t": w1_t, "w2_t": w2_t, "w3_t": w3_t,
        "bn1": bn1, "bn2": bn2, "bn3": bn3,
        # kernel-layout folded bf16 weights + f32 bias shifts
        "w1": w1, "w2": w2, "w3": w3,
        "b1": sh1.reshape(1, P), "b2": sh2.reshape(1, P),
        "b3": sh3.reshape(1, C4),
    }


def reference_forward_matched(x_bf16, p):
    """Precision-matched NHWC reference: same folded bf16 weights, bf16 matmul
    operands, f32 accumulation.  Validates the Pallas tap/mask/halo logic."""
    P = p["w1"].shape[1]
    t1 = jnp.einsum("nhwc,cp->nhwp", x_bf16, p["w1"],
                    preferred_element_type=jnp.float32)
    t1 = _leaky(t1 + p["b1"].reshape(P))
    w2 = p["w2"].reshape(3, 3, P, P)                            # HWIO
    t2 = jax.lax.conv_general_dilated(
        t1.astype(jnp.bfloat16), w2, (1, 1), [(1, 1), (1, 1)],
        dimension_numbers=("NHWC", "HWIO", "NHWC"),
        preferred_element_type=jnp.float32)
    t2 = _leaky(t2 + p["b2"].reshape(P))
    t3 = jnp.einsum("nhwp,pc->nhwc", t2.astype(jnp.bfloat16), p["w3"],
                    preferred_element_type=jnp.float32)
    t3 = t3 + p["b3"].reshape(4 * P)
    return _leaky(t3 + x_bf16.astype(jnp.float32))


def reference_forward_f32(x, p):
    """Faithful f32 Bottleneck (conv -> BN(stats) -> leaky) in NHWC."""
    def conv(v, w_oihw, pad):
        w = jnp.transpose(w_oihw, (2, 3, 1, 0))                 # OIHW -> HWIO
        return jax.lax.conv_general_dilated(
            v, w, (1, 1), [(pad, pad), (pad, pad)],
            dimension_numbers=("NHWC", "HWIO", "NHWC"))

    def bn(v, gbmv):
        gamma, beta, mean, var = gbmv
        inv = gamma / jnp.sqrt(var + BN_EPS)
        return (v - mean) * inv + beta

    out = _leaky(bn(conv(x, p["w1_t"], 0), p["bn1"]))
    out = _leaky(bn(conv(out, p["w2_t"], 1), p["bn2"]))
    out = bn(conv(out, p["w3_t"], 0), p["bn3"])
    return _leaky(out + x)


if __name__ == "__main__":
    key = jax.random.PRNGKey(0)
    kx, kp = jax.random.split(key)

    N, H, W = 2, 16, 16
    planes = 32                 # demo size; production tuning should use >=64
    inplanes = planes * 4       # downsample=None => residual channels must match

    x_f32 = jax.random.normal(kx, (N, H, W, inplanes), jnp.float32)
    x = x_f32.astype(jnp.bfloat16)          # bf16 activations at HBM boundary
    params = init_params(kp, inplanes, planes)

    out = jax.block_until_ready(bottleneck_forward(x, params, tile_h=8))
    out_f32 = np.asarray(out.astype(jnp.float32))

    # 1) Tight check vs a precision-matched (bf16-matmul, folded-weight)
    #    reference, itself cast to the kernel's bf16 output precision.
    ref_m = reference_forward_matched(x, params)
    ref_m = ref_m.astype(jnp.bfloat16).astype(jnp.float32)
    np.testing.assert_allclose(out_f32, np.asarray(ref_m),
                               rtol=1e-2, atol=5e-2)

    # 2) Coarse sanity check vs the faithful f32 module (bounds bf16 drift and
    #    validates the BN scale/shift folding against running-stat BN).
    with jax.default_matmul_precision("highest"):
        ref_f = reference_forward_f32(x.astype(jnp.float32), params)
    np.testing.assert_allclose(out_f32, np.asarray(ref_f),
                               rtol=1e-1, atol=5e-1)

    print("KERNEL_OK")
</pallas_src>

<mosaic_0001>
module attributes {stable_mosaic.version = 11 : i64} {
  func.func @bottleneck_kernel(%arg0: i32, %arg1: i32, %arg2: memref<1x128x128xbf16, #tpu.memory_space<vmem>>, %arg3: memref<1x16x128xbf16, #tpu.memory_space<vmem>>, %arg4: memref<1x16x128xbf16, #tpu.memory_space<vmem>>, %arg5: memref<128x32xbf16, #tpu.memory_space<vmem>>, %arg6: memref<288x32xbf16, #tpu.memory_space<vmem>>, %arg7: memref<32x128xbf16, #tpu.memory_space<vmem>>, %arg8: memref<1x32xf32, #tpu.memory_space<vmem>>, %arg9: memref<1x32xf32, #tpu.memory_space<vmem>>, %arg10: memref<1x128xf32, #tpu.memory_space<vmem>>, %arg11: memref<1x128x128xbf16, #tpu.memory_space<vmem>>, %arg12: memref<192x32xbf16, #tpu.memory_space<vmem>>) attributes {dimension_semantics = [#tpu.dimension_semantics<parallel>, #tpu.dimension_semantics<parallel>], iteration_bounds = array<i64: 2, 2>, scalar_prefetch = 0 : i64, scratch_operands = 1 : i64, tpu.core_type = #tpu.core_type<tc>, window_params = [{transform_indices = @transform_0, window_bounds = array<i64: 1, 128, 128>}, {transform_indices = @transform_1, window_bounds = array<i64: 1, 16, 128>}, {transform_indices = @transform_2, window_bounds = array<i64: 1, 16, 128>}, {pipeline_mode = #tpu.pipeline_mode<synchronous>, transform_indices = @transform_3, window_bounds = array<i64: 128, 32>}, {pipeline_mode = #tpu.pipeline_mode<synchronous>, transform_indices = @transform_4, window_bounds = array<i64: 288, 32>}, {pipeline_mode = #tpu.pipeline_mode<synchronous>, transform_indices = @transform_5, window_bounds = array<i64: 32, 128>}, {pipeline_mode = #tpu.pipeline_mode<synchronous>, transform_indices = @transform_6, window_bounds = array<i64: 1, 32>}, {pipeline_mode = #tpu.pipeline_mode<synchronous>, transform_indices = @transform_7, window_bounds = array<i64: 1, 32>}, {pipeline_mode = #tpu.pipeline_mode<synchronous>, transform_indices = @transform_8, window_bounds = array<i64: 1, 128>}, {transform_indices = @transform_9, window_bounds = array<i64: 1, 128, 128>}]} {
    %c0 = arith.constant 0 : index
    %c0_0 = arith.constant 0 : index
    %c0_1 = arith.constant 0 : index
    %0 = vector.load %arg2[%c0, %c0_0, %c0_1] : memref<1x128x128xbf16, #tpu.memory_space<vmem>>, vector<1x128x128xbf16>
    %1 = vector.shape_cast %0 : vector<1x128x128xbf16> to vector<128x128xbf16>
    %c0_2 = arith.constant 0 : index
    %c0_3 = arith.constant 0 : index
    %2 = vector.load %arg5[%c0_2, %c0_3] : memref<128x32xbf16, #tpu.memory_space<vmem>>, vector<128x32xbf16>
    %cst = arith.constant dense<0.000000e+00> : vector<128x32xf32>
    %3 = tpu.matmul %1, %2, %cst {dimension_numbers = #tpu.dot_dimension_numbers<[1], [0], [0], [1], [0, 0, 1, 1], [], []>} : vector<128x128xbf16>, vector<128x32xbf16>, vector<128x32xf32> -> vector<128x32xf32>
    %c0_4 = arith.constant 0 : index
    %c0_5 = arith.constant 0 : index
    %4 = vector.load %arg8[%c0_4, %c0_5] : memref<1x32xf32, #tpu.memory_space<vmem>>, vector<1x32xf32>
    %5 = vector.broadcast %4 : vector<1x32xf32> to vector<128x32xf32>
    %6 = arith.addf %3, %5 : vector<128x32xf32>
    %cst_6 = arith.constant 0.000000e+00 : f32
    %7 = vector.broadcast %cst_6 : f32 to vector<128x32xf32>
    %8 = arith.cmpf oge, %6, %7 : vector<128x32xf32>
    %cst_7 = arith.constant 0.00999999977 : f32
    %9 = vector.broadcast %cst_7 : f32 to vector<128x32xf32>
    %10 = arith.mulf %9, %6 : vector<128x32xf32>
    %11 = arith.select %8, %6, %10 : vector<128x32xi1>, vector<128x32xf32>
    %c0_8 = arith.constant 0 : index
    %c0_9 = arith.constant 0 : index
    %c0_10 = arith.constant 0 : index
    %12 = vector.load %arg3[%c0_8, %c0_9, %c0_10] : memref<1x16x128xbf16, #tpu.memory_space<vmem>>, vector<1x16x128xbf16>
    %13 = vector.shape_cast %12 : vector<1x16x128xbf16> to vector<16x128xbf16>
    %c0_11 = arith.constant 0 : index
    %c0_12 = arith.constant 0 : index
    %14 = vector.load %arg5[%c0_11, %c0_12] : memref<128x32xbf16, #tpu.memory_space<vmem>>, vector<128x32xbf16>
    %cst_13 = arith.constant dense<0.000000e+00> : vector<16x32xf32>
    %15 = tpu.matmul %13, %14, %cst_13 {dimension_numbers = #tpu.dot_dimension_numbers<[1], [0], [0], [1], [0, 0, 1, 1], [], []>} : vector<16x128xbf16>, vector<128x32xbf16>, vector<16x32xf32> -> vector<16x32xf32>
    %c0_14 = arith.constant 0 : index
    %c0_15 = arith.constant 0 : index
    %16 = vector.load %arg8[%c0_14, %c0_15] : memref<1x32xf32, #tpu.memory_space<vmem>>, vector<1x32xf32>
    %17 = vector.broadcast %16 : vector<1x32xf32> to vector<16x32xf32>
    %18 = arith.addf %15, %17 : vector<16x32xf32>
    %cst_16 = arith.constant 0.000000e+00 : f32
    %19 = vector.broadcast %cst_16 : f32 to vector<16x32xf32>
    %20 = arith.cmpf oge, %18, %19 : vector<16x32xf32>
    %cst_17 = arith.constant 0.00999999977 : f32
    %21 = vector.broadcast %cst_17 : f32 to vector<16x32xf32>
    %22 = arith.mulf %21, %18 : vector<16x32xf32>
    %23 = arith.select %20, %18, %22 : vector<16x32xi1>, vector<16x32xf32>
    %c0_18 = arith.constant 0 : index
    %c0_19 = arith.constant 0 : index
    %c0_20 = arith.constant 0 : index
    %24 = vector.load %arg4[%c0_18, %c0_19, %c0_20] : memref<1x16x128xbf16, #tpu.memory_space<vmem>>, vector<1x16x128xbf16>
    %25 = vector.shape_cast %24 : vector<1x16x128xbf16> to vector<16x128xbf16>
    %c0_21 = arith.constant 0 : index
    %c0_22 = arith.constant 0 : index
    %26 = vector.load %arg5[%c0_21, %c0_22] : memref<128x32xbf16, #tpu.memory_space<vmem>>, vector<128x32xbf16>
    %cst_23 = arith.constant dense<0.000000e+00> : vector<16x32xf32>
    %27 = tpu.matmul %25, %26, %cst_23 {dimension_numbers = #tpu.dot_dimension_numbers<[1], [0], [0], [1], [0, 0, 1, 1], [], []>} : vector<16x128xbf16>, vector<128x32xbf16>, vector<16x32xf32> -> vector<16x32xf32>
    %c0_24 = arith.constant 0 : index
    %c0_25 = arith.constant 0 : index
    %28 = vector.load %arg8[%c0_24, %c0_25] : memref<1x32xf32, #tpu.memory_space<vmem>>, vector<1x32xf32>
    %29 = vector.broadcast %28 : vector<1x32xf32> to vector<16x32xf32>
    %30 = arith.addf %27, %29 : vector<16x32xf32>
    %cst_26 = arith.constant 0.000000e+00 : f32
    %31 = vector.broadcast %cst_26 : f32 to vector<16x32xf32>
    %32 = arith.cmpf oge, %30, %31 : vector<16x32xf32>
    %cst_27 = arith.constant 0.00999999977 : f32
    %33 = vector.broadcast %cst_27 : f32 to vector<16x32xf32>
    %34 = arith.mulf %33, %30 : vector<16x32xf32>
    %35 = arith.select %32, %30, %34 : vector<16x32xi1>, vector<16x32xf32>
    %36 = arith.truncf %11 : vector<128x32xf32> to vector<128x32xbf16>
    %c32 = arith.constant 32 : index
    %c0_28 = arith.constant 0 : index
    %37 = vector.load %arg12[%c32, %c0_28] : memref<192x32xbf16, #tpu.memory_space<vmem>>, vector<128x32xbf16>
    tpu.vector_store %arg12[%c32, %c0_28], %36 {strides = array<i32>} : memref<192x32xbf16, #tpu.memory_space<vmem>>, vector<128x32xbf16>,
    %c0_i32 = arith.constant 0 : i32
    %38 = arith.cmpi ne, %arg1, %c0_i32 : i32
    %39 = arith.extui %38 : i1 to i32
    %c0_i32_29 = arith.constant 0 : i32
    %40 = arith.cmpi ne, %39, %c0_i32_29 : i32
    scf.if %40 {
      %120 = arith.truncf %23 : vector<16x32xf32> to vector<16x32xbf16>
      %c16_73 = arith.constant 16 : index
      %c0_74 = arith.constant 0 : index
      %121 = vector.load %arg12[%c16_73, %c0_74] : memref<192x32xbf16, #tpu.memory_space<vmem>>, vector<16x32xbf16>
      tpu.vector_store %arg12[%c16_73, %c0_74], %120 {strides = array<i32>} : memref<192x32xbf16, #tpu.memory_space<vmem>>, vector<16x32xbf16>,
    } else {
    }
    %c0_i32_30 = arith.constant 0 : i32
    %41 = arith.cmpi eq, %arg1, %c0_i32_30 : i32
    %42 = arith.extui %41 : i1 to i32
    %c0_i32_31 = arith.constant 0 : i32
    %43 = arith.cmpi ne, %42, %c0_i32_31 : i32
    scf.if %43 {
      %cst_73 = arith.constant 0.000000e+00 : bf16
      %120 = vector.broadcast %cst_73 : bf16 to vector<16x32xbf16>
      %c16_74 = arith.constant 16 : index
      %c0_75 = arith.constant 0 : index
      %121 = vector.load %arg12[%c16_74, %c0_75] : memref<192x32xbf16, #tpu.memory_space<vmem>>, vector<16x32xbf16>
      tpu.vector_store %arg12[%c16_74, %c0_75], %120 {strides = array<i32>} : memref<192x32xbf16, #tpu.memory_space<vmem>>, vector<16x32xbf16>,
    } else {
    }
    %c1_i32 = arith.constant 1 : i32
    %44 = arith.cmpi ne, %arg1, %c1_i32 : i32
    %45 = arith.extui %44 : i1 to i32
    %c0_i32_32 = arith.constant 0 : i32
    %46 = arith.cmpi ne, %45, %c0_i32_32 : i32
    scf.if %46 {
      %120 = arith.truncf %35 : vector<16x32xf32> to vector<16x32xbf16>
      %c160 = arith.constant 160 : index
      %c0_73 = arith.constant 0 : index
      %121 = vector.load %arg12[%c160, %c0_73] : memref<192x32xbf16, #tpu.memory_space<vmem>>, vector<16x32xbf16>
      tpu.vector_store %arg12[%c160, %c0_73], %120 {strides = array<i32>} : memref<192x32xbf16, #tpu.memory_space<vmem>>, vector<16x32xbf16>,
    } else {
    }
    %c1_i32_33 = arith.constant 1 : i32
    %47 = arith.cmpi eq, %arg1, %c1_i32_33 : i32
    %48 = arith.extui %47 : i1 to i32
    %c0_i32_34 = arith.constant 0 : i32
    %49 = arith.cmpi ne, %48, %c0_i32_34 : i32
    scf.if %49 {
      %cst_73 = arith.constant 0.000000e+00 : bf16
      %120 = vector.broadcast %cst_73 : bf16 to vector<16x32xbf16>
      %c160 = arith.constant 160 : index
      %c0_74 = arith.constant 0 : index
      %121 = vector.load %arg12[%c160, %c0_74] : memref<192x32xbf16, #tpu.memory_space<vmem>>, vector<16x32xbf16>
      tpu.vector_store %arg12[%c160, %c0_74], %120 {strides = array<i32>} : memref<192x32xbf16, #tpu.memory_space<vmem>>, vector<16x32xbf16>,
    } else {
    }
    %50 = tpu.iota {dimensions = array<i32: 0>} : vector<128x1xi32>
    %c15_i32 = arith.constant 15 : i32
    %51 = vector.broadcast %c15_i32 : i32 to vector<128x1xi32>
    %52 = arith.andi %50, %51 : vector<128x1xi32>
    %c0_i32_35 = arith.constant 0 : i32
    %53 = vector.broadcast %c0_i32_35 : i32 to vector<128x1xi32>
    %54 = arith.cmpi ne, %52, %53 : vector<128x1xi32>
    %c15_i32_36 = arith.constant 15 : i32
    %55 = vector.broadcast %c15_i32_36 : i32 to vector<128x1xi32>
    %56 = arith.cmpi ne, %52, %55 : vector<128x1xi32>
    %c15 = arith.constant 15 : index
    %c0_37 = arith.constant 0 : index
    %57 = vector.load %arg12[%c15, %c0_37] : memref<192x32xbf16, #tpu.memory_space<vmem>>, vector<128x32xbf16>
    %cst_38 = arith.constant 0.000000e+00 : bf16
    %58 = vector.shape_cast %54 : vector<128x1xi1> to vector<128x1xi1>
    %59 = vector.broadcast %58 : vector<128x1xi1> to vector<128x32xi1>
    %60 = vector.broadcast %cst_38 : bf16 to vector<128x32xbf16>
    %61 = arith.select %59, %57, %60 : vector<128x32xi1>, vector<128x32xbf16>
    %c16 = arith.constant 16 : index
    %c0_39 = arith.constant 0 : index
    %62 = vector.load %arg12[%c16, %c0_39] : memref<192x32xbf16, #tpu.memory_space<vmem>>, vector<128x32xbf16>
    %c17 = arith.constant 17 : index
    %c0_40 = arith.constant 0 : index
    %63 = vector.load %arg12[%c17, %c0_40] : memref<192x32xbf16, #tpu.memory_space<vmem>>, vector<128x32xbf16>
    %cst_41 = arith.constant 0.000000e+00 : bf16
    %64 = vector.shape_cast %56 : vector<128x1xi1> to vector<128x1xi1>
    %65 = vector.broadcast %64 : vector<128x1xi1> to vector<128x32xi1>
    %66 = vector.broadcast %cst_41 : bf16 to vector<128x32xbf16>
    %67 = arith.select %65, %63, %66 : vector<128x32xi1>, vector<128x32xbf16>
    %c31 = arith.constant 31 : index
    %c0_42 = arith.constant 0 : index
    %68 = vector.load %arg12[%c31, %c0_42] : memref<192x32xbf16, #tpu.memory_space<vmem>>, vector<128x32xbf16>
    %cst_43 = arith.constant 0.000000e+00 : bf16
    %69 = vector.shape_cast %54 : vector<128x1xi1> to vector<128x1xi1>
    %70 = vector.broadcast %69 : vector<128x1xi1> to vector<128x32xi1>
    %71 = vector.broadcast %cst_43 : bf16 to vector<128x32xbf16>
    %72 = arith.select %70, %68, %71 : vector<128x32xi1>, vector<128x32xbf16>
    %c32_44 = arith.constant 32 : index
    %c0_45 = arith.constant 0 : index
    %73 = vector.load %arg12[%c32_44, %c0_45] : memref<192x32xbf16, #tpu.memory_space<vmem>>, vector<128x32xbf16>
    %c33 = arith.constant 33 : index
    %c0_46 = arith.constant 0 : index
    %74 = vector.load %arg12[%c33, %c0_46] : memref<192x32xbf16, #tpu.memory_space<vmem>>, vector<128x32xbf16>
    %cst_47 = arith.constant 0.000000e+00 : bf16
    %75 = vector.shape_cast %56 : vector<128x1xi1> to vector<128x1xi1>
    %76 = vector.broadcast %75 : vector<128x1xi1> to vector<128x32xi1>
    %77 = vector.broadcast %cst_47 : bf16 to vector<128x32xbf16>
    %78 = arith.select %76, %74, %77 : vector<128x32xi1>, vector<128x32xbf16>
    %c47 = arith.constant 47 : index
    %c0_48 = arith.constant 0 : index
    %79 = vector.load %arg12[%c47, %c0_48] : memref<192x32xbf16, #tpu.memory_space<vmem>>, vector<128x32xbf16>
    %cst_49 = arith.constant 0.000000e+00 : bf16
    %80 = vector.shape_cast %54 : vector<128x1xi1> to vector<128x1xi1>
    %81 = vector.broadcast %80 : vector<128x1xi1> to vector<128x32xi1>
    %82 = vector.broadcast %cst_49 : bf16 to vector<128x32xbf16>
    %83 = arith.select %81, %79, %82 : vector<128x32xi1>, vector<128x32xbf16>
    %c48 = arith.constant 48 : index
    %c0_50 = arith.constant 0 : index
    %84 = vector.load %arg12[%c48, %c0_50] : memref<192x32xbf16, #tpu.memory_space<vmem>>, vector<128x32xbf16>
    %c49 = arith.constant 49 : index
    %c0_51 = arith.constant 0 : index
    %85 = vector.load %arg12[%c49, %c0_51] : memref<192x32xbf16, #tpu.memory_space<vmem>>, vector<128x32xbf16>
    %cst_52 = arith.constant 0.000000e+00 : bf16
    %86 = vector.shape_cast %56 : vector<128x1xi1> to vector<128x1xi1>
    %87 = vector.broadcast %86 : vector<128x1xi1> to vector<128x32xi1>
    %88 = vector.broadcast %cst_52 : bf16 to vector<128x32xbf16>
    %89 = arith.select %87, %85, %88 : vector<128x32xi1>, vector<128x32xbf16>
    %90 = tpu.concatenate %61, %62, %67, %72, %73, %78, %83, %84, %89 in 1 : vector<128x32xbf16>, vector<128x32xbf16>, vector<128x32xbf16>, vector<128x32xbf16>, vector<128x32xbf16>, vector<128x32xbf16>, vector<128x32xbf16>, vector<128x32xbf16>, vector<128x32xbf16> -> vector<128x288xbf16>
    %c0_53 = arith.constant 0 : index
    %c0_54 = arith.constant 0 : index
    %91 = vector.load %arg6[%c0_53, %c0_54] : memref<288x32xbf16, #tpu.memory_space<vmem>>, vector<288x32xbf16>
    %cst_55 = arith.constant dense<0.000000e+00> : vector<128x32xf32>
    %92 = tpu.matmul %90, %91, %cst_55 {dimension_numbers = #tpu.dot_dimension_numbers<[1], [0], [0], [1], [0, 0, 1, 1], [], []>} : vector<128x288xbf16>, vector<288x32xbf16>, vector<128x32xf32> -> vector<128x32xf32>
    %c0_56 = arith.constant 0 : index
    %c0_57 = arith.constant 0 : index
    %93 = vector.load %arg9[%c0_56, %c0_57] : memref<1x32xf32, #tpu.memory_space<vmem>>, vector<1x32xf32>
    %94 = vector.broadcast %93 : vector<1x32xf32> to vector<128x32xf32>
    %95 = arith.addf %92, %94 : vector<128x32xf32>
    %cst_58 = arith.constant 0.000000e+00 : f32
    %96 = vector.broadcast %cst_58 : f32 to vector<128x32xf32>
    %97 = arith.cmpf oge, %95, %96 : vector<128x32xf32>
    %cst_59 = arith.constant 0.00999999977 : f32
    %98 = vector.broadcast %cst_59 : f32 to vector<128x32xf32>
    %99 = arith.mulf %98, %95 : vector<128x32xf32>
    %100 = arith.select %97, %95, %99 : vector<128x32xi1>, vector<128x32xf32>
    %101 = arith.truncf %100 : vector<128x32xf32> to vector<128x32xbf16>
    %c0_60 = arith.constant 0 : index
    %c0_61 = arith.constant 0 : index
    %102 = vector.load %arg7[%c0_60, %c0_61] : memref<32x128xbf16, #tpu.memory_space<vmem>>, vector<32x128xbf16>
    %cst_62 = arith.constant dense<0.000000e+00> : vector<128x128xf32>
    %103 = tpu.matmul %101, %102, %cst_62 {dimension_numbers = #tpu.dot_dimension_numbers<[1], [0], [0], [1], [0, 0, 1, 1], [], []>} : vector<128x32xbf16>, vector<32x128xbf16>, vector<128x128xf32> -> vector<128x128xf32>
    %c0_63 = arith.constant 0 : index
    %c0_64 = arith.constant 0 : index
    %104 = vector.load %arg10[%c0_63, %c0_64] : memref<1x128xf32, #tpu.memory_space<vmem>>, vector<1x128xf32>
    %105 = vector.broadcast %104 : vector<1x128xf32> to vector<128x128xf32>
    %106 = arith.addf %103, %105 : vector<128x128xf32>
    %c0_65 = arith.constant 0 : index
    %c0_66 = arith.constant 0 : index
    %c0_67 = arith.constant 0 : index
    %107 = vector.load %arg2[%c0_65, %c0_66, %c0_67] : memref<1x128x128xbf16, #tpu.memory_space<vmem>>, vector<1x128x128xbf16>
    %108 = vector.shape_cast %107 : vector<1x128x128xbf16> to vector<128x128xbf16>
    %109 = arith.extf %108 : vector<128x128xbf16> to vector<128x128xf32>
    %110 = arith.addf %106, %109 : vector<128x128xf32>
    %cst_68 = arith.constant 0.000000e+00 : f32
    %111 = vector.broadcast %cst_68 : f32 to vector<128x128xf32>
    %112 = arith.cmpf oge, %110, %111 : vector<128x128xf32>
    %cst_69 = arith.constant 0.00999999977 : f32
    %113 = vector.broadcast %cst_69 : f32 to vector<128x128xf32>
    %114 = arith.mulf %113, %110 : vector<128x128xf32>
    %115 = arith.select %112, %110, %114 : vector<128x128xi1>, vector<128x128xf32>
    %116 = arith.truncf %115 : vector<128x128xf32> to vector<128x128xbf16>
    %c0_70 = arith.constant 0 : index
    %c0_71 = arith.constant 0 : index
    %c0_72 = arith.constant 0 : index
    %117 = vector.load %arg11[%c0_70, %c0_71, %c0_72] : memref<1x128x128xbf16, #tpu.memory_space<vmem>>, vector<1x128x128xbf16>
    %118 = vector.shape_cast %117 : vector<1x128x128xbf16> to vector<128x128xbf16>
    %119 = vector.shape_cast %116 : vector<128x128xbf16> to vector<1x128x128xbf16>
    tpu.vector_store %arg11[%c0_70, %c0_71, %c0_72], %119 {strides = array<i32>} : memref<1x128x128xbf16, #tpu.memory_space<vmem>>, vector<1x128x128xbf16>,
    return
  }
  func.func @transform_0(%arg0: i32, %arg1: i32) -> (i32, i32, i32) {
    %c0_i32 = arith.constant 0 : i32
    %c0_i32_0 = arith.constant 0 : i32
    return %arg0, %arg1, %c0_i32 : i32, i32, i32
  }
  func.func @transform_1(%arg0: i32, %arg1: i32) -> (i32, i32, i32) {
    %c8_i32 = arith.constant 8 : i32
    %0 = arith.muli %arg1, %c8_i32 : i32
    %c1_i32 = arith.constant 1 : i32
    %1 = arith.subi %0, %c1_i32 : i32
    %c0_i32 = arith.constant 0 : i32
    %2 = arith.maxsi %1, %c0_i32 : i32
    %c0_i32_0 = arith.constant 0 : i32
    %c0_i32_1 = arith.constant 0 : i32
    return %arg0, %2, %c0_i32_0 : i32, i32, i32
  }
  func.func @transform_2(%arg0: i32, %arg1: i32) -> (i32, i32, i32) {
    %c1_i32 = arith.constant 1 : i32
    %0 = arith.addi %arg1, %c1_i32 : i32
    %c8_i32 = arith.constant 8 : i32
    %1 = arith.muli %0, %c8_i32 : i32
    %c15_i32 = arith.constant 15 : i32
    %2 = arith.minsi %1, %c15_i32 : i32
    %c0_i32 = arith.constant 0 : i32
    %c0_i32_0 = arith.constant 0 : i32
    return %arg0, %2, %c0_i32 : i32, i32, i32
  }
  func.func @transform_3(%arg0: i32, %arg1: i32) -> (i32, i32) {
    %c0_i32 = arith.constant 0 : i32
    %c0_i32_0 = arith.constant 0 : i32
    %c0_i32_1 = arith.constant 0 : i32
    return %c0_i32, %c0_i32_0 : i32, i32
  }
  func.func @transform_4(%arg0: i32, %arg1: i32) -> (i32, i32) {
    %c0_i32 = arith.constant 0 : i32
    %c0_i32_0 = arith.constant 0 : i32
    %c0_i32_1 = arith.constant 0 : i32
    return %c0_i32, %c0_i32_0 : i32, i32
  }
  func.func @transform_5(%arg0: i32, %arg1: i32) -> (i32, i32) {
    %c0_i32 = arith.constant 0 : i32
    %c0_i32_0 = arith.constant 0 : i32
    %c0_i32_1 = arith.constant 0 : i32
    return %c0_i32, %c0_i32_0 : i32, i32
  }
  func.func @transform_6(%arg0: i32, %arg1: i32) -> (i32, i32) {
    %c0_i32 = arith.constant 0 : i32
    %c0_i32_0 = arith.constant 0 : i32
    %c0_i32_1 = arith.constant 0 : i32
    return %c0_i32, %c0_i32_0 : i32, i32
  }
  func.func @transform_7(%arg0: i32, %arg1: i32) -> (i32, i32) {
    %c0_i32 = arith.constant 0 : i32
    %c0_i32_0 = arith.constant 0 : i32
    %c0_i32_1 = arith.constant 0 : i32
    return %c0_i32, %c0_i32_0 : i32, i32
  }
  func.func @transform_8(%arg0: i32, %arg1: i32) -> (i32, i32) {
    %c0_i32 = arith.constant 0 : i32
    %c0_i32_0 = arith.constant 0 : i32
    %c0_i32_1 = arith.constant 0 : i32
    return %c0_i32, %c0_i32_0 : i32, i32
  }
  func.func @transform_9(%arg0: i32, %arg1: i32) -> (i32, i32, i32) {
    %c0_i32 = arith.constant 0 : i32
    %c0_i32_0 = arith.constant 0 : i32
    return %arg0, %arg1, %c0_i32 : i32, i32, i32
  }
}

</mosaic_0001>

<bundles_post_ra>
// kernel: tpu_custom_call.1
= control target key start
LH: loop header
LB: loop body
LE: loop exit
PB: predicated region body
PF: predicated region fallthrough
CT: control target
= control target key end

     0   :  { %s6011_s0 = inlined_call_operand.hbm [shape: bf16[2,256,128], index: 0, kind: input, shape index: {}]   ;;  %s6012_s1 = inlined_call_operand.hbm [shape: bf16[2,256,128], index: 1, kind: input, shape index: {}]   ;;  %s6013_s2 = inlined_call_operand.hbm [shape: bf16[2,256,128], index: 2, kind: input, shape index: {}]   ;;  %s6014_s3 = inlined_call_operand.vmem [shape: bf16[128,32], index: 3, kind: input, shape index: {}]   ;;  %s6015_s4 = inlined_call_operand.vmem [shape: bf16[288,32], index: 4, kind: input, shape index: {}]   ;;  %s6016_s5 = inlined_call_operand.vmem [shape: bf16[32,128], index: 5, kind: input, shape index: {}]   ;;  %s6017_s6 = inlined_call_operand.vmem [shape: f32[1,32], index: 6, kind: input, shape index: {}]   ;;  %s6018_s7 = inlined_call_operand.vmem [shape: f32[1,32], index: 7, kind: input, shape index: {}]   ;;  %s6019_s8 = inlined_call_operand.vmem [shape: f32[1,128], index: 8, kind: input, shape index: {}]   ;;  %s6020_s9 = inlined_call_operand.hbm [shape: bf16[2,256,128], index: 9, kind: output, shape index: {}]  }
   0x1   :  { %6071 = sst [smem:[#allocation38_spill]] %s6011_s0 }
   0x2   :  { %6072 = sst [smem:[#allocation39_spill]] %s6012_s1 }
   0x3   :  { %6073 = sst [smem:[#allocation40_spill]] %s6014_s3 }
   0x4   :  { %6074 = sst [smem:[#allocation41_spill]] %s6015_s4 }
   0x5   :  { %6075 = sst [smem:[#allocation42_spill]] %s6016_s5 }
   0x6   :  { %6076 = sst [smem:[#allocation43_spill]] %s6017_s6 }
   0x7   :  { %6077 = sst [smem:[#allocation44_spill]] %s6018_s7 }
   0x8   :  { %6078 = sst [smem:[#allocation45_spill]] %s6019_s8 }
   0x9   :  { %6079 = sst [smem:[#allocation46_spill]] %s6020_s9 }
   0xa   :  { %14 = vsyncpa [#allocation4], 0 }
   0xb   :  { %16 = vsyncpa [#allocation4 + $0x1], 0 }
   0xc   :  { %17 = vsyncpa [#allocation7], 0 }
   0xd   :  { %19 = vsyncpa [#allocation7 + $0x1], 0 }
   0xe   :  { %20 = vsyncpa [#allocation5], 0 }
   0xf   :  { %22 = vsyncpa [#allocation5 + $0x1], 0  ;;  %s4263_s30 = smov 0   ;;  %s4265_s10 = smov 0  }
  0x10   :  { %s4267_s11 = smov 0   ;;  %s4269_s12 = smov 0  }
  0x11   :  { %s4271_s13 = smov 0   ;;  %s4273_s14 = smov 0  }
  0x12   :  { %s4275_s15 = smov 0   ;;  %s4277_s16 = smov 0  }
  0x13   :  { %s4279_s17 = smov 0   ;;  %s4281_s18 = smov 0  }
  0x14   :  { %s4283_s19 = smov 0   ;;  %s4285_s20 = smov 0  }
  0x15   :  { %s4287_s21 = smov 0   ;;  %s4289_s22 = smov 0  }
  0x16 LB: > { %6080 = sst [smem:[#allocation14_spill]] %s4169_s14  ;;  %s4334_s23 = sadd.s32 4294967295, %s4201_s22   ;;  %s4201_s22 = sphi %s4289_s22, %s28_s22   ;;  %s4197_s21 = sphi %s4287_s21, %s6354_s21   ;;  %s4193_s20 = sphi %s4285_s20, %s6353_s20   ;;  %s4189_s19 = sphi %s4283_s19, %s6352_s19   ;;  %s4185_s18 = sphi %s4281_s18, %s6351_s18   ;;  %s4181_s17 = sphi %s4279_s17, %s6350_s17   ;;  %s4177_s16 = sphi %s4277_s16, %s6361_s16   ;;  %s4173_s15 = sphi %s4275_s15, %s6360_s15   ;;  %s4169_s14 = sphi %s4273_s14, %s6348_s14   ;;  %s4165_s13 = sphi %s4271_s13, %s6359_s13   ;;  %s4161_s12 = sphi %s4269_s12, %s6358_s12   ;;  %s4157_s11 = sphi %s4267_s11, %s6357_s11   ;;  %s4153_s10 = sphi %s4265_s10, %s6356_s10   ;;  %s4149_s30 = sphi %s4263_s30, %s6355_s30  }
  0x17   : > { %6081 = sst [smem:[#allocation15_spill]] %s4173_s15  ;;  %s37_s24 = sadd.s32 1, %s4193_s20 }
  0x18   : > { %6082 = sst [smem:[#allocation16_spill]] %s4181_s17  ;;  %p38_p0 = scmp.ge.s32.totalorder %s37_s24, 2 }
  0x19   : > { %6083 = sst [smem:[#allocation17_spill]] %s4185_s18  ;;  %s40_s25 = sadd.s32 1, %s4197_s21 }
  0x1a   : > { %6084 = sst [smem:[#allocation18_spill]] %s4189_s19  ;;  %p57_p1 = scmp.eq.s32.totalorder %s4201_s22, 0 }
  0x1b   : > { %6085 = sst [smem:[#allocation19_spill]] %s4193_s20  ;;  %p63_p2 = scmp.eq.s32.totalorder %s4334_s23, 0 }
  0x1c   : > { %6086 = sst [smem:[#allocation20_spill]] %s4197_s21  ;;  %s6363_s24 = smov (%p38_p0, %s37_s24), 0 }
  0x1d   : > { %6087 = sst [smem:[#allocation21_spill]] %s6363_s24  ;;  %s6365_s25 = smov (!%p38_p0, %s40_s25), %s4197_s21 }
  0x1e   : > { %s45_s26 = ssub.s32 %s4193_s20, %s6363_s24  ;;  %s3392_s27 = sshll.u32 %s4193_s20, 3 }
  0x1f   : > { %p42_p3 = scmp.ge.s32.totalorder %s6365_s25, 2  ;;  %s3393_s28 = sadd.s32 4294967295, %s3392_s27 }
  0x20   : > { %p74_p4 = scmp.gt.s32.totalorder %s3393_s28, 0  ;;  %s3394_s29 = sshll.u32 %s6363_s24, 3 }
  0x21   : > { %s6367_s25 = smov (%p42_p3, %s6365_s25), 0  ;;  %s3395_s19 = sadd.s32 4294967295, %s3394_s29 }
  0x22   : > { %6088 = sst [smem:[#allocation22_spill]] %s6367_s25  ;;  %s6369_s28 = smov (!%p74_p4, %s3393_s28), 0 }
  0x23   : > { %s4351_s9 = ssub.s32 %s4197_s21, %s6367_s25  ;;  %p78_p5 = scmp.gt.s32.totalorder %s3395_s19, 0 }
  0x24   : > { %s4354_s8 = sor.u32 %s45_s26, %s4351_s9  ;;  %s85_s7 = sadd.s32 1, %s4169_s14 }
  0x25   : > { %p47_p6 = scmp.eq.s32.totalorder %s4354_s8, 0  ;;  %s6371_s19 = smov (!%p78_p5, %s3395_s19), 0 }
  0x26   : > { %p92_p7 = scmp.ne.s32.totalorder %s4169_s14, %s4165_s13  ;;  %p98_p8 = scmp.ne.s32.totalorder %s4165_s13, %s4161_s12 }
  0x27   : > { %s81_s24 = ssub.s32 %s6369_s28, %s6371_s19  ;;  %s4362_s25 = sadd.s32 8, %s3392_s27 }
  0x28   : > { %s82_s5 = sor.u32 %s81_s24, %s4351_s9  ;;  %p4367_p9 = por %p92_p7, %p57_p1 }
  0x29   : > { %p83_p10 = scmp.eq.s32.totalorder %s82_s5, 0  ;;  %p4373_p11 = por %p98_p8, %p63_p2 }
  0x2a   : > { %s4378_s12 = sadd.s32 8, %s3394_s29  ;;  %p6038_p0 = scmp.lt.s32.totalorder %s4201_s22, 4 }
  0x2b   : > { %s6090_s4 = scalar_select %p4373_p11, 1, 0 }
  0x2c   : > { %s4381_s19 = scalar_select %p83_p10, %s4169_s14, %s85_s7  }
  0x2d   : > { %6091 = sst [smem:[#allocation23_spill]] %s6090_s4  ;;  %s4386_s24 = sshll.u32 %s4197_s21, 5 }
  0x2e   : > { %6092 = sst [smem:[#allocation24_spill]] %s4381_s19  ;;  %s354_s5 = sand.u32 1, %s4201_s22  }
  0x2f   : > { %s356_s27 = sand.u32 1, %s4169_s14   ;;  %s3407_s6 = sshll.u32 %s6369_s28, 1 }
  0x30   : > { %s3404_s18 = sshll.u32 %s356_s27, 3  ;;  %s367_s3 = sadd.s32 %s3407_s6, %s4386_s24 }
  0x31   : > { %s358_s4 = scalar_lea.vmem [#allocation6], %s3404_s18  ;;  %s3409_s7 = sshll.u32 %s367_s3, 2 }
  0x32   : > { %s372_s29 = sshll.u32 %s358_s4, 4  ;;  %s6093_s1 = sld [smem:[#allocation39_spill]]  ;;  %s373_s29 = int_to_ptr.vmem [resolvable:$true] %s372_s29 }
  0x33   : > { %p3806_p3 = pnand %p6038_p0, %p4367_p9  ;;  %p3415_p4 = scmp.ge.s32.totalorder %s4201_s22, 1 }
  0x34   : > { %s4399_s4 = scalar_lea.sflag [#allocation7], %s354_s5  ;;  %s6031_s3 = smov 64  }
  0x35   : > { %s6033_s18 = smov 4   ;;  %p408_p5 = scmp.lt.s32.totalorder %s4201_s22, 5 }
  0x36   : > { %s49_s28 = sadd.s32 1, %s4181_s17  ;;  %p56_p8 = scmp.ne.s32.totalorder %s4181_s17, %s4177_s16 }
  0x37   : > { %p4406_p7 = pnand %p3415_p4, %p408_p5  ;;  %p62_p9 = scmp.ne.s32.totalorder %s4177_s16, %s4173_s15 }
  0x38   : > { %s369_s14 = scalar_lea.hbm %s6093_s1, %s3409_s7  ;;  %p286_p10 = scmp.eq.s32.totalorder %s4334_s23, 3 }
  0x39   : > { %s370_s6 = sshll.u32 %s369_s14, 4  ;;  %s3391_s14 = sadd.s32 4294967294, %s4201_s22   ;;  %s371_s6 = int_to_ptr.hbm [resolvable:$true] %s370_s6 }
  0x3a   : > { %3808 = dma.hbm_to_vmem [thread:$0]  (!%p3806_p3), %s371_s6, 128, %s373_s29, %s4399_s4, %s6031_s3, %s6031_s3, %s6033_s18  }
  0x3b   : > { %s4415_s26 = scalar_select %p47_p6, %s4181_s17, %s49_s28  }
  0x3c   : > { %p292_p13 = scmp.eq.s32.totalorder %s3391_s14, 3  ;;  %p4424_p12 = por %p57_p1, %p56_p8 }
  0x3d   : > { %6095 = sst [smem:[#allocation25_spill]] %s4415_s26  ;;  %p4430_p3 = por %p63_p2, %p62_p9 }
  0x3e   : > { %p4434_p4 = por %p286_p10, %p56_p8  ;;  %p4438_p6 = por %p292_p13, %p62_p9 }
  0x3f   : > { %s330_s29 = sand.u32 1, %s4181_s17   ;;  %s3401_s7 = sshll.u32 %s4193_s20, 4 }
  0x40   : > { %s6099_s27 = scalar_select %p4438_p6, 1, 0 }
  0x41   : > { %s3400_s6 = sshll.u32 %s330_s29, 6  ;;  %s339_s14 = sadd.s32 %s4386_s24, %s3401_s7 }
  0x42   : > { %6100 = sst [smem:[#allocation26_spill]] %s6099_s27  ;;  %s3403_s28 = sshll.u32 %s339_s14, 2 }
  0x43   : > { %s334_s3 = scalar_lea.vmem [#allocation3], %s3400_s6  ;;  %s6101_s0 = sld [smem:[#allocation38_spill]] }
  0x44   : > { %s344_s18 = sshll.u32 %s334_s3, 4  ;;  %p3803_p13 = pnand %p6038_p0, %p4424_p12  ;;  %s345_s18 = int_to_ptr.vmem [resolvable:$true] %s344_s18 }
  0x45   : > { %s331_s7 = scalar_lea.sflag [#allocation4], %s330_s29  ;;  %s6102_s20 = smov 4  }
  0x46   : > { %s6103_s14 = smov 64   ;;  %p6104_p5 = scmp.lt.s32.totalorder %s4362_s25, 15 }
  0x47   : > { %p6105_p8 = scmp.lt.s32.totalorder %s4378_s12, 15  ;;  %s121_s1 = sadd.s32 1, %s4157_s11 }
  0x48   : > { %s6373_s25 = smov (!%p6104_p5, %s4362_s25), 15  ;;  %p128_p9 = scmp.ne.s32.totalorder %s4157_s11, %s4153_s10 }
  0x49   : > { %s341_s27 = scalar_lea.hbm %s6101_s0, %s3403_s28  ;;  %s6375_s12 = smov (!%p6105_p8, %s4378_s12), 15 }
  0x4a   : > { %s342_s17 = sshll.u32 %s341_s27, 4  ;;  %s117_s3 = ssub.s32 %s6373_s25, %s6375_s12  ;;  %s343_s17 = int_to_ptr.hbm [resolvable:$true] %s342_s17 }
  0x4b   : > { %3805 = dma.hbm_to_vmem [thread:$0]  (!%p3803_p13), %s343_s17, 1024, %s345_s18, %s331_s7, %s6103_s14, %s6103_s14, %s6102_s20  }
  0x4c   : > { %p134_p10 = scmp.ne.s32.totalorder %s4153_s10, %s4149_s30  ;;  %s118_s26 = sor.u32 %s117_s3, %s4351_s9 }
  0x4d   : > { %p4469_p12 = por %p128_p9, %p57_p1  ;;  %p119_p0 = scmp.eq.s32.totalorder %s118_s26, 0 }
  0x4e   : > { %p4475_p13 = por %p134_p10, %p63_p2  ;;  %s384_s18 = sand.u32 1, %s4157_s11  }
  0x4f   : > { %s3412_s27 = sshll.u32 %s6373_s25, 1  ;;  %s3410_s30 = sshll.u32 %s384_s18, 3 }
  0x50   : > { %s4481_s29 = scalar_select %p119_p0, %s4157_s11, %s121_s1  }
  0x51   : > { %s395_s9 = sadd.s32 %s3412_s27, %s4386_s24  ;;  %s386_s3 = scalar_lea.vmem [#allocation8], %s3410_s30 }
  0x52   : > { %s3414_s12 = sshll.u32 %s395_s9, 2  ;;  %s400_s0 = sshll.u32 %s386_s3, 4  ;;  %s401_s0 = int_to_ptr.vmem [resolvable:$true] %s400_s0 }
  0x53   : > { %s397_s7 = scalar_lea.hbm %s6013_s2, %s3414_s12  ;;  %p6108_p1 = scmp.lt.s32.totalorder %s4201_s22, 4 }
  0x54   : > { %s398_s15 = sshll.u32 %s397_s7, 4  ;;  %412 = sbr.rel (%p4406_p7) target bundleno = 976 (0x3d0), region = 56  ;;  %s399_s15 = int_to_ptr.hbm [resolvable:$true] %s398_s15 }
  0x55   : > { %p3809_p2 = pnand %p6108_p1, %p4469_p12 }
  0x57   : > { %3811 = dma.hbm_to_vmem [thread:$0]  (!%p3809_p2), %s399_s15, 128, %s401_s0, %s4399_s4, %s6103_s14, %s6103_s14, %s6102_s20  }
  0x59   : > { %s4498_s25 = sand.u32 1, %s4177_s16  }
  0x5a   : > { %s3416_s24 = sshll.u32 %s4498_s25, 6  ;;  %s415_s1 = scalar_lea.sflag [#allocation4], %s4498_s25 }
  0x5b   : > { %s4504_s26 = scalar_lea.vmem [#allocation3], %s3416_s24 }
  0x5c   : > { %4132 = dma.done.wait (%p4430_p3), %s415_s1, 1024  }
  0x5d   : > { %4134 = vsyncadd (%p4430_p3), %s415_s1, 4294966272  ;;  %s424_s15 = sand.u32 1, %s4334_s23   ;;  %s426_s20 = sand.u32 1, %s4165_s13  }
  0x5e   : > { %s4512_s4 = sshll.u32 %s426_s20, 3  ;;  %s425_s21 = scalar_lea.sflag [#allocation7], %s424_s15 }
  0x5f   : > { %s428_s14 = scalar_lea.vmem [#allocation6], %s4512_s4 }
  0x60   : > { %4136 = dma.done.wait (%p4373_p11), %s425_s21, 128  }
  0x61   : > { %4138 = vsyncadd (%p4373_p11), %s425_s21, 4294967168  ;;  %s436_s19 = sand.u32 1, %s4153_s10  }
  0x62   : > { %s4520_s5 = sshll.u32 %s436_s19, 3 }
  0x63   : > { %s438_s18 = scalar_lea.vmem [#allocation8], %s4520_s5 }
  0x64   : > { %4140 = dma.done.wait (%p4475_p13), %s425_s21, 128  }
  0x65   : > { %4142 = vsyncadd (%p4475_p13), %s425_s21, 4294967168  ;;  %s6110_s30 = sld [smem:[#allocation40_spill]]  ;;  %v3644_v8 = vld [vmem:[%s4504_s26] sm:$0xff]  ;;  %v3647_v9 = vld [vmem:[%s4504_s26 + $0x18] sm:$0xff]  ;;  %vm800_vm1 = vcmask 257024   ;;  %s4610_s5 = scalar_lea.vmem [#allocation9], %s3416_s24 }
  0x66   : > { %v3649_v10 = vld [vmem:[%s4504_s26 + $0x28] sm:$0xff]  ;;  %v3648_v13 = vld [vmem:[%s4504_s26 + $0x20] sm:$0xff]  ;;  %v3650_v14 = vld [vmem:[%s4504_s26 + $0x30] sm:$0xff] }
  0x67   : > { %v3660_v11 = vld [vmem:[%s428_s14] sm:$0xff]  ;;  %v3646_v15 = vld [vmem:[%s4504_s26 + $0x10] sm:$0xff]  ;;  %v3651_v17 = vld [vmem:[%s4504_s26 + $0x38] sm:$0xff] }
  0x68   : > { %v3645_v12 = vld [vmem:[%s4504_s26 + $0x8] sm:$0xff]  ;;  %v3661_v16 = vld [vmem:[%s438_s18] sm:$0xff]  ;;  %s6113_s18 = sld [smem:[#allocation17_spill]] }
  0x6b   : > { %s6111_s9 = smov %s6110_s30  ;;  %v3659_v0 = vld [vmem:[%s6110_s30 + $0x38] sm:$0xff]  ;;  %s6112_s30 = sld [smem:[#allocation43_spill]] }
  0x6c   : > { %631 = vmatpush.bf16.msra.mxu0 %v3659_v0  ;;  %3778 = vmatpush.bf16.msra.mxu2 %v3659_v0  ;;  %v3658_v1 = vld [vmem:[%s6111_s9 + $0x30] sm:$0xff]  ;;  %v3657_v2 = vld [vmem:[%s6111_s9 + $0x28] sm:$0xff]  ;;  %v3656_v3 = vld [vmem:[%s6111_s9 + $0x20] sm:$0xff] }
  0x6d   : > { %3779 = vmatpush.bf16.msra.mxu3 %v3659_v0  ;;  %736 = vmatpush.bf16.msra.mxu1 %v3659_v0  ;;  %v3655_v4 = vld [vmem:[%s6111_s9 + $0x18] sm:$0xff]  ;;  %v3654_v5 = vld [vmem:[%s6111_s9 + $0x10] sm:$0xff]  ;;  %v3653_v6 = vld [vmem:[%s6111_s9 + $0x8] sm:$0xff] }
  0x6e   : > { %v3652_v7 = vld [vmem:[%s6111_s9] sm:$0xff]  ;;  %p3492_p11 = scmp.eq.s32.totalorder %s6113_s18, 0 }
  0x70   : > { %632 = vmatpush.bf16.msra.mxu0 %v3658_v1  ;;  %3780 = vmatpush.bf16.msra.mxu2 %v3658_v1 }
  0x71   : > { %3781 = vmatpush.bf16.msra.mxu3 %v3658_v1  ;;  %737 = vmatpush.bf16.msra.mxu1 %v3658_v1  ;;  %v4566_v18 = vld [vmem:[%s6112_s30] ss:$0 sm:$0xff] }
  0x74   : > { %633 = vmatpush.bf16.msra.mxu0 %v3657_v2  ;;  %3782 = vmatpush.bf16.msra.mxu2 %v3657_v2 }
  0x75   : > { %3783 = vmatpush.bf16.msra.mxu3 %v3657_v2  ;;  %738 = vmatpush.bf16.msra.mxu1 %v3657_v2 }
  0x78   : > { %634 = vmatpush.bf16.msra.mxu0 %v3656_v3  ;;  %3784 = vmatpush.bf16.msra.mxu2 %v3656_v3 }
  0x79   : > { %3785 = vmatpush.bf16.msra.mxu3 %v3656_v3  ;;  %739 = vmatpush.bf16.msra.mxu1 %v3656_v3 }
  0x7c   : > { %635 = vmatpush.bf16.msra.mxu0 %v3655_v4  ;;  %3786 = vmatpush.bf16.msra.mxu2 %v3655_v4 }
  0x7d   : > { %3787 = vmatpush.bf16.msra.mxu3 %v3655_v4  ;;  %740 = vmatpush.bf16.msra.mxu1 %v3655_v4 }
  0x80   : > { %636 = vmatpush.bf16.msra.mxu0 %v3654_v5  ;;  %3788 = vmatpush.bf16.msra.mxu2 %v3654_v5 }
  0x81   : > { %3789 = vmatpush.bf16.msra.mxu3 %v3654_v5  ;;  %741 = vmatpush.bf16.msra.mxu1 %v3654_v5 }
  0x84   : > { %637 = vmatpush.bf16.msra.mxu0 %v3653_v6  ;;  %3790 = vmatpush.bf16.msra.mxu2 %v3653_v6 }
  0x85   : > { %3791 = vmatpush.bf16.msra.mxu3 %v3653_v6  ;;  %742 = vmatpush.bf16.msra.mxu1 %v3653_v6 }
  0x88   : > { %638 = vmatpush.bf16.msra.mxu0 %v3652_v7  ;;  %3792 = vmatpush.bf16.msra.mxu2 %v3652_v7 }
  0x89   : > { %3793 = vmatpush.bf16.msra.mxu3 %v3652_v7  ;;  %743 = vmatpush.bf16.msra.mxu1 %v3652_v7 }
  0x8b   : > { %639 = vmatmul.bf16.vlgmr.msra.gmra.mxu0 %v3644_v8  ;;  %654 = vmatmul.bf16.vlgmr.msra.gmra.mxu2 %v3647_v9 }
  0x8c   : > { %764 = vmatpush.bf16.msrb.mxu2 %v3659_v0  ;;  %664 = vmatmul.bf16.vlgmr.msra.gmra.mxu3 %v3649_v10 }
  0x8d   : > { %744 = vmatmul.bf16.vlgmr.msra.gmra.mxu1 %v3660_v11 }
  0x90   : > { %765 = vmatpush.bf16.msrb.mxu2 %v3658_v1 }
  0x94   : > { %766 = vmatpush.bf16.msrb.mxu2 %v3657_v2 }
  0x98   : > { %767 = vmatpush.bf16.msrb.mxu2 %v3656_v3 }
  0x9b   : > { %644 = vmatmul.bf16.gmra.mxu0 %v3645_v12  ;;  %659 = vmatmul.bf16.gmra.mxu2 %v3648_v13 }
  0x9c   : > { %768 = vmatpush.bf16.msrb.mxu2 %v3655_v4  ;;  %669 = vmatmul.bf16.gmra.mxu3 %v3650_v14 }
  0xa0   : > { %769 = vmatpush.bf16.msrb.mxu2 %v3654_v5 }
  0xa4   : > { %770 = vmatpush.bf16.msrb.mxu2 %v3653_v6 }
  0xa8   : > { %771 = vmatpush.bf16.msrb.mxu2 %v3652_v7 }
  0xab   : > { %649 = vmatmul.bf16.gmra.mxu0 %v3646_v15  ;;  %772 = vmatmul.bf16.vlgmr.msrb.gmra.mxu2 %v3661_v16 }
  0xac   : > { %674 = vmatmul.bf16.gmra.mxu3 %v3651_v17 }
 0x108   : > { %v640_v19 = vpop.f32.mrf.mxu0 }
 0x109   : > { %v641_v20 = vadd.f32 %v4566_v18, %v640_v19 }
 0x10a   : > { %v745_v21 = vpop.f32.mrf.mxu1 }
 0x10b   : > { %vm680_vm0 = vcmp.ge.f32.partialorder %v641_v20, 0.0  ;;  %v696_v22 = vmul.f32 0.01, %v641_v20  ;;  %v746_v28 = vadd.f32 %v4566_v18, %v745_v21 }
 0x10d   : > { %v712_v23 = vsel %vm680_vm0, %v641_v20, %v696_v22  ;;  %vm750_vm3 = vcmp.ge.f32.partialorder %v746_v28, 0.0  ;;  %v752_v34 = vmul.f32 0.01, %v746_v28 }
 0x10e   : > { %v784_v24 = vpack.c.bf16 %v712_v23, %v712_v23  ;;  %v655_v25 = vpop.f32.mrf.mxu2 }
 0x10f   : > { %v656_v26 = vadd.f32 %v4566_v18, %v655_v25  ;;  %v665_v27 = vpop.f32.mrf.mxu3  ;;  %v4575_v41 = vsel %vm750_vm3, %v746_v28, %v752_v34 }
 0x110   : > { %801 = vst.msk [vmem:[#allocation2 + $0x10] sm:$0xf] %vm800_vm1, %v784_v24  ;;  %v666_v29 = vadd.f32 %v4566_v18, %v665_v27  ;;  %v642_v30 = vpop.f32.mrf.mxu0 }
 0x111   : > { %vm686_vm2 = vcmp.ge.f32.partialorder %v656_v26, 0.0  ;;  %v702_v31 = vmul.f32 0.01, %v656_v26  ;;  %v643_v32 = vadd.f32 %v4566_v18, %v642_v30 }
 0x112   : > { %vm690_vm4 = vcmp.ge.f32.partialorder %v666_v29, 0.0  ;;  %v706_v33 = vmul.f32 0.01, %v666_v29  ;;  %v747_v35 = vpop.f32.mrf.mxu1 }
 0x113   : > { %v718_v36 = vsel %vm686_vm2, %v656_v26, %v702_v31  ;;  %vm681_vm5 = vcmp.ge.f32.partialorder %v643_v32, 0.0  ;;  %v697_v37 = vmul.f32 0.01, %v643_v32  ;;  %v748_v38 = vadd.f32 %v4566_v18, %v747_v35 }
 0x114   : > { %v790_v39 = vpack.c.bf16 %v718_v36, %v718_v36  ;;  %v722_v40 = vsel %vm690_vm4, %v666_v29, %v706_v33 }
 0x115   : > { %v794_v42 = vpack.c.bf16 %v722_v40, %v722_v40  ;;  %v713_v43 = vsel %vm681_vm5, %v643_v32, %v697_v37  ;;  %vm751_vm6 = vcmp.ge.f32.partialorder %v748_v38, 0.0  ;;  %v753_v44 = vmul.f32 0.01, %v748_v38 }
 0x116   : > { %807 = vst.msk [vmem:[#allocation2 + $0x28] sm:$0xf] %vm800_vm1, %v790_v39  ;;  %v785_v45 = vpack.c.bf16 %v713_v43, %v713_v43  ;;  %v657_v46 = vpop.f32.mrf.mxu2 }
 0x117   : > { %811 = vst.msk [vmem:[#allocation2 + $0x38] sm:$0xf] %vm800_vm1, %v794_v42  ;;  %v658_v47 = vadd.f32 %v4566_v18, %v657_v46  ;;  %v667_v48 = vpop.f32.mrf.mxu3  ;;  %v4580_v49 = vsel %vm751_vm6, %v748_v38, %v753_v44 }
 0x118   : > { %802 = vst.msk [vmem:[#allocation2 + $0x14] sm:$0xf] %vm800_vm1, %v785_v45  ;;  %v668_v50 = vadd.f32 %v4566_v18, %v667_v48  ;;  %v645_v51 = vpop.f32.mrf.mxu0 }
 0x119   : > { %vm687_vm7 = vcmp.ge.f32.partialorder %v658_v47, 0.0  ;;  %v703_v52 = vmul.f32 0.01, %v658_v47  ;;  %v646_v53 = vadd.f32 %v4566_v18, %v645_v51 }
 0x11a   : > { %vm691_vm8 = vcmp.ge.f32.partialorder %v668_v50, 0.0  ;;  %v707_v54 = vmul.f32 0.01, %v668_v50 }
 0x11b   : > { %v719_v55 = vsel %vm687_vm7, %v658_v47, %v703_v52  ;;  %vm682_vm9 = vcmp.ge.f32.partialorder %v646_v53, 0.0  ;;  %v698_v56 = vmul.f32 0.01, %v646_v53 }
 0x11c   : > { %v791_v57 = vpack.c.bf16 %v719_v55, %v719_v55  ;;  %v723_v58 = vsel %vm691_vm8, %v668_v50, %v707_v54 }
 0x11d   : > { %v795_v59 = vpack.c.bf16 %v723_v58, %v723_v58  ;;  %v714_v60 = vsel %vm682_vm9, %v646_v53, %v698_v56 }
 0x11e   : > { %808 = vst.msk [vmem:[#allocation2 + $0x2c] sm:$0xf] %vm800_vm1, %v791_v57  ;;  %v786_v61 = vpack.c.bf16 %v714_v60, %v714_v60  ;;  %v660_v62 = vpop.f32.mrf.mxu2 }
 0x11f   : > { %812 = vst.msk [vmem:[#allocation2 + $0x3c] sm:$0xf] %vm800_vm1, %v795_v59  ;;  %v661_v63 = vadd.f32 %v4566_v18, %v660_v62  ;;  %v670_v0 = vpop.f32.mrf.mxu3 }
 0x120   : > { %803 = vst.msk [vmem:[#allocation2 + $0x18] sm:$0xf] %vm800_vm1, %v786_v61  ;;  %v671_v1 = vadd.f32 %v4566_v18, %v670_v0  ;;  %v647_v2 = vpop.f32.mrf.mxu0 }
 0x121   : > { %vm688_vm10 = vcmp.ge.f32.partialorder %v661_v63, 0.0  ;;  %v704_v3 = vmul.f32 0.01, %v661_v63  ;;  %v648_v4 = vadd.f32 %v4566_v18, %v647_v2 }
 0x122   : > { %vm692_vm11 = vcmp.ge.f32.partialorder %v671_v1, 0.0  ;;  %v708_v5 = vmul.f32 0.01, %v671_v1 }
 0x123   : > { %v720_v6 = vsel %vm688_vm10, %v661_v63, %v704_v3  ;;  %vm683_vm12 = vcmp.ge.f32.partialorder %v648_v4, 0.0  ;;  %v699_v7 = vmul.f32 0.01, %v648_v4 }
 0x124   : > { %v792_v8 = vpack.c.bf16 %v720_v6, %v720_v6  ;;  %v724_v9 = vsel %vm692_vm11, %v671_v1, %v708_v5 }
 0x125   : > { %v796_v10 = vpack.c.bf16 %v724_v9, %v724_v9  ;;  %v715_v11 = vsel %vm683_vm12, %v648_v4, %v699_v7 }
 0x126   : > { %809 = vst.msk [vmem:[#allocation2 + $0x30] sm:$0xf] %vm800_vm1, %v792_v8  ;;  %v787_v12 = vpack.c.bf16 %v715_v11, %v715_v11  ;;  %v662_v13 = vpop.f32.mrf.mxu2 }
 0x127   : > { %813 = vst.msk [vmem:[#allocation2 + $0x40] sm:$0xf] %vm800_vm1, %v796_v10  ;;  %v663_v14 = vadd.f32 %v4566_v18, %v662_v13  ;;  %v672_v15 = vpop.f32.mrf.mxu3 }
 0x128   : > { %804 = vst.msk [vmem:[#allocation2 + $0x1c] sm:$0xf] %vm800_vm1, %v787_v12  ;;  %v673_v16 = vadd.f32 %v4566_v18, %v672_v15  ;;  %v650_v17 = vpop.f32.mrf.mxu0 }
 0x129   : > { %vm689_vm13 = vcmp.ge.f32.partialorder %v663_v14, 0.0  ;;  %v705_v19 = vmul.f32 0.01, %v663_v14  ;;  %v651_v20 = vadd.f32 %v4566_v18, %v650_v17 }
 0x12a   : > { %vm693_vm14 = vcmp.ge.f32.partialorder %v673_v16, 0.0  ;;  %v709_v21 = vmul.f32 0.01, %v673_v16 }
 0x12b   : > { %v721_v22 = vsel %vm689_vm13, %v663_v14, %v705_v19  ;;  %vm684_vm15 = vcmp.ge.f32.partialorder %v651_v20, 0.0  ;;  %v700_v23 = vmul.f32 0.01, %v651_v20 }
 0x12c   : > { %v793_v24 = vpack.c.bf16 %v721_v22, %v721_v22  ;;  %v725_v25 = vsel %vm693_vm14, %v673_v16, %v709_v21 }
 0x12d   : > { %v797_v26 = vpack.c.bf16 %v725_v25, %v725_v25  ;;  %v716_v27 = vsel %vm684_vm15, %v651_v20, %v700_v23 }
 0x12e   : > { %810 = vst.msk [vmem:[#allocation2 + $0x34] sm:$0xf] %vm800_vm1, %v793_v24  ;;  %v788_v28 = vpack.c.bf16 %v716_v27, %v716_v27  ;;  %v773_v29 = vpop.f32.mrf.mxu2 }
 0x12f   : > { %814 = vst.msk [vmem:[#allocation2 + $0x44] sm:$0xf] %vm800_vm1, %v797_v26  ;;  %v675_v30 = vpop.f32.mrf.mxu3  ;;  %v774_v31 = vadd.f32 %v4566_v18, %v773_v29 }
 0x130   : > { %805 = vst.msk [vmem:[#allocation2 + $0x20] sm:$0xf] %vm800_vm1, %v788_v28  ;;  %v676_v32 = vadd.f32 %v4566_v18, %v675_v30  ;;  %v652_v33 = vpop.f32.mrf.mxu0 }
 0x131   : > { %vm778_vm0 = vcmp.ge.f32.partialorder %v774_v31, 0.0  ;;  %v780_v34 = vmul.f32 0.01, %v774_v31  ;;  %v653_v35 = vadd.f32 %v4566_v18, %v652_v33 }
 0x132   : > { %vm694_vm2 = vcmp.ge.f32.partialorder %v676_v32, 0.0  ;;  %v710_v36 = vmul.f32 0.01, %v676_v32 }
 0x133   : > { %v782_v37 = vsel %vm778_vm0, %v774_v31, %v780_v34  ;;  %vm685_vm3 = vcmp.ge.f32.partialorder %v653_v35, 0.0  ;;  %v701_v38 = vmul.f32 0.01, %v653_v35 }
 0x134   : > { %v726_v39 = vsel %vm694_vm2, %v676_v32, %v710_v36 }
 0x135   : > { %v798_v40 = vpack.c.bf16 %v726_v39, %v726_v39  ;;  %v717_v42 = vsel %vm685_vm3, %v653_v35, %v701_v38 }
 0x136   : > { %v789_v43 = vpack.c.bf16 %v717_v42, %v717_v42  ;;  %v775_v44 = vpop.f32.mrf.mxu2 }
 0x137   : > { %815 = vst.msk [vmem:[#allocation2 + $0x48] sm:$0xf] %vm800_vm1, %v798_v40  ;;  %v677_v45 = vpop.f32.mrf.mxu3  ;;  %v776_v46 = vadd.f32 %v4566_v18, %v775_v44 }
 0x138   : > { %806 = vst.msk [vmem:[#allocation2 + $0x24] sm:$0xf] %vm800_vm1, %v789_v43  ;;  %v678_v47 = vadd.f32 %v4566_v18, %v677_v45 }
 0x139   : > { %vm779_vm4 = vcmp.ge.f32.partialorder %v776_v46, 0.0  ;;  %v781_v48 = vmul.f32 0.01, %v776_v46 }
 0x13a   : > { %vm695_vm5 = vcmp.ge.f32.partialorder %v678_v47, 0.0  ;;  %v711_v50 = vmul.f32 0.01, %v678_v47 }
 0x13b   : > { %v783_v51 = vsel %vm779_vm4, %v776_v46, %v781_v48  ;;  %820 = sbr.rel (%p3492_p11) target bundleno = 324 (0x144), region = 72 }
 0x13c   : > { %v727_v52 = vsel %vm695_vm5, %v678_v47, %v711_v50 }
 0x13d   : > { %v799_v53 = vpack.c.bf16 %v727_v52, %v727_v52 }
 0x13f   : > { %816 = vst.msk [vmem:[#allocation2 + $0x4c] sm:$0xf] %vm800_vm1, %v799_v53 }
 0x140   : > { %v821_v54 = vpack.c.bf16 %v4575_v41, %v4575_v41  ;;  %v822_v18 = vpack.c.bf16 %v4580_v49, %v4580_v49 }
 0x142   : > { %823 = vst.msk [vmem:[#allocation2 + $0x8] sm:$0xf] %vm800_vm1, %v821_v54 }
 0x143   : > { %824 = vst.msk [vmem:[#allocation2 + $0xc] sm:$0xf] %vm800_vm1, %v822_v18 }
 0x144 PF: > { %s6114_s12 = sld [smem:[#allocation17_spill]] }
 0x14a   : > { %p3493_p0 = scmp.ne.s32.totalorder %s6114_s12, 0 }
 0x14c   : > { %828 = sbr.rel (%p3493_p0) target bundleno = 340 (0x154), region = 76 }
 0x151   : > { %v4205_v55 = vmov 0  }
 0x152   : > { %829 = vst.msk [vmem:[#allocation2 + $0x8] sm:$0xf] %vm800_vm1, %v4205_v55 }
 0x153   : > { %830 = vst.msk [vmem:[#allocation2 + $0xc] sm:$0xf] %vm800_vm1, %v4205_v55 }
 0x154 PF: > { %s6115_s24 = sld [smem:[#allocation17_spill]] }
 0x15a   : > { %p3494_p7 = scmp.eq.s32.totalorder %s6115_s24, 1 }
 0x15c   : > { %834 = sbr.rel (%p3494_p7) target bundleno = 357 (0x165), region = 80 }
 0x161   : > { %v835_v41 = vpack.c.bf16 %v782_v37, %v782_v37  ;;  %v836_v56 = vpack.c.bf16 %v783_v51, %v783_v51 }
 0x163   : > { %837 = vst.msk [vmem:[#allocation2 + $0x50] sm:$0xf] %vm800_vm1, %v835_v41 }
 0x164   : > { %838 = vst.msk [vmem:[#allocation2 + $0x54] sm:$0xf] %vm800_vm1, %v836_v56 }
 0x165 PF: > { %s6116_s6 = sld [smem:[#allocation17_spill]] }
 0x16b   : > { %p3495_p3 = scmp.ne.s32.totalorder %s6116_s6, 1 }
 0x16d   : > { %842 = sbr.rel (%p3495_p3) target bundleno = 373 (0x175), region = 84 }
 0x172   : > { %v4206_v49 = vmov 0  }
 0x173   : > { %843 = vst.msk [vmem:[#allocation2 + $0x50] sm:$0xf] %vm800_vm1, %v4206_v49 }
 0x174   : > { %844 = vst.msk [vmem:[#allocation2 + $0x54] sm:$0xf] %vm800_vm1, %v4206_v49 }
 0x175 PF: > { %v3662_v57 = vld [vmem:[#allocation2 + $0x8] sm:$0xff]  ;;  %v3663_v58 = vld [vmem:[#allocation2 + $0x10] sm:$0xff]  ;;  %v845_v59 = vlaneseq  ;;  %vm4207_vm6 = vmmov 1   ;;  %vm6040_vm8 = vsmask.f32 3328  ;;  %v6048_v7 = vmov 0  }
 0x176   : > { %v1796_v60 = vshrl.u32 %v3662_v57, 16  ;;  %v1799_v61 = vshll.u32 %v3662_v57, 16  ;;  %v1804_v62 = vshrl.u32 %v3663_v58, 16  ;;  %v1807_v63 = vshll.u32 %v3663_v58, 16  ;;  %vm960_vm7 = vmpackc.low %vm4207_vm6, %vm4207_vm6  ;;  %s4209_s28 = smov 32   ;;  %s4210_s7 = smov 64  }
 0x177   : > { %v4628_v0 = vshrl.u32 %v845_v59, 7  ;;  %v976_v8 = vsel %vm960_vm7, 65537, %v6048_v7  ;;  %vm992_vm1 = vsmask.f32 7440  ;;  %vm1354_vm9 = vsmask.f32 256 }
 0x178   : > { %v1798_v1 = vrot.slane %v1796_v60, 4  ;;  %v1801_v2 = vrot.slane %v1799_v61, 5  ;;  %v1806_v3 = vrot.slane %v1804_v62, 4  ;;  %v1809_v4 = vrot.slane %v1807_v63, 5  ;;  %vm4664_vm15 = vmor %vm6040_vm8, %vm992_vm1  ;;  %v4676_v42 = vld [vmem:[#allocation2 + $0x8] sm:$0xf] }
 0x179   : > { %v847_v5 = vadd.s32 8, %v4628_v0  ;;  %v848_v6 = vadd.s32 16, %v4628_v0  ;;  %v1004_v10 = vshll.u32 %v976_v8, 16  ;;  %v1008_v11 = vshrl.u32 %v976_v8, 16  ;;  %v4695_v54 = vld [vmem:[#allocation2 + $0x10] sm:$0xf] }
 0x17a   : > { %v1802_v9 = vor.u32 %v1801_v2, %v1798_v1  ;;  %v4633_v12 = vor.u32 %v1809_v4, %v1806_v3  ;;  %v4643_v20 = vunpack.c.l.b16 %v6048_v7  ;;  %v849_v21 = vadd.s32 24, %v4628_v0  ;;  %v4697_v18 = vld [vmem:[#allocation2 + $0x18] sm:$0xf]  ;;  %v4716_v59 = vld [vmem:[#allocation2 + $0xc] sm:$0xf]  ;;  %s4211_s17 = smov 96  }
 0x17b   : > { %v863_v13 = vand.u32 15, %v847_v5  ;;  %v864_v14 = vand.u32 15, %v848_v6  ;;  %v4636_v15 = vrot.slane %v1004_v10, 5  ;;  %v1010_v16 = vrot.slane %v1008_v11, 4  ;;  %v4728_v3 = vld [vmem:[#allocation2 + $0x14] sm:$0xf] }
 0x17c   : > { %1866 = vrot.lane.b32.xlu0 %v1802_v9, %s4209_s28  ;;  %v1360_v17 = vrot.slane %v1008_v11, 7  ;;  %v4648_v23 = vunpack.c.h.b16 %v6048_v7  ;;  %vm1355_vm13 = vsmask.f32 4368  ;;  %v1811_v25 = vsel %vm6040_vm8, %v1802_v9, %v4633_v12  ;;  %s6186_s0 = sld [smem:[#allocation41_spill]]  ;;  %s3248_s4 = sshll.u32 %s4610_s5, 4  ;;  %s3249_s4 = int_to_ptr.vmem [resolvable:$true] %s3248_s4 }
 0x17d   : > { %vm880_vm10 = vcmp.ne.s32.totalorder %v864_v14, 0  ;;  %vm4638_vm11 = vcmp.ne.s32.totalorder %v863_v13, 15  ;;  %v1011_v22 = vor.u32 %v1010_v16, %v4636_v15  ;;  %v865_v27 = vand.u32 15, %v849_v21  ;;  %vm4672_vm0 = vmor %vm1354_vm9, %vm1355_vm13  ;;  %s6325_s23 = sld [smem:[#allocation42_spill]]  ;;  %s3234_s30 = scalar_lea.sflag [#allocation5], %s4498_s25 }
 0x17e   : > { %vm961_vm12 = vmpackc.low %vm880_vm10, %vm880_vm10  ;;  %v4650_v24 = vor.u32 %v1360_v17, %v1004_v10  ;;  %v862_v28 = vand.u32 15, %v4628_v0  ;;  %v4678_v43 = vrot.slane %v1360_v17, 4  ;;  %v4703_v49 = vadd.s32 40, %v4628_v0  ;;  %v4739_v10 = vld [vmem:[#allocation2 + $0x1c] sm:$0xf]  ;;  %s6331_s18 = sld [smem:[#allocation44_spill]] }
 0x17f   : > { %v977_v26 = vsel %vm961_vm12, 65537, %v6048_v7  ;;  %vm1323_vm14 = vmpackc.low %vm4638_vm11, %vm4638_vm11  ;;  %v4659_v29 = vrot.slane %v1011_v22, 4  ;;  %vm897_vm2 = vcmp.ne.s32.totalorder %v865_v27, 15  ;;  %s6339_s6 = sld [smem:[#allocation45_spill]] }
 0x180   : > { %v1014_v30 = vshll.u32 %v977_v26, 16  ;;  %v1018_v31 = vshrl.u32 %v977_v26, 16  ;;  %v1339_v32 = vsel %vm1323_vm14, 65537, %v6048_v7  ;;  %v1500_v36 = vunpack.c.l.b16 %v4650_v24  ;;  %vm1325_vm5 = vmpackc.low %vm897_vm2, %vm897_vm2  ;;  %s6341_s3 = sld [smem:[#allocation17_spill]] }
 0x181   : > { %v1366_v34 = vshrl.u32 %v1339_v32, 16  ;;  %v1369_v35 = vshll.u32 %v1339_v32, 16  ;;  %v1501_v37 = vunpack.c.h.b16 %v4650_v24  ;;  %v1341_v47 = vsel %vm1325_vm5, 65537, %v6048_v7  ;;  %s6342_s1 = sld [smem:[#allocation18_spill]] }
 0x182   : > { %v1016_v38 = vrot.slane %v1014_v30, 5  ;;  %v1020_v40 = vrot.slane %v1018_v31, 4  ;;  %vm1504_vm3 = vcmp.ne.s32.totalorder %v1500_v36, %v4643_v20  ;;  %vm4691_vm7 = vcmp.ne.s32.totalorder %v862_v28, 0  ;;  %s6343_s27 = sld [smem:[#allocation46_spill]] }
 0x183   : > { %v1368_v44 = vrot.slane %v1366_v34, 7  ;;  %vm1505_vm4 = vcmp.ne.s32.totalorder %v1501_v37, %v4648_v23  ;;  %v1384_v41 = vshrl.u32 %v1341_v47, 16  ;;  %vm959_vm10 = vmpackc.low %vm4691_vm7, %vm4691_vm7  ;;  %v1387_v6 = vshll.u32 %v1341_v47, 16 }
 0x184   : > { %1868 = vrot.lane.b32.xlu0 %v1811_v25, %s4209_s28  ;;  %v1017_v45 = vsel %vm4664_vm15, %v4659_v29, %v1016_v38  ;;  %vm4686_vm6 = vmpackc.low %vm1505_vm4, %vm1504_vm3  ;;  %v1021_v56 = vor.u32 %v1020_v40, %v1016_v38  ;;  %v975_v16 = vsel %vm959_vm10, 65537, %v6048_v7 }
 0x185   : > { %v1167_v50 = vunpack.c.l.b16 %v1017_v45  ;;  %v1168_v51 = vunpack.c.h.b16 %v1017_v45  ;;  %v1371_v52 = vor.u32 %v1369_v35, %v1368_v44  ;;  %v1373_v53 = vrot.slane %v1368_v44, 4 }
 0x186   : > { %v1619_v55 = vsel %vm4686_vm6, %v4676_v42, 0  ;;  %v1695_v58 = vsel %vm4686_vm6, %v4697_v18, 0  ;;  %v1657_v1 = vsel %vm4686_vm6, %v4695_v54, 0  ;;  %v4733_v5 = vrot.slane %v1384_v41, 7  ;;  %s3633_s15 = sshll.u32 %s6341_s3, 4 }
 0x187   : > { %vm1171_vm1 = vcmp.ne.s32.totalorder %v1167_v50, %v4643_v20  ;;  %vm1172_vm9 = vcmp.ne.s32.totalorder %v1168_v51, %v4648_v23  ;;  %v1372_v57 = vsel %vm4672_vm0, %v4678_v43, %v1371_v52  ;;  %v1901_v63 = vunpack.c.l.b16 %v1619_v55  ;;  %s3634_s20 = sshll.u32 %s6342_s1, 5 }
 0x188   : > { %vm4718_vm11 = vmpackc.low %vm1172_vm9, %vm1171_vm1  ;;  %v1507_v61 = vunpack.c.l.b16 %v1372_v57  ;;  %v1508_v62 = vunpack.c.h.b16 %v1372_v57  ;;  %v1381_v4 = vsel %vm4672_vm0, %v1373_v53, %v4650_v24  ;;  %v4737_v8 = vunpack.c.l.b16 %v1695_v58  ;;  %s3245_s21 = sadd.s32 %s3634_s20, %s3633_s15  ;;  %s4067_s3 = scalar_lea.hbm %s6343_s27, 256 }
 0x189   : > { %v1274_v2 = vsel %vm4718_vm11, %v4716_v59, 0  ;;  %v1514_v9 = vunpack.c.l.b16 %v1381_v4  ;;  %v2055_v11 = vunpack.c.l.b16 %v1657_v1  ;;  %v1389_v13 = vor.u32 %v1387_v6, %v4733_v5  ;;  %v4791_v6 = vld [vmem:[#allocation2 + $0x20] sm:$0xf]  ;;  %s3635_s19 = sshll.u32 %s3245_s21, 2 }
 0x18a   : > { %vm1511_vm12 = vcmp.ne.s32.totalorder %v1507_v61, %v4643_v20  ;;  %vm1512_vm13 = vcmp.ne.s32.totalorder %v1508_v62, %v4648_v23  ;;  %v1515_v14 = vunpack.c.h.b16 %v1381_v4  ;;  %v1022_v31 = vrot.slane %v1021_v56, 4  ;;  %v3664_v4 = vld [vmem:[#allocation2 + $0x18] sm:$0xff] }
 0x18b   : > { %vm1513_vm14 = vmpackc.low %vm1512_vm13, %vm1511_vm12  ;;  %vm1518_vm2 = vcmp.ne.s32.totalorder %v1514_v9, %v4643_v20  ;;  %v1390_v27 = vsel %vm4672_vm0, %v4678_v43, %v1389_v13  ;;  %v995_v37 = vshll.u32 %v975_v16, 16  ;;  %v998_v40 = vshrl.u32 %v975_v16, 16 }
 0x18c   : > { %v1620_v17 = vsel %vm1513_vm14, %v4716_v59, 0  ;;  %v1696_v19 = vsel %vm1513_vm14, %v4739_v10, 0  ;;  %v1658_v21 = vsel %vm1513_vm14, %v4728_v3, 0  ;;  %vm1519_vm3 = vcmp.ne.s32.totalorder %v1515_v14, %v4648_v23 }
 0x18d   : > { %v1902_v22 = vunpack.c.l.b16 %v1620_v17  ;;  %v4752_v25 = vunpack.c.l.b16 %v1696_v19  ;;  %v2056_v26 = vunpack.c.l.b16 %v1658_v21  ;;  %v1521_v28 = vunpack.c.l.b16 %v1390_v27  ;;  %vm4760_vm4 = vmpackc.low %vm1519_vm3, %vm1518_vm2  ;;  %v1636_v21 = vld [vmem:[#allocation2 + $0xc] sm:$0x8] }
 0x18e   : > { %v1522_v30 = vunpack.c.h.b16 %v1390_v27  ;;  %v1621_v38 = vsel %vm4760_vm4, %v4695_v54, 0  ;;  %vm6041_vm1 = vcmask 1042432   ;;  %v1659_v50 = vsel %vm4760_vm4, %v4697_v18, 0 }
 0x18f   : > { %v1918_v32 = vpack.c.b16 %v1902_v22, %v1901_v63  ;;  %v2243_v34 = vpack.c.b16 %v4752_v25, %v4737_v8  ;;  %v2072_v35 = vpack.c.b16 %v2056_v26, %v2055_v11  ;;  %vm1525_vm5 = vcmp.ne.s32.totalorder %v1521_v28, %v4643_v20 }
 0x190   : > { %vm1526_vm6 = vcmp.ne.s32.totalorder %v1522_v30, %v4648_v23  ;;  %v1903_v47 = vunpack.c.l.b16 %v1621_v38  ;;  %v2057_v53 = vunpack.c.l.b16 %v1659_v50  ;;  %v867_v55 = vand.u32 15, %v4703_v49 }
 0x191   : > { %v1928_v44 = vrot.slane %v1918_v32, 5  ;;  %v2081_v45 = vrot.slane %v2072_v35, 5  ;;  %vm4769_vm7 = vmpackc.low %vm1526_vm6, %vm1525_vm5  ;;  %v997_v56 = vrot.slane %v995_v37, 5  ;;  %v1000_v57 = vrot.slane %v998_v40, 4  ;;  %v1674_v32 = vld [vmem:[#allocation2 + $0x14] sm:$0x8] }
 0x192   : > { %v1622_v48 = vsel %vm4769_vm7, %v4728_v3, 0  ;;  %v1660_v52 = vsel %vm4769_vm7, %v4739_v10, 0  ;;  %v1027_v58 = vsel %vm4664_vm15, %v1022_v31, %v4636_v15  ;;  %v1679_v1 = vsel %vm4718_vm11, %v4739_v10, 0 }
 0x193   : > { %1945 = vrot.lane.b32.xlu1 %v1928_v44, %s4210_s7  ;;  %2098 = vrot.lane.b32.xlu0 %v2081_v45, %s4209_s28  ;;  %v1904_v51 = vunpack.c.l.b16 %v1622_v48  ;;  %v2058_v41 = vunpack.c.l.b16 %v1660_v52  ;;  %v1174_v62 = vunpack.c.l.b16 %v1027_v58  ;;  %v1175_v63 = vunpack.c.h.b16 %v1027_v58 }
 0x194   : > { %v1001_v11 = vor.u32 %v1000_v57, %v997_v56  ;;  %v1153_v49 = vunpack.c.l.b16 %v997_v56  ;;  %v1154_v13 = vunpack.c.h.b16 %v997_v56  ;;  %v2135_v16 = vunpack.c.l.b16 %v1679_v1 }
 0x195   : > { %v1919_v61 = vpack.c.b16 %v1904_v51, %v1903_v47  ;;  %v2073_v9 = vpack.c.b16 %v2058_v41, %v2057_v53  ;;  %vm1178_vm9 = vcmp.ne.s32.totalorder %v1174_v62, %v4643_v20  ;;  %vm1179_vm10 = vcmp.ne.s32.totalorder %v1175_v63, %v4648_v23 }
 0x196   : > { %v1002_v19 = vrot.slane %v1001_v11, 4  ;;  %vm1157_vm12 = vcmp.ne.s32.totalorder %v1153_v49, %v4643_v20  ;;  %vm1158_vm13 = vcmp.ne.s32.totalorder %v1154_v13, %v4648_v23  ;;  %vm4801_vm14 = vmpackc.low %vm1179_vm10, %vm1178_vm9  ;;  %v6133_v22 = vmov 0 }
 0x197   : > { %v4793_v14 = vrot.slane %v1919_v61, 5  ;;  %v4797_v17 = vrot.slane %v2073_v9, 5  ;;  %v6134_v22 = vsel %vm4801_vm14, 4294967295, %v6133_v22  ;;  %vm4807_vm2 = vmpackc.low %vm1158_vm13, %vm1157_vm12  ;;  %v1680_v28 = vsel %vm4801_vm14, %v4791_v6, 0 }
 0x198   : > { %v1813_v30 = vshrl.u32 %v3664_v4, 16  ;;  %v1816_v31 = vshll.u32 %v3664_v4, 16  ;;  %v1007_v35 = vsel %vm4664_vm15, %v1002_v19, %v4636_v15  ;;  %v850_v37 = vadd.s32 32, %v4628_v0 }
 0x199   : > { %v1930_v26 = vsel %vm6041_vm1, %v1928_v44, %v4793_v14  ;;  %v1160_v38 = vunpack.c.l.b16 %v1007_v35  ;;  %v1161_v40 = vunpack.c.h.b16 %v1007_v35  ;;  %v1639_v44 = vsel %vm4807_vm2, %v1636_v21, 0 }
 0x19a   : > { %v2136_v47 = vunpack.c.l.b16 %v1680_v28  ;;  %v1815_v48 = vrot.slane %v1813_v30, 4  ;;  %v1818_v50 = vrot.slane %v1816_v31, 5  ;;  %v1677_v51 = vsel %vm4807_vm2, %v1674_v32, 0 }
 0x19b   : > { %1947 = vrot.lane.b32.xlu1 %v1930_v26, %s4210_s7  ;;  %vm899_vm3 = vcmp.ne.s32.totalorder %v867_v55, 15  ;;  %v2083_v52 = vsel %vm6041_vm1, %v2081_v45, %v4797_v17  ;;  %vm1164_vm5 = vcmp.ne.s32.totalorder %v1160_v38, %v4643_v20  ;;  %vm1165_vm6 = vcmp.ne.s32.totalorder %v1161_v40, %v4648_v23 }
 0x19c   : > { %v2151_v53 = vpack.c.b16 %v2136_v47, %v2135_v16  ;;  %vm1327_vm9 = vmpackc.low %vm899_vm3, %vm899_vm3  ;;  %v1980_v56 = vunpack.c.l.b16 %v1639_v44  ;;  %v4831_v57 = vunpack.c.l.b16 %v1677_v51  ;;  %v1391_v55 = vrot.slane %v4733_v5, 4 }
 0x19d   : > { %vm4827_vm10 = vmpackc.low %vm1165_vm6, %vm1164_vm5  ;;  %v1343_v58 = vsel %vm1327_vm9, 65537, %v6048_v7  ;;  %v4845_v4 = vor.u32 %v1818_v50, %v1815_v48  ;;  %v1641_v26 = vsel %vm4718_vm11, %v4728_v3, 0  ;;  %v1642_v30 = vsel %vm4801_vm14, %v4697_v18, 0 }
 0x19e   : > { %v1640_v45 = vsel %vm4827_vm10, %v4695_v54, 0  ;;  %2161 = vrot.lane.b32.xlu0 %v2151_v53, %s4210_s7  ;;  %v1678_v62 = vsel %vm4827_vm10, %v4697_v18, 0  ;;  %v1402_v63 = vshrl.u32 %v1343_v58, 16  ;;  %v1399_v5 = vsel %vm4672_vm0, %v1391_v55, %v4650_v24  ;;  %v3665_v54 = vld [vmem:[#allocation2 + $0x20] sm:$0xff] }
 0x19f   : > { %v1981_v1 = vunpack.c.l.b16 %v1640_v45  ;;  %v2134_v9 = vunpack.c.l.b16 %v1678_v62  ;;  %v1405_v49 = vshll.u32 %v1343_v58, 16  ;;  %v1528_v13 = vunpack.c.l.b16 %v1399_v5 }
 0x1a0   : > { %v1404_v11 = vrot.slane %v1402_v63, 7  ;;  %v1529_v16 = vunpack.c.h.b16 %v1399_v5  ;;  %v4853_v21 = vsel %vm6040_vm8, %v4633_v12, %v4845_v4  ;;  %v866_v32 = vand.u32 15, %v850_v37 }
 0x1a1   : > { %v1997_v19 = vpack.c.b16 %v1981_v1, %v1980_v56  ;;  %vm1532_vm12 = vcmp.ne.s32.totalorder %v1528_v13, %v4643_v20  ;;  %v1822_v3 = vshrl.u32 %v3665_v54, 16  ;;  %v1825_v35 = vshll.u32 %v3665_v54, 16 }
 0x1a2   : > { %v1407_v28 = vor.u32 %v1405_v49, %v1404_v11  ;;  %vm1533_vm13 = vcmp.ne.s32.totalorder %v1529_v16, %v4648_v23  ;;  %v853_v38 = vadd.s32 56, %v4628_v0  ;;  %v2150_v40 = vpack.c.b16 %v2134_v9, %v4831_v57 }
 0x1a3   : > { %2100 = vrot.lane.b32.xlu1 %v2083_v52, %s4209_s28  ;;  %2006 = vrot.lane.b32.xlu2 %v1997_v19, %s4211_s17  ;;  %vm4865_vm3 = vmpackc.low %vm1533_vm13, %vm1532_vm12  ;;  %v1982_v51 = vunpack.c.l.b16 %v1641_v26  ;;  %v4877_v52 = vld [vmem:[#allocation2 + $0x24] sm:$0xf]  ;;  %v1983_v37 = vunpack.c.l.b16 %v1642_v30  ;;  %vm882_vm5 = vcmp.ne.s32.totalorder %v866_v32, 0  ;;  %v1824_v56 = vrot.slane %v1822_v3, 4 }
 0x1a4   : > { %v1408_v44 = vsel %vm4672_vm0, %v4678_v43, %v1407_v28  ;;  %v1623_v50 = vsel %vm4865_vm3, %v4697_v18, 0  ;;  %v1661_v53 = vsel %vm4865_vm3, %v4791_v6, 0  ;;  %vm963_vm12 = vmpackc.low %vm882_vm5, %vm882_vm5  ;;  %v1827_v57 = vrot.slane %v1825_v35, 5 }
 0x1a5   : > { %v1535_v47 = vunpack.c.l.b16 %v1408_v44  ;;  %v1536_v48 = vunpack.c.h.b16 %v1408_v44  ;;  %v869_v18 = vand.u32 15, %v853_v38  ;;  %v1905_v55 = vunpack.c.l.b16 %v1623_v50 }
 0x1a6   : > { %1870 = vrot.lane.b32.xlu0 %v4853_v21, %s4209_s28  ;;  %v2059_v45 = vunpack.c.l.b16 %v1661_v53  ;;  %v979_v62 = vsel %vm963_vm12, 65537, %v6048_v7  ;;  %v1409_v63 = vrot.slane %v1404_v11, 4  ;;  %v852_v54 = vadd.s32 48, %v4628_v0 }
 0x1a7   : > { %vm1539_vm6 = vcmp.ne.s32.totalorder %v1535_v47, %v4643_v20  ;;  %vm1540_vm9 = vcmp.ne.s32.totalorder %v1536_v48, %v4648_v23  ;;  %v1034_v5 = vshll.u32 %v979_v62, 16  ;;  %v1998_v13 = vpack.c.b16 %v1983_v37, %v1982_v51 }
 0x1a8   : > { %vm4886_vm13 = vmpackc.low %vm1540_vm9, %vm1539_vm6  ;;  %v1038_v19 = vshrl.u32 %v979_v62, 16  ;;  %v4901_v26 = vor.u32 %v1827_v57, %v1824_v56  ;;  %vm901_vm5 = vcmp.ne.s32.totalorder %v869_v18, 15  ;;  %v1417_v28 = vsel %vm4672_vm0, %v1409_v63, %v4650_v24  ;;  %v4926_v63 = vld [vmem:[#allocation2 + $0x28] sm:$0xff] }
 0x1a9   : > { %v1624_v1 = vsel %vm4886_vm13, %v4739_v10, 0  ;;  %v1662_v9 = vsel %vm4886_vm13, %v4877_v52, 0  ;;  %v1036_v11 = vrot.slane %v1034_v5, 5  ;;  %vm1329_vm6 = vmpackc.low %vm901_vm5, %vm901_vm5  ;;  %v1542_v35 = vunpack.c.l.b16 %v1417_v28 }
 0x1aa   : > { %v1906_v49 = vunpack.c.l.b16 %v1624_v1  ;;  %v2060_v16 = vunpack.c.l.b16 %v1662_v9  ;;  %v1040_v3 = vrot.slane %v1038_v19, 4  ;;  %v1345_v44 = vsel %vm1329_vm6, 65537, %v6048_v7 }
 0x1ab   : > { %2191 = vrot.lane.b32.xlu1 %v4845_v4, %s4211_s17  ;;  %2159 = vrot.lane.b32.xlu2 %v2150_v40, %s4210_s7  ;;  %v1037_v38 = vsel %vm4664_vm15, %v4659_v29, %v1036_v11  ;;  %v1543_v40 = vunpack.c.h.b16 %v1417_v28  ;;  %v868_v47 = vand.u32 15, %v852_v54  ;;  %v1420_v56 = vshrl.u32 %v1345_v44, 16 }
 0x1ac   : > { %v1920_v30 = vpack.c.b16 %v1906_v49, %v1905_v55  ;;  %v2074_v32 = vpack.c.b16 %v2060_v16, %v2059_v45  ;;  %v1041_v51 = vor.u32 %v1040_v3, %v1036_v11  ;;  %v1181_v37 = vunpack.c.l.b16 %v1037_v38  ;;  %v4956_v11 = vld [vmem:[#allocation2 + $0x28] sm:$0xf] }
 0x1ad   : > { %v1182_v53 = vunpack.c.h.b16 %v1037_v38  ;;  %v1423_v57 = vshll.u32 %v1345_v44, 16  ;;  %vm4915_vm9 = vcmp.ne.s32.totalorder %v1542_v35, %v4643_v20  ;;  %v4930_v1 = vrot.slane %v1420_v56, 7 }
 0x1ae   : > { %v4910_v48 = vrot.slane %v1920_v30, 5  ;;  %v4912_v50 = vrot.slane %v2074_v32, 5  ;;  %v1042_v62 = vrot.slane %v1041_v51, 4  ;;  %vm1185_vm12 = vcmp.ne.s32.totalorder %v1181_v37, %v4643_v20  ;;  %v4983_v51 = vld [vmem:[#allocation2 + $0x2c] sm:$0xf] }
 0x1af   : > { %vm1186_vm5 = vcmp.ne.s32.totalorder %v1182_v53, %v4648_v23  ;;  %vm1547_vm6 = vcmp.ne.s32.totalorder %v1543_v40, %v4648_v23  ;;  %vm4933_vm8 = vcmp.ne.s32.totalorder %v868_v47, 0  ;;  %v1425_v16 = vor.u32 %v1423_v57, %v4930_v1 }
 0x1b0   : > { %v1932_v55 = vsel %vm6041_vm1, %v4793_v14, %v4910_v48  ;;  %v2085_v45 = vsel %vm6041_vm1, %v4797_v17, %v4912_v50  ;;  %v1047_v14 = vsel %vm4664_vm15, %v1042_v62, %v4636_v15  ;;  %vm4941_vm1 = vmpackc.low %vm1186_vm5, %vm1185_vm12  ;;  %v6147_v17 = vmov 0 }
 0x1b1   : > { %2102 = vrot.lane.b32.xlu0 %v2085_v45, %s4209_s28  ;;  %v6148_v17 = vsel %vm4941_vm1, 4294967295, %v6147_v17  ;;  %v1188_v5 = vunpack.c.l.b16 %v1047_v14  ;;  %v1189_v54 = vunpack.c.h.b16 %v1047_v14  ;;  %v1681_v49 = vsel %vm4941_vm1, %v4877_v52, 0  ;;  %vm4952_vm14 = vmpackc.low %vm1547_vm6, %vm4915_vm9 }
 0x1b2   : > { %vm6151_vm12 = vsmask.f32 3328  ;;  %v1625_v28 = vsel %vm4952_vm14, %v4791_v6, 0  ;;  %vm965_vm5 = vmpackc.low %vm4933_vm8, %vm4933_vm8  ;;  %v1831_v30 = vshrl.u32 %v4926_v63, 16  ;;  %v855_v32 = vadd.s32 72, %v4628_v0 }
 0x1b3   : > { %1949 = vrot.lane.b32.xlu1 %v1932_v55, %s4210_s7  ;;  %2008 = vrot.lane.b32.xlu2 %v1998_v13, %s4211_s17  ;;  %v4961_v13 = vsel %vm6151_vm12, %v4845_v4, %v4901_v26  ;;  %vm1192_vm9 = vcmp.ne.s32.totalorder %v1188_v5, %v4643_v20  ;;  %vm1193_vm6 = vcmp.ne.s32.totalorder %v1189_v54, %v4648_v23  ;;  %v2137_v3 = vunpack.c.l.b16 %v1681_v49 }
 0x1b4   : > { %6152 = vst [vmem:[#allocation27_spill] sm:$0xff] %v4961_v13  ;;  %v1426_v4 = vsel %vm4672_vm0, %v4678_v43, %v1425_v16  ;;  %vm4976_vm12 = vmpackc.low %vm1193_vm6, %vm1192_vm9  ;;  %v6153_v35 = vmov 0  ;;  %v1907_v40 = vunpack.c.l.b16 %v1625_v28  ;;  %v1663_v47 = vsel %vm4952_vm14, %v4956_v11, 0 }
 0x1b5   : > { %v6154_v35 = vsel %vm4976_vm12, 4294967295, %v6153_v35  ;;  %v1549_v38 = vunpack.c.l.b16 %v1426_v4  ;;  %v1550_v44 = vunpack.c.h.b16 %v1426_v4  ;;  %v1682_v37 = vsel %vm4976_vm12, %v4956_v11, 0 }
 0x1b6   : > { %v981_v53 = vsel %vm965_vm5, 65537, %v6048_v7  ;;  %v1643_v56 = vsel %vm4941_vm1, %v4739_v10, 0  ;;  %v1644_v57 = vsel %vm4976_vm12, %v4791_v6, 0  ;;  %v2138_v18 = vunpack.c.l.b16 %v1682_v37 }
 0x1b7   : > { %vm1553_vm8 = vcmp.ne.s32.totalorder %v1549_v38, %v4643_v20  ;;  %vm1554_vm9 = vcmp.ne.s32.totalorder %v1550_v44, %v4648_v23  ;;  %v1054_v55 = vshll.u32 %v981_v53, 16  ;;  %v6155_v45 = vmov 0 }
 0x1b8   : > { %vm4999_vm6 = vmpackc.low %vm1554_vm9, %vm1553_vm8  ;;  %v2061_v62 = vunpack.c.l.b16 %v1663_v47  ;;  %v1058_v9 = vshrl.u32 %v981_v53, 16  ;;  %v1984_v10 = vunpack.c.l.b16 %v1643_v56  ;;  %v1985_v14 = vunpack.c.l.b16 %v1644_v57 }
 0x1b9   : > { %1872 = vrot.lane.b32.xlu0 %v4961_v13, %s4209_s28  ;;  %v6156_v45 = vsel %vm4999_vm6, 4294967295, %v6155_v45  ;;  %v2152_v5 = vpack.c.b16 %v2138_v18, %v2137_v3  ;;  %v1626_v54 = vsel %vm4999_vm6, %v4877_v52, 0  ;;  %v1664_v49 = vsel %vm4999_vm6, %v4983_v51, 0 }
 0x1ba   : > { %v1834_v16 = vshll.u32 %v4926_v63, 16  ;;  %v5014_v28 = vunpack.c.l.b16 %v1274_v2  ;;  %v1908_v3 = vunpack.c.l.b16 %v1626_v54  ;;  %v2062_v4 = vunpack.c.l.b16 %v1664_v49 }
 0x1bb   : > { %2193 = vrot.lane.b32.xlu2 %v4961_v13, %s4211_s17  ;;  %v1056_v38 = vrot.slane %v1054_v55, 5  ;;  %2163 = vrot.lane.b32.xlu1 %v2152_v5, %s4210_s7  ;;  %v1060_v44 = vrot.slane %v1058_v9, 4  ;;  %v1999_v47 = vpack.c.b16 %v1985_v14, %v1984_v10  ;;  %v1833_v37 = vrot.slane %v1831_v30, 4 }
 0x1bc   : > { %v871_v53 = vand.u32 15, %v855_v32  ;;  %v1921_v56 = vpack.c.b16 %v1908_v3, %v1907_v40  ;;  %v2075_v63 = vpack.c.b16 %v2062_v4, %v2061_v62  ;;  %v1427_v60 = vrot.slane %v4930_v1, 4 }
 0x1bd   : > { %v1057_v59 = vsel %vm4664_vm15, %v4659_v29, %v1056_v38  ;;  %v1061_v2 = vor.u32 %v1060_v44, %v1056_v38  ;;  %v1836_v54 = vrot.slane %v1834_v16, 5  ;;  %v1697_v32 = vsel %vm4760_vm4, %v4791_v6, 0 }
 0x1be   : > { %v1195_v57 = vunpack.c.l.b16 %v1057_v59  ;;  %v1196_v18 = vunpack.c.h.b16 %v1057_v59  ;;  %v5023_v49 = vrot.slane %v1921_v56, 5  ;;  %v5025_v55 = vrot.slane %v2075_v63, 5  ;;  %v5061_v63 = vld [vmem:[#allocation2 + $0x30] sm:$0xf] }
 0x1bf   : > { %vm903_vm11 = vcmp.ne.s32.totalorder %v871_v53, 15  ;;  %v1435_v30 = vsel %vm4672_vm0, %v1427_v60, %v4650_v24  ;;  %v1062_v40 = vrot.slane %v1061_v2, 4  ;;  %vm6157_vm12 = vcmask 1042432   ;;  %v3667_v53 = vld [vmem:[#allocation2 + $0x30] sm:$0xff] }
 0x1c0   : > { %vm1199_vm5 = vcmp.ne.s32.totalorder %v1195_v57, %v4643_v20  ;;  %vm1200_vm8 = vcmp.ne.s32.totalorder %v1196_v18, %v4648_v23  ;;  %vm1331_vm9 = vmpackc.low %vm903_vm11, %vm903_vm11  ;;  %v1934_v1 = vsel %vm6157_vm12, %v4910_v48, %v5023_v49  ;;  %v6159_v9 = vmov 0 }
 0x1c1   : > { %vm6158_vm1 = vmmov %vm6157_vm12  ;;  %v1347_v10 = vsel %vm1331_vm9, 65537, %v6048_v7  ;;  %v1556_v14 = vunpack.c.l.b16 %v1435_v30  ;;  %v1067_v5 = vsel %vm4664_vm15, %v1062_v40, %v4636_v15  ;;  %v5050_v16 = vor.u32 %v1836_v54, %v1833_v37 }
 0x1c2   : > { %v2087_v62 = vsel %vm6158_vm1, %v4912_v50, %v5025_v55  ;;  %vm5041_vm6 = vmpackc.low %vm1200_vm8, %vm1199_vm5  ;;  %v1438_v48 = vshrl.u32 %v1347_v10, 16  ;;  %v1441_v3 = vshll.u32 %v1347_v10, 16  ;;  %v1202_v4 = vunpack.c.l.b16 %v1067_v5 }
 0x1c3   : > { %v6160_v9 = vsel %vm5041_vm6, 4294967295, %v6159_v9  ;;  %2104 = vrot.lane.b32.xlu0 %v2087_v62, %s4209_s28  ;;  %v1203_v38 = vunpack.c.h.b16 %v1067_v5  ;;  %v1683_v50 = vsel %vm5041_vm6, %v4983_v51, 0  ;;  %2010 = vrot.lane.b32.xlu2 %v1999_v47, %s4211_s17  ;;  %v1557_v44 = vunpack.c.h.b16 %v1435_v30 }
 0x1c4   : > { %v5059_v56 = vrot.slane %v2243_v34, 5  ;;  %1951 = vrot.lane.b32.xlu1 %v1934_v1, %s4210_s7  ;;  %v1440_v37 = vrot.slane %v1438_v48, 7  ;;  %vm1560_vm1 = vcmp.ne.s32.totalorder %v1556_v14, %v4643_v20  ;;  %v854_v59 = vadd.s32 64, %v4628_v0 }
 0x1c5   : > { %vm1206_vm12 = vcmp.ne.s32.totalorder %v1202_v4, %v4643_v20  ;;  %vm1207_vm11 = vcmp.ne.s32.totalorder %v1203_v38, %v4648_v23  ;;  %vm1561_vm5 = vcmp.ne.s32.totalorder %v1557_v44, %v4648_v23  ;;  %v6161_v8 = vmov 0  ;;  %v5101_v4 = vld [vmem:[#allocation2 + $0x34] sm:$0xf] }
 0x1c6   : > { %vm5072_vm8 = vmpackc.low %vm1207_vm11, %vm1206_vm12  ;;  %v2139_v25 = vunpack.c.l.b16 %v1683_v50  ;;  %v1443_v34 = vor.u32 %v1441_v3, %v1440_v37  ;;  %v870_v60 = vand.u32 15, %v854_v59  ;;  %v1645_v2 = vsel %vm5041_vm6, %v4877_v52, 0 }
 0x1c7   : > { %v6162_v8 = vsel %vm5072_vm8, 4294967295, %v6161_v8  ;;  %v1684_v57 = vsel %vm5072_vm8, %v5061_v63, 0  ;;  %vm6163_vm9 = vsmask.f32 3328  ;;  %vm5087_vm12 = vmpackc.low %vm1561_vm5, %vm1560_vm1  ;;  %v1646_v30 = vsel %vm5072_vm8, %v4956_v11, 0 }
 0x1c8   : > { %v5085_v18 = vsel %vm6163_vm9, %v4901_v26, %v5050_v16  ;;  %v1840_v40 = vshrl.u32 %v3667_v53, 16  ;;  %v2140_v1 = vunpack.c.l.b16 %v1684_v57  ;;  %v1444_v62 = vsel %vm4672_vm0, %v4678_v43, %v1443_v34 }
 0x1c9   : > { %6164 = vst [vmem:[#allocation28_spill] sm:$0xff] %v5085_v18  ;;  %v1627_v10 = vsel %vm5087_vm12, %v4956_v11, 0  ;;  %v857_v26 = vadd.s32 88, %v4628_v0  ;;  %v1563_v14 = vunpack.c.l.b16 %v1444_v62  ;;  %v1564_v5 = vunpack.c.h.b16 %v1444_v62 }
 0x1ca   : > { %v1986_v48 = vunpack.c.l.b16 %v1645_v2  ;;  %v1843_v3 = vshll.u32 %v3667_v53, 16  ;;  %v2153_v38 = vpack.c.b16 %v2140_v1, %v2139_v25  ;;  %v1665_v50 = vsel %vm5087_vm12, %v5061_v63, 0 }
 0x1cb   : > { %1874 = vrot.lane.b32.xlu0 %v5085_v18, %s4209_s28  ;;  %vm886_vm1 = vcmp.ne.s32.totalorder %v870_v60, 0  ;;  %v1445_v44 = vrot.slane %v1440_v37, 4  ;;  %vm1567_vm11 = vcmp.ne.s32.totalorder %v1563_v14, %v4643_v20  ;;  %vm1568_vm5 = vcmp.ne.s32.totalorder %v1564_v5, %v4648_v23  ;;  %2195 = vrot.lane.b32.xlu2 %v5085_v18, %s4211_s17 }
 0x1cc   : > { %v1909_v59 = vunpack.c.l.b16 %v1627_v10  ;;  %vm967_vm9 = vmpackc.low %vm886_vm1, %vm886_vm1  ;;  %v1987_v53 = vunpack.c.l.b16 %v1646_v30  ;;  %2165 = vrot.lane.b32.xlu1 %v2153_v38, %s4210_s7  ;;  %v2063_v34 = vunpack.c.l.b16 %v1665_v50  ;;  %v1842_v37 = vrot.slane %v1840_v40, 4 }
 0x1cd   : > { %vm5113_vm8 = vmpackc.low %vm1568_vm5, %vm1567_vm11  ;;  %v983_v60 = vsel %vm967_vm9, 65537, %v6048_v7  ;;  %v873_v2 = vand.u32 15, %v857_v26  ;;  %v1845_v62 = vrot.slane %v1843_v3, 5  ;;  %v5128_v10 = vunpack.c.l.b16 %v1697_v32 }
 0x1ce   : > { %v1628_v57 = vsel %vm5113_vm8, %v4983_v51, 0  ;;  %v1666_v1 = vsel %vm5113_vm8, %v5101_v4, 0  ;;  %v1074_v30 = vshll.u32 %v983_v60, 16  ;;  %v1078_v40 = vshrl.u32 %v983_v60, 16 }
 0x1cf   : > { %v1910_v14 = vunpack.c.l.b16 %v1628_v57  ;;  %v2064_v5 = vunpack.c.l.b16 %v1666_v1  ;;  %v2000_v38 = vpack.c.b16 %v1987_v53, %v1986_v48  ;;  %vm905_vm1 = vcmp.ne.s32.totalorder %v873_v2, 15 }
 0x1d0   : > { %v1076_v26 = vrot.slane %v1074_v30, 5  ;;  %v1453_v50 = vsel %vm4672_vm0, %v1445_v44, %v4650_v24  ;;  %v1080_v7 = vrot.slane %v1078_v40, 4  ;;  %vm1333_vm11 = vmpackc.low %vm905_vm1, %vm905_vm1  ;;  %v5136_v6 = vor.u32 %v1845_v62, %v1842_v37 }
 0x1d1   : > { %v1922_v61 = vpack.c.b16 %v1910_v14, %v1909_v59  ;;  %v2076_v47 = vpack.c.b16 %v2064_v5, %v2063_v34  ;;  %v1570_v3 = vunpack.c.l.b16 %v1453_v50  ;;  %v6169_v32 = vmov 0  }
 0x1d2   : > { %v1077_v36 = vsel %vm4664_vm15, %v4659_v29, %v1076_v26  ;;  %v1349_v60 = vsel %vm1333_vm11, 65537, %v6169_v32  ;;  %v1571_v57 = vunpack.c.h.b16 %v1453_v50  ;;  %v1081_v2 = vor.u32 %v1080_v7, %v1076_v26 }
 0x1d3   : > { %v5139_v48 = vrot.slane %v1922_v61, 5  ;;  %v5141_v53 = vrot.slane %v2076_v47, 5  ;;  %v1209_v44 = vunpack.c.l.b16 %v1077_v36  ;;  %v1210_v59 = vunpack.c.h.b16 %v1077_v36  ;;  %2012 = vrot.lane.b32.xlu2 %v2000_v38, %s4211_s17  ;;  %v3668_v47 = vld [vmem:[#allocation2 + $0x38] sm:$0xff] }
 0x1d4   : > { %v1456_v34 = vshrl.u32 %v1349_v60, 16  ;;  %v1459_v1 = vshll.u32 %v1349_v60, 16  ;;  %vm5145_vm4 = vcmp.ne.s32.totalorder %v1570_v3, %v4643_v20  ;;  %vm6172_vm5 = vcmask 1042432   ;;  %v5194_v3 = vld [vmem:[#allocation2 + $0x38] sm:$0xf] }
 0x1d5   : > { %v1936_v37 = vsel %vm6172_vm5, %v5023_v49, %v5139_v48  ;;  %vm6173_vm9 = vmmov %vm6172_vm5  ;;  %v1082_v7 = vrot.slane %v1081_v2, 4  ;;  %vm1213_vm1 = vcmp.ne.s32.totalorder %v1209_v44, %v4643_v20  ;;  %v6174_v62 = vsel %vm4769_vm7, %v4877_v52, 0 }
 0x1d6   : > { %v2089_v61 = vsel %vm6173_vm9, %v5025_v55, %v5141_v53  ;;  %v5160_v14 = vunpack.c.l.b16 %v6174_v62  ;;  %1953 = vrot.lane.b32.xlu1 %v1936_v37, %s4210_s7  ;;  %vm1214_vm11 = vcmp.ne.s32.totalorder %v1210_v59, %v4648_v23  ;;  %v5165_v49 = vrot.slane %v1456_v34, 7 }
 0x1d7   : > { %2106 = vrot.lane.b32.xlu0 %v2089_v61, %s4209_s28  ;;  %vm1575_vm5 = vcmp.ne.s32.totalorder %v1571_v57, %v4648_v23  ;;  %v1699_v55 = vsel %vm4865_vm3, %v4956_v11, 0  ;;  %v1087_v46 = vsel %vm4664_vm15, %v1082_v7, %v4636_v15  ;;  %vm5174_vm7 = vmpackc.low %vm1214_vm11, %vm1213_vm1  ;;  %v6175_v52 = vmov 0  ;;  %v3679_v61 = vld [vmem:[%s6186_s0 + $0x38] sm:$0xff] }
 0x1d8   : > { %v6176_v52 = vsel %vm5174_vm7, 4294967295, %v6175_v52  ;;  %vm6178_vm9 = vsmask.f32 3328  ;;  %v856_v40 = vadd.s32 80, %v4628_v0  ;;  %v1216_v26 = vunpack.c.l.b16 %v1087_v46  ;;  %vm5190_vm3 = vmpackc.low %vm1575_vm5, %vm5145_vm4  ;;  %v5215_v7 = vld [vmem:[#allocation2 + $0x3c] sm:$0xf]  ;;  %2809 = vmatpush.bf16.msrb.mxu3 %v3679_v61 }
 0x1d9   : > { %6177 = vst [vmem:[#allocation29_spill] sm:$0xff] %v6176_v52  ;;  %v5181_v5 = vsel %vm6178_vm9, %v5050_v16, %v5136_v6  ;;  %v1217_v38 = vunpack.c.h.b16 %v1087_v46  ;;  %v1685_v31 = vsel %vm5174_vm7, %v5101_v4, 0  ;;  %v1461_v11 = vor.u32 %v1459_v1, %v5165_v49 }
 0x1da   : > { %6179 = vst [vmem:[#allocation30_spill] sm:$0xff] %v5181_v5  ;;  %v6180_v50 = vmov 0  ;;  %v1629_v16 = vsel %vm5190_vm3, %v5061_v63, 0  ;;  %v1849_v36 = vshrl.u32 %v3668_v47, 16  ;;  %v1852_v60 = vshll.u32 %v3668_v47, 16 }
 0x1db   : > { %v6181_v50 = vsel %vm5190_vm3, 4294967295, %v6180_v50  ;;  %v859_v57 = vadd.s32 104, %v4628_v0  ;;  %vm1220_vm1 = vcmp.ne.s32.totalorder %v1216_v26, %v4643_v20  ;;  %vm1221_vm11 = vcmp.ne.s32.totalorder %v1217_v38, %v4648_v23  ;;  %2197 = vrot.lane.b32.xlu2 %v5181_v5, %s4211_s17  ;;  %v5228_v38 = vld [vmem:[#allocation2 + $0x4] sm:$0x8] }
 0x1dc   : > { %6182 = vst [vmem:[#allocation31_spill] sm:$0xff] %v6181_v50  ;;  %v2141_v2 = vunpack.c.l.b16 %v1685_v31  ;;  %v1462_v44 = vsel %vm4672_vm0, %v4678_v43, %v1461_v11  ;;  %vm5205_vm4 = vmpackc.low %vm1221_vm11, %vm1220_vm1  ;;  %v6183_v59 = vmov 0  ;;  %v1911_v30 = vunpack.c.l.b16 %v1629_v16 }
 0x1dd   : > { %v6184_v59 = vsel %vm5205_vm4, 4294967295, %v6183_v59  ;;  %v1577_v34 = vunpack.c.l.b16 %v1462_v44  ;;  %v1578_v1 = vunpack.c.h.b16 %v1462_v44  ;;  %v1667_v37 = vsel %vm5190_vm3, %v5194_v3, 0 }
 0x1de   : > { %6185 = vst [vmem:[#allocation32_spill] sm:$0xff] %v6184_v59  ;;  %v1686_v47 = vsel %vm5205_vm4, %v5194_v3, 0  ;;  %v872_v62 = vand.u32 15, %v856_v40  ;;  %v1647_v46 = vsel %vm5174_vm7, %v4983_v51, 0  ;;  %v1648_v26 = vsel %vm5205_vm4, %v5061_v63, 0 }
 0x1df   : > { %v2142_v31 = vunpack.c.l.b16 %v1686_v47  ;;  %vm1581_vm5 = vcmp.ne.s32.totalorder %v1577_v34, %v4643_v20  ;;  %vm1582_vm9 = vcmp.ne.s32.totalorder %v1578_v1, %v4648_v23  ;;  %v1988_v11 = vunpack.c.l.b16 %v1647_v46  ;;  %1876 = vrot.lane.b32.xlu0 %v5181_v5, %s4209_s28  ;;  %v3678_v47 = vld [vmem:[%s6186_s0 + $0x30] sm:$0xff] }
 0x1e0   : > { %vm5234_vm1 = vmpackc.low %vm1582_vm9, %vm1581_vm5  ;;  %v6187_v40 = vmov 0  ;;  %v2065_v16 = vunpack.c.l.b16 %v1667_v37  ;;  %vm888_vm11 = vcmp.ne.s32.totalorder %v872_v62, 0  ;;  %v1989_v44 = vunpack.c.l.b16 %v1648_v26  ;;  %2810 = vmatpush.bf16.msrb.mxu3 %v3678_v47 }
 0x1e1   : > { %v6188_v40 = vsel %vm5234_vm1, 4294967295, %v6187_v40  ;;  %v1851_v18 = vrot.slane %v1849_v36, 4  ;;  %v2154_v59 = vpack.c.b16 %v2142_v31, %v2141_v2  ;;  %v1630_v34 = vsel %vm5234_vm1, %v5101_v4, 0  ;;  %vm969_vm4 = vmpackc.low %vm888_vm11, %vm888_vm11 }
 0x1e2   : > { %6189 = vst [vmem:[#allocation33_spill] sm:$0xff] %v6188_v40  ;;  %v1668_v1 = vsel %vm5234_vm1, %v5215_v7, 0  ;;  %v1854_v61 = vrot.slane %v1852_v60, 5  ;;  %v1912_v46 = vunpack.c.l.b16 %v1630_v34  ;;  %v985_v62 = vsel %vm969_vm4, 65537, %v6169_v32 }
 0x1e3   : > { %v2066_v37 = vunpack.c.l.b16 %v1668_v1  ;;  %v5248_v36 = vunpack.c.l.b16 %v1699_v55  ;;  %2167 = vrot.lane.b32.xlu1 %v2154_v59, %s4210_s7  ;;  %v1094_v2 = vshll.u32 %v985_v62, 16  ;;  %v1098_v26 = vshrl.u32 %v985_v62, 16 }
 0x1e4   : > { %v2001_v31 = vpack.c.b16 %v1989_v44, %v1988_v11  ;;  %v1923_v5 = vpack.c.b16 %v1912_v46, %v1911_v30  ;;  %v875_v40 = vand.u32 15, %v859_v57  ;;  %v1463_v60 = vrot.slane %v5165_v49, 4 }
 0x1e5   : > { %v2077_v52 = vpack.c.b16 %v2066_v37, %v2065_v16  ;;  %v1096_v34 = vrot.slane %v1094_v2, 5  ;;  %v1100_v1 = vrot.slane %v1098_v26, 4  ;;  %v5255_v50 = vor.u32 %v1854_v61, %v1851_v18  ;;  %v3677_v18 = vld [vmem:[%s6186_s0 + $0x28] sm:$0xff]  ;;  %v5289_v37 = vld [vmem:[#allocation2 + $0x40] sm:$0xf] }
 0x1e6   : > { %v858_v55 = vadd.s32 96, %v4628_v0  ;;  %v5258_v13 = vrot.slane %v1923_v5, 5  ;;  %2014 = vrot.lane.b32.xlu2 %v2001_v31, %s4211_s17  ;;  %vm5263_vm4 = vcmp.ne.s32.totalorder %v875_v40, 15  ;;  %v1471_v49 = vsel %vm4672_vm0, %v1463_v60, %v4650_v24  ;;  %2811 = vmatpush.bf16.msrb.mxu3 %v3677_v18 }
 0x1e7   : > { %v5260_v59 = vrot.slane %v2077_v52, 5  ;;  %v1097_v52 = vsel %vm4664_vm15, %v4659_v29, %v1096_v34  ;;  %v1101_v5 = vor.u32 %v1100_v1, %v1096_v34  ;;  %vm1335_vm5 = vmpackc.low %vm5263_vm4, %vm5263_vm4  ;;  %v1584_v30 = vunpack.c.l.b16 %v1471_v49 }
 0x1e8   : > { %v1585_v11 = vunpack.c.h.b16 %v1471_v49  ;;  %vm6192_vm9 = vcmask 1042432   ;;  %v1223_v44 = vunpack.c.l.b16 %v1097_v52  ;;  %v1224_v61 = vunpack.c.h.b16 %v1097_v52 }
 0x1e9   : > { %v1938_v40 = vsel %vm6192_vm9, %v5139_v48, %v5258_v13  ;;  %vm6193_vm11 = vmmov %vm6192_vm9  ;;  %v1102_v47 = vrot.slane %v1101_v5, 4  ;;  %v1351_v46 = vsel %vm1335_vm5, 65537, %v6169_v32  ;;  %vm1588_vm7 = vcmp.ne.s32.totalorder %v1584_v30, %v4643_v20 }
 0x1ea   : > { %v2091_v16 = vsel %vm6193_vm11, %v5141_v53, %v5260_v59  ;;  %vm1589_vm4 = vcmp.ne.s32.totalorder %v1585_v11, %v4648_v23  ;;  %vm1227_vm1 = vcmp.ne.s32.totalorder %v1223_v44, %v4643_v20  ;;  %vm1228_vm9 = vcmp.ne.s32.totalorder %v1224_v61, %v4648_v23 }
 0x1eb   : > { %2108 = vrot.lane.b32.xlu0 %v2091_v16, %s4209_s28  ;;  %v1474_v48 = vshrl.u32 %v1351_v46, 16  ;;  %v1477_v62 = vshll.u32 %v1351_v46, 16  ;;  %vm5293_vm11 = vmpackc.low %vm1589_vm4, %vm1588_vm7  ;;  %v6194_v53 = vmov 0  ;;  %1955 = vrot.lane.b32.xlu1 %v1938_v40, %s4210_s7  ;;  %v1107_v2 = vsel %vm4664_vm15, %v1102_v47, %v4636_v15 }
 0x1ec   : > { %v6195_v53 = vsel %vm5293_vm11, 4294967295, %v6194_v53  ;;  %vm5301_vm5 = vmpackc.low %vm1228_vm9, %vm1227_vm1  ;;  %v6197_v26 = vmov 0  ;;  %v1631_v31 = vsel %vm5293_vm11, %v5194_v3, 0  ;;  %v1669_v60 = vsel %vm5293_vm11, %v5289_v37, 0 }
 0x1ed   : > { %6196 = vst [vmem:[#allocation34_spill] sm:$0xff] %v6195_v53  ;;  %v6198_v26 = vsel %vm5301_vm5, 4294967295, %v6197_v26  ;;  %v874_v34 = vand.u32 15, %v858_v55  ;;  %v1230_v1 = vunpack.c.l.b16 %v1107_v2  ;;  %v1231_v57 = vunpack.c.h.b16 %v1107_v2  ;;  %v5324_v55 = vld [vmem:[#allocation2 + $0x48] sm:$0xf] }
 0x1ee   : > { %6199 = vst [vmem:[#allocation35_spill] sm:$0xff] %v6198_v26  ;;  %v1687_v49 = vsel %vm5301_vm5, %v5215_v7, 0  ;;  %v5314_v18 = vrot.slane %v1474_v48, 7  ;;  %vm6200_vm7 = vsmask.f32 3328  ;;  %v1913_v16 = vunpack.c.l.b16 %v1631_v31 }
 0x1ef   : > { %v2143_v5 = vunpack.c.l.b16 %v1687_v49  ;;  %v5322_v30 = vsel %vm6200_vm7, %v5136_v6, %v5255_v50  ;;  %vm890_vm1 = vcmp.ne.s32.totalorder %v874_v34, 0  ;;  %vm1234_vm4 = vcmp.ne.s32.totalorder %v1230_v1, %v4643_v20 }
 0x1f0   : > { %6201 = vst [vmem:[#allocation36_spill] sm:$0xff] %v5322_v30  ;;  %vm1235_vm9 = vcmp.ne.s32.totalorder %v1231_v57, %v4648_v23  ;;  %v1479_v11 = vor.u32 %v1477_v62, %v5314_v18  ;;  %2199 = vrot.lane.b32.xlu2 %v5322_v30, %s4211_s17  ;;  %vm971_vm3 = vmpackc.low %vm890_vm1, %vm890_vm1  ;;  %v6202_v6 = vmov 0  ;;  %v2067_v44 = vunpack.c.l.b16 %v1669_v60  ;;  %v5353_v57 = vld [vmem:[#allocation2 + $0x44] sm:$0xf] }
 0x1f1   : > { %vm5334_vm6 = vmpackc.low %vm1235_vm9, %vm1234_vm4  ;;  %v987_v61 = vsel %vm971_vm3, 65537, %v6169_v32  ;;  %v1649_v47 = vsel %vm5301_vm5, %v5101_v4, 0 }
 0x1f2   : > { %v6203_v6 = vsel %vm5334_vm6, 4294967295, %v6202_v6  ;;  %v1688_v46 = vsel %vm5334_vm6, %v5289_v37, 0  ;;  %v1480_v48 = vsel %vm4672_vm0, %v4678_v43, %v1479_v11  ;;  %v1114_v62 = vshll.u32 %v987_v61, 16 }
 0x1f3   : > { %v1118_v2 = vshrl.u32 %v987_v61, 16  ;;  %v2144_v34 = vunpack.c.l.b16 %v1688_v46  ;;  %1878 = vrot.lane.b32.xlu0 %v5322_v30, %s4209_s28  ;;  %v1591_v31 = vunpack.c.l.b16 %v1480_v48  ;;  %v1592_v60 = vunpack.c.h.b16 %v1480_v48  ;;  %v3669_v46 = vld [vmem:[#allocation2 + $0x40] sm:$0xff] }
 0x1f4   : > { %v1650_v1 = vsel %vm5334_vm6, %v5194_v3, 0  ;;  %v1116_v49 = vrot.slane %v1114_v62, 5  ;;  %v1990_v52 = vunpack.c.l.b16 %v1649_v47  ;;  %v6204_v11 = vsel %vm4807_vm2, %v5228_v38, 0  ;;  %v3676_v38 = vld [vmem:[%s6186_s0 + $0x20] sm:$0xff] }
 0x1f5   : > { %v1120_v40 = vrot.slane %v1118_v2, 4  ;;  %v1991_v26 = vunpack.c.l.b16 %v1650_v1  ;;  %v2155_v53 = vpack.c.b16 %v2144_v34, %v2143_v5  ;;  %vm1595_vm3 = vcmp.ne.s32.totalorder %v1591_v31, %v4643_v20  ;;  %2812 = vmatpush.bf16.msrb.mxu3 %v3676_v38 }
 0x1f6   : > { %vm1596_vm7 = vcmp.ne.s32.totalorder %v1592_v60, %v4648_v23  ;;  %v5361_v61 = vunpack.c.l.b16 %v6204_v11  ;;  %v1117_v47 = vsel %vm4664_vm15, %v4659_v29, %v1116_v49  ;;  %v6207_v2 = vsel %vm4827_vm10, %v4676_v42, 0  ;;  %v3687_v42 = vld [vmem:[%s6186_s0 + $0x78] sm:$0xff] }
 0x1f7   : > { %vm5363_vm1 = vmpackc.low %vm1596_vm7, %vm1595_vm3  ;;  %v1121_v5 = vor.u32 %v1120_v40, %v1116_v49  ;;  %v2002_v62 = vpack.c.b16 %v1991_v26, %v1990_v52  ;;  %v5374_v27 = vunpack.c.l.b16 %v6207_v2  ;;  %2169 = vrot.lane.b32.xlu1 %v2155_v53, %s4210_s7  ;;  %v1237_v52 = vunpack.c.l.b16 %v1117_v47  ;;  %v5390_v53 = vpop.permute.xlu0 %1866  ;;  %v3675_v49 = vld [vmem:[%s6186_s0 + $0x18] sm:$0xff]  ;;  %2858 = vmatpush.bf16.msrb.mxu1 %v3687_v42 }
 0x1f8   : > { %v1632_v34 = vsel %vm5363_vm1, %v5215_v7, 0  ;;  %v1670_v26 = vsel %vm5363_vm1, %v5353_v57, 0  ;;  %v1238_v41 = vunpack.c.h.b16 %v1117_v47  ;;  %v1858_v11 = vshrl.u32 %v3669_v46, 16 }
 0x1f9   : > { %v1914_v40 = vunpack.c.l.b16 %v1632_v34  ;;  %v2068_v31 = vunpack.c.l.b16 %v1670_v26  ;;  %v1122_v60 = vrot.slane %v1121_v5, 4  ;;  %2016 = vrot.lane.b32.xlu2 %v2002_v62, %s4211_s17  ;;  %vm1241_vm2 = vcmp.ne.s32.totalorder %v1237_v52, %v4643_v20  ;;  %v3686_v5 = vld [vmem:[%s6186_s0 + $0x70] sm:$0xff]  ;;  %2813 = vmatpush.bf16.msrb.mxu3 %v3675_v49 }
 0x1fa   : > { %vm1242_vm10 = vcmp.ne.s32.totalorder %v1238_v41, %v4648_v23  ;;  %v1861_v47 = vshll.u32 %v3669_v46, 16  ;;  %v1701_v62 = vsel %vm4952_vm14, %v5061_v63, 0  ;;  %v6208_v26 = vmov 0 }
 0x1fb   : > { %v1924_v2 = vpack.c.b16 %v1914_v40, %v1913_v16  ;;  %v2078_v38 = vpack.c.b16 %v2068_v31, %v2067_v44  ;;  %v1127_v34 = vsel %vm4664_vm15, %v1122_v60, %v4636_v15  ;;  %vm5408_vm4 = vmpackc.low %vm1242_vm10, %vm1241_vm2  ;;  %v1860_v42 = vrot.slane %v1858_v11, 4  ;;  %2859 = vmatpush.bf16.msrb.mxu1 %v3686_v5 }
 0x1fc   : > { %v6209_v26 = vsel %vm5408_vm4, 4294967295, %v6208_v26  ;;  %v1244_v46 = vunpack.c.l.b16 %v1127_v34  ;;  %v1245_v52 = vunpack.c.h.b16 %v1127_v34  ;;  %v1689_v41 = vsel %vm5408_vm4, %v5353_v57, 0 }
 0x1fd   : > { %v5415_v1 = vrot.slane %v1924_v2, 5  ;;  %v5417_v19 = vrot.slane %v2078_v38, 5  ;;  %v5419_v63 = vunpack.c.l.b16 %v1689_v41  ;;  %v1863_v16 = vrot.slane %v1861_v47, 5  ;;  %v3943_v47 = vld [vmem:[#allocation2 + $0x10] sm:$0xf] }
 0x1fe   : > { %vm1248_vm14 = vcmp.ne.s32.totalorder %v1244_v46, %v4643_v20  ;;  %vm1249_vm9 = vcmp.ne.s32.totalorder %v1245_v52, %v4648_v23  ;;  %v861_v44 = vadd.s32 120, %v4628_v0  ;;  %v1481_v40 = vrot.slane %v5314_v18, 4  ;;  %v3674_v18 = vld [vmem:[%s6186_s0 + $0x10] sm:$0xff] }
 0x1ff   : > { %vm6210_vm3 = vcmask 1042432   ;;  %vm5431_vm2 = vmpackc.low %vm1249_vm9, %vm1248_vm14  ;;  %v6212_v11 = vmov 0  ;;  %v5435_v49 = vor.u32 %v1863_v16, %v1860_v42  ;;  %vm6214_vm10 = vnez %v6134_v22  ;;  %v3685_v22 = vld [vmem:[%s6186_s0 + $0x68] sm:$0xff]  ;;  %2814 = vmatpush.bf16.msrb.mxu3 %v3674_v18  ;;  %v1869_v58 = vpop.permute.xlu0 %1868 }
 0x200   : > { %v1940_v31 = vsel %vm6210_vm3, %v5258_v13, %v5415_v1  ;;  %vm6211_vm7 = vmmov %vm6210_vm3  ;;  %v6213_v11 = vsel %vm5431_vm2, 4294967295, %v6212_v11  ;;  %v1275_v2 = vsel %vm6214_vm10, %v3943_v47, 0  ;;  %v1690_v13 = vsel %vm5431_vm2, %v5324_v55, 0  ;;  %v3673_v42 = vld [vmem:[%s6186_s0 + $0x8] sm:$0xff]  ;;  %2860 = vmatpush.bf16.msrb.mxu1 %v3685_v22 }
 0x201   : > { %v2093_v60 = vsel %vm6211_vm7, %v5260_v59, %v5417_v19  ;;  %1957 = vrot.lane.b32.xlu1 %v1940_v31, %s4210_s7  ;;  %v877_v59 = vand.u32 15, %v861_v44  ;;  %v1489_v5 = vsel %vm4672_vm0, %v1481_v40, %v4650_v24  ;;  %v1732_v38 = vunpack.c.l.b16 %v1275_v2  ;;  %v2007_v40 = vpop.permute.xlu2 %2006 }
 0x202   : > { %2110 = vrot.lane.b32.xlu0 %v2093_v60, %s4209_s28  ;;  %v2146_v34 = vunpack.c.l.b16 %v1690_v13  ;;  %vm6215_vm14 = vsmask.f32 3328  ;;  %v1598_v52 = vunpack.c.l.b16 %v1489_v5  ;;  %v1599_v41 = vunpack.c.h.b16 %v1489_v5  ;;  %v5490_v13 = vld [vmem:[#allocation2 + $0x48] sm:$0xff] }
 0x203   : > { %v5456_v46 = vsel %vm6215_vm14, %v5255_v50, %v5435_v49  ;;  %v6217_v24 = vsel %vm4886_vm13, %v4983_v51, 0  ;;  %v5467_v44 = vunpack.c.l.b16 %v1701_v62  ;;  %vm6066_vm9 = vcmask 261120   ;;  %v3684_v50 = vld [vmem:[%s6186_s0 + $0x60] sm:$0xff]  ;;  %2815 = vmatpush.bf16.msrb.mxu3 %v3673_v42 }
 0x204   : > { %6216 = vst [vmem:[#allocation37_spill] sm:$0xff] %v5456_v46  ;;  %v5465_v16 = vunpack.c.l.b16 %v6217_v24  ;;  %vm909_vm3 = vcmp.ne.s32.totalorder %v877_v59, 15  ;;  %2201 = vrot.lane.b32.xlu2 %v5456_v46, %s4211_s17  ;;  %vm1602_vm10 = vcmp.ne.s32.totalorder %v1598_v52, %v4643_v20  ;;  %vm1603_vm13 = vcmp.ne.s32.totalorder %v1599_v41, %v4648_v23  ;;  %2861 = vmatpush.bf16.msrb.mxu1 %v3684_v50  ;;  %v3672_v42 = vld [vmem:[%s6186_s0] sm:$0xff]  ;;  %v3689_v24 = vld [vmem:[%s6186_s0 + $0x88] sm:$0xff] }
 0x205   : > { %vm1337_vm7 = vmpackc.low %vm909_vm3, %vm909_vm3  ;;  %v1747_v51 = vpack.c.b16 %v1732_v38, %v5014_v28  ;;  %v860_v62 = vadd.s32 112, %v4628_v0  ;;  %v2156_v31 = vpack.c.b16 %v2146_v34, %v5419_v63  ;;  %v1651_v2 = vsel %vm5408_vm4, %v5215_v7, 0  ;;  %v5500_v38 = vld [vmem:[#allocation2 + $0x50] sm:$0xf]  ;;  %2913 = vmatpush.bf16.msra.mxu2 %v3689_v24 }
 0x206   : > { %v1353_v60 = vsel %vm1337_vm7, 65537, %v6169_v32  ;;  %vm5480_vm14 = vmpackc.low %vm1603_vm13, %vm1602_vm10  ;;  %v1652_v18 = vsel %vm5431_vm2, %v5289_v37, 0  ;;  %vm6220_vm3 = vnez %v6156_v45  ;;  %v6221_v28 = vpack.c.b16 %v5374_v27, %v5361_v61 }
 0x207   : > { %v1492_v59 = vshrl.u32 %v1353_v60, 16  ;;  %v1495_v5 = vshll.u32 %v1353_v60, 16  ;;  %v1633_v22 = vsel %vm5480_vm14, %v5289_v37, 0  ;;  %v876_v34 = vand.u32 15, %v860_v62  ;;  %v3683_v60 = vld [vmem:[%s6186_s0 + $0x58] sm:$0xff]  ;;  %2816 = vmatpush.bf16.msrb.mxu3 %v3672_v42 }
 0x208   : > { %v2272_v63 = vsel %vm6066_vm9, %v6221_v28, %v5390_v53  ;;  %v1671_v61 = vsel %vm5480_vm14, %v5324_v55, 0  ;;  %v1992_v27 = vunpack.c.l.b16 %v1651_v2  ;;  %v1993_v53 = vunpack.c.l.b16 %v1652_v18  ;;  %2862 = vmatpush.bf16.msrb.mxu1 %v3683_v60 }
 0x209   : > { %v1494_v41 = vrot.slane %v1492_v59, 7  ;;  %2171 = vrot.lane.b32.xlu1 %v2156_v31, %s4210_s7  ;;  %v5521_v50 = vsel %vm6066_vm9, %v1747_v51, %v1869_v58  ;;  %vm6067_vm10 = vcmask 785408   ;;  %vm892_vm13 = vcmp.ne.s32.totalorder %v876_v34, 0  ;;  %v3688_v58 = vld [vmem:[%s6186_s0 + $0x80] sm:$0xff]  ;;  %v1946_v31 = vpop.permute.xlu1 %1945  ;;  %v5543_v42 = vpop.permute.xlu2 %2159 }
 0x20a   : > { %1880 = vrot.lane.b32.xlu0 %v5456_v46, %s4209_s28  ;;  %v2030_v62 = vshrl.u32 %v5490_v13, 16  ;;  %v5527_v18 = vunpack.c.l.b16 %v1633_v22  ;;  %vm973_vm7 = vmpackc.low %vm892_vm13, %vm892_vm13  ;;  %v2003_v28 = vpack.c.b16 %v1993_v53, %v1992_v27  ;;  %v2069_v59 = vunpack.c.l.b16 %v1671_v61  ;;  %v3682_v22 = vld [vmem:[%s6186_s0 + $0x50] sm:$0xff]  ;;  %v5547_v46 = vld [vmem:[#allocation2 + $0x4c] sm:$0xf]  ;;  %2914 = vmatpush.bf16.msra.mxu2 %v3688_v58 }
 0x20b   : > { %v1497_v2 = vor.u32 %v1495_v5, %v1494_v41  ;;  %v989_v34 = vsel %vm973_vm7, 65537, %v6169_v32  ;;  %v1499_v52 = vrot.slane %v1494_v41, 4  ;;  %v2033_v5 = vshll.u32 %v5490_v13, 16 }
 0x20c   : > { %vm6222_vm13 = vcmask 523264   ;;  %v1134_v24 = vshll.u32 %v989_v34, 16  ;;  %v1138_v61 = vshrl.u32 %v989_v34, 16  ;;  %2018 = vrot.lane.b32.xlu2 %v2003_v28, %s4211_s17  ;;  %v2032_v60 = vrot.slane %v2030_v62, 4  ;;  %2863 = vmatpush.bf16.msrb.mxu1 %v3682_v22 }
 0x20d   : > { %v1498_v27 = vsel %vm4672_vm0, %v4678_v43, %v1497_v2  ;;  %v2299_v53 = vsel %vm6222_vm13, %v2272_v63, %v1946_v31  ;;  %v5549_v43 = vpop.permute.xlu0 %2098  ;;  %v1612_v63 = vunpack.c.l.b16 %v1499_v52  ;;  %v1613_v2 = vunpack.c.h.b16 %v1499_v52 }
 0x20e   : > { %v1605_v32 = vunpack.c.l.b16 %v1498_v27  ;;  %v1606_v41 = vunpack.c.h.b16 %v1498_v27  ;;  %v2318_v13 = vsel %vm6067_vm10, %v2299_v53, %v2007_v40  ;;  %v1136_v30 = vrot.slane %v1134_v24, 5 }
 0x20f   : > { %v2439_v51 = vshrl.u32 %v2318_v13, 16  ;;  %v2442_v0 = vshll.u32 %v2318_v13, 16  ;;  %v1140_v39 = vrot.slane %v1138_v61, 4  ;;  %v2035_v34 = vrot.slane %v2033_v5, 5 }
 0x210   : > { %vm1609_vm0 = vcmp.ne.s32.totalorder %v1605_v32, %v4643_v20  ;;  %vm1610_vm7 = vcmp.ne.s32.totalorder %v1606_v41, %v4648_v23  ;;  %v1137_v62 = vsel %vm4664_vm15, %v4659_v29, %v1136_v30  ;;  %vm1617_vm10 = vcmp.ne.s32.totalorder %v1613_v2, %v4648_v23  ;;  %v3680_v32 = vld [vmem:[%s6186_s0 + $0x40] sm:$0xff] }
 0x211   : > { %vm5553_vm13 = vmpackc.low %vm1610_vm7, %vm1609_vm0  ;;  %v5557_v40 = vrot.slane %v2439_v51, 3  ;;  %v1141_v31 = vor.u32 %v1140_v39, %v1136_v30  ;;  %v1251_v22 = vunpack.c.l.b16 %v1137_v62  ;;  %v1252_v27 = vunpack.c.h.b16 %v1137_v62  ;;  %v3681_v51 = vld [vmem:[%s6186_s0 + $0x48] sm:$0xff]  ;;  %v1948_v5 = vpop.permute.xlu1 %1947  ;;  %v2009_v2 = vpop.permute.xlu2 %2008 }
 0x212   : > { %v1634_v58 = vsel %vm5553_vm13, %v5353_v57, 0  ;;  %v1672_v52 = vsel %vm5553_vm13, %v5547_v46, 0  ;;  %v2444_v30 = vrot.slane %v2442_v0, 4  ;;  %2864 = vmatpush.bf16.msrb.mxu1 %v3681_v51  ;;  %vm6227_vm2 = vcmask 523264  }
 0x213   : > { %v1916_v53 = vunpack.c.l.b16 %v1634_v58  ;;  %v2070_v24 = vunpack.c.l.b16 %v1672_v52  ;;  %v1142_v61 = vrot.slane %v1141_v31, 4  ;;  %vm1255_vm7 = vcmp.ne.s32.totalorder %v1251_v22, %v4643_v20  ;;  %v1289_v31 = vld [vmem:[#allocation2 + $0x48] sm:$0x1] }
 0x214   : > { %vm1256_vm9 = vcmp.ne.s32.totalorder %v1252_v27, %v4648_v23  ;;  %v2301_v62 = vsel %vm6227_vm2, %v5521_v50, %v1948_v5  ;;  %vm6228_vm4 = vcmask 785408   ;;  %vm6229_vm6 = vcmp.ne.s32.totalorder %v1612_v63, %v4643_v20 }
 0x215   : > { %v1925_v41 = vpack.c.b16 %v1916_v53, %v5527_v18  ;;  %v2079_v13 = vpack.c.b16 %v2070_v24, %v2069_v59  ;;  %v1147_v39 = vsel %vm4664_vm15, %v1142_v61, %v4636_v15  ;;  %vm5582_vm0 = vmpackc.low %vm1256_vm9, %vm1255_vm7  ;;  %v2320_v59 = vsel %vm6228_vm4, %v2301_v62, %v2009_v2  ;;  %v1656_v24 = vld [vmem:[#allocation2 + $0x50] sm:$0x1] }
 0x216   : > { %v1258_v58 = vunpack.c.l.b16 %v1147_v39  ;;  %v1259_v52 = vunpack.c.h.b16 %v1147_v39  ;;  %v1691_v18 = vsel %vm5582_vm0, %v5547_v46, 0  ;;  %vm5594_vm15 = vmpackc.low %vm1617_vm10, %vm6229_vm6  ;;  %v2446_v50 = vshrl.u32 %v2320_v59, 16  ;;  %2865 = vmatpush.bf16.msrb.mxu1 %v3680_v32 }
 0x217   : > { %v1941_v33 = vrot.slane %v1925_v41, 5  ;;  %v5598_v22 = vrot.slane %v2079_v13, 5  ;;  %v5600_v27 = vor.u32 %v2035_v34, %v2032_v60  ;;  %v2449_v51 = vshll.u32 %v2320_v59, 16  ;;  %v2162_v41 = vpop.permute.xlu0 %2161 }
 0x218   : > { %vm1262_vm2 = vcmp.ne.s32.totalorder %v1258_v58, %v4643_v20  ;;  %vm1263_vm9 = vcmp.ne.s32.totalorder %v1259_v52, %v4648_v23  ;;  %v1635_v53 = vsel %vm5594_vm15, %v1289_v31, 0  ;;  %vm6232_vm6 = vcmask 1042432  }
 0x219   : > { %v1942_v63 = vsel %vm6232_vm6, %v5415_v1, %v1941_v33  ;;  %vm6233_vm4 = vmmov %vm6232_vm6  ;;  %v2147_v34 = vunpack.c.l.b16 %v1691_v18  ;;  %v2448_v5 = vrot.slane %v2446_v50, 3  ;;  %v2451_v1 = vrot.slane %v2449_v51, 4  ;;  %v2101_v58 = vpop.permute.xlu1 %2100 }
 0x21a   : > { %v2095_v61 = vsel %vm6233_vm4, %v5417_v19, %v5598_v22  ;;  %vm5611_vm10 = vmpackc.low %vm1263_vm9, %vm1262_vm2  ;;  %1959 = vrot.lane.b32.xlu1 %v1942_v63, %s4210_s7  ;;  %v1917_v13 = vunpack.c.l.b16 %v1635_v53  ;;  %v2470_v39 = vshrl.u32 %v5059_v56, 16  ;;  %vm6236_vm7 = vsmask.f32 3328  ;;  %v2194_v63 = vpop.permute.xlu2 %2193 }
 0x21b   : > { %2112 = vrot.lane.b32.xlu0 %v2095_v61, %s4209_s28  ;;  %v1692_v32 = vsel %vm5611_vm10, %v5500_v38, 0  ;;  %v5624_v62 = vsel %vm6236_vm7, %v5435_v49, %v5600_v27  ;;  %vm2438_vm2 = vsmask.f32 4352  ;;  %v1673_v2 = vsel %vm5594_vm15, %v1656_v24, 0 }
 0x21c   : > { %v2148_v19 = vunpack.c.l.b16 %v1692_v32  ;;  %v1926_v31 = vpack.c.b16 %v1917_v13, %v1917_v13  ;;  %2203 = vrot.lane.b32.xlu2 %v5624_v62, %s4211_s17  ;;  %v2445_v52 = vor.u32 %v2444_v30, %v5557_v40  ;;  %v5631_v18 = vor.u32 %v2451_v1, %v2448_v5 }
 0x21d   : > { %v2071_v59 = vunpack.c.l.b16 %v1673_v2  ;;  %v6237_v50 = vsel %vm6220_vm3, %v5101_v4, 0  ;;  %vm6238_vm9 = vcmask 261120   ;;  %v6239_v61 = vpack.c.b16 %v5160_v14, %v5128_v10 }
 0x21e   : > { %v5637_v51 = vunpack.c.l.b16 %v6237_v50  ;;  %v2157_v53 = vpack.c.b16 %v2148_v19, %v2147_v34  ;;  %v2340_v24 = vsel %vm6238_vm9, %v4853_v21, %v2101_v58  ;;  %v1943_v40 = vrot.slane %v1926_v31, 5  ;;  %vm6243_vm7 = vmmov %vm6238_vm9 }
 0x21f   : > { %v5644_v32 = vrot.slane %v6239_v61, 5  ;;  %vm6240_vm6 = vcmask 523264   ;;  %v2453_v45 = vsel %vm2438_vm2, %v2445_v52, %v5631_v18  ;;  %v2472_v5 = vrot.slane %v2470_v39, 3  ;;  %vm6244_vm9 = vmmov %vm6233_vm4  ;;  %v5668_v58 = vpop.permute.xlu0 %1870 }
 0x220   : > { %v2365_v30 = vsel %vm6240_vm6, %v2340_v24, %v2162_v41  ;;  %vm6241_vm3 = vcmask 785408   ;;  %2817 = vmatmul.bf16.vlgmr.msrb.gmra.mxu3 %v2453_v45  ;;  %v2080_v34 = vpack.c.b16 %v2071_v59, %v2071_v59  ;;  %v2473_v1 = vshll.u32 %v5059_v56, 16  ;;  %v1676_v24 = vld [vmem:[#allocation2 + $0x54] sm:$0xf] }
 0x221   : > { %v2383_v4 = vsel %vm6241_vm3, %v2365_v30, %v2194_v63  ;;  %v2254_v21 = vsel %vm6233_vm4, %v5059_v56, %v5644_v32  ;;  %v1703_v10 = vsel %vm5087_vm12, %v5194_v3, 0  ;;  %v6242_v14 = vsel %vm5480_vm14, %v5500_v38, 0  ;;  %v2192_v63 = vpop.permute.xlu1 %2191 }
 0x222   : > { %v5661_v41 = vunpack.c.l.b16 %v6242_v14  ;;  %v2337_v13 = vsel %vm6243_vm7, %v4633_v12, %v5549_v43  ;;  %v2478_v39 = vshrl.u32 %v2254_v21, 16  ;;  %v1944_v19 = vsel %vm6244_vm9, %v1941_v33, %v1943_v40  ;;  %2173 = vrot.lane.b32.xlu1 %v2157_v53, %s4210_s7  ;;  %v3671_v12 = vld [vmem:[#allocation2 + $0x50] sm:$0xff]  ;;  %v2011_v30 = vpop.permute.xlu2 %2010 }
 0x223   : > { %v2475_v2 = vrot.slane %v2473_v1, 4  ;;  %v2481_v31 = vshll.u32 %v2254_v21, 16  ;;  %v1265_v56 = vunpack.c.l.b16 %v4659_v29  ;;  %1882 = vrot.lane.b32.xlu0 %v5435_v49, %s4209_s28  ;;  %v2461_v47 = vshrl.u32 %v2383_v4, 16 }
 0x224   : > { %v2096_v38 = vrot.slane %v2080_v34, 5  ;;  %v2480_v52 = vrot.slane %v2478_v39, 3  ;;  %v1266_v59 = vunpack.c.h.b16 %v4659_v29  ;;  %v2464_v43 = vshll.u32 %v2383_v4, 16 }
 0x225   : > { %v2476_v50 = vor.u32 %v2475_v2, %v2472_v5  ;;  %v2483_v33 = vrot.slane %v2481_v31, 4  ;;  %vm1269_vm14 = vcmp.ne.s32.totalorder %v1265_v56, %v4643_v20  ;;  %v1710_v53 = vsel %vm5553_vm13, %v1676_v24, 0  ;;  %vm6247_vm13 = vmmov %vm6233_vm4  ;;  %v3944_v56 = vld [vmem:[#allocation2 + $0x14] sm:$0xf] }
 0x226   : > { %vm1270_vm6 = vcmp.ne.s32.totalorder %v1266_v59, %v4648_v23  ;;  %v1653_v49 = vsel %vm5582_vm0, %v5353_v57, 0  ;;  %v1654_v29 = vsel %vm5611_vm10, %v5324_v55, 0  ;;  %v5690_v20 = vunpack.c.l.b16 %v1710_v53 }
 0x227   : > { %v5684_v61 = vor.u32 %v2483_v33, %v2480_v52  ;;  %vm5686_vm3 = vmpackc.low %vm1270_vm6, %vm1269_vm14  ;;  %v1994_v23 = vunpack.c.l.b16 %v1653_v49  ;;  %v1995_v28 = vunpack.c.l.b16 %v1654_v29  ;;  %v2097_v45 = vsel %vm6247_vm13, %v5598_v22, %v2096_v38  ;;  %v3945_v33 = vld [vmem:[#allocation2 + $0x18] sm:$0xf]  ;;  %v2103_v29 = vpop.permute.xlu0 %2102 }
 0x228   : > { %v1693_v5 = vsel %vm5686_vm3, %v1676_v24, 0  ;;  %v2183_v4 = vshrl.u32 %v3671_v12, 16  ;;  %v2186_v34 = vshll.u32 %v3671_v12, 16  ;;  %v2250_v1 = vpack.c.b16 %v5690_v20, %v5661_v41 }
 0x229   : > { %v2485_v21 = vsel %vm2438_vm2, %v2476_v50, %v5684_v61  ;;  %v2004_v14 = vpack.c.b16 %v1995_v28, %v1994_v23  ;;  %vm6248_vm4 = vcmask 523264   ;;  %vm6249_vm9 = vcmask 785408   ;;  %v1950_v23 = vpop.permute.xlu1 %1949 }
 0x22a   : > { %v2363_v39 = vsel %vm6248_vm4, %v2337_v13, %v5543_v42  ;;  %3608 = vmatmul.msk.bf16.vlgmr.msra.gmra.mxu2 %vm6243_vm7, %v2485_v21  ;;  %v2185_v22 = vrot.slane %v2183_v4, 4  ;;  %v2188_v31 = vrot.slane %v2186_v34, 5  ;;  %vm6250_vm14 = vnez %v6148_v17  ;;  %1961 = vrot.lane.b32.xlu1 %v1944_v19, %s4210_s7  ;;  %v2196_v4 = vpop.permute.xlu2 %2195 }
 0x22b   : > { %v2381_v2 = vsel %vm6249_vm9, %v2363_v39, %v2192_v63  ;;  %v1276_v38 = vsel %vm6250_vm14, %v3944_v56, 0  ;;  %v2463_v52 = vrot.slane %v2461_v47, 3  ;;  %v2466_v59 = vrot.slane %v2464_v43, 4  ;;  %2020 = vrot.lane.b32.xlu2 %v2004_v14, %s4211_s17  ;;  %2114 = vrot.lane.b32.xlu0 %v2097_v45, %s4209_s28 }
 0x22c   : > { %v2454_v12 = vshrl.u32 %v2381_v2, 16  ;;  %v2457_v50 = vshll.u32 %v2381_v2, 16  ;;  %v2149_v42 = vunpack.c.l.b16 %v1693_v5  ;;  %v5709_v13 = vor.u32 %v2188_v31, %v2185_v22  ;;  %v3947_v22 = vld [vmem:[#allocation2 + $0x20] sm:$0xf] }
 0x22d   : > { %vm6251_vm6 = vnez %v6154_v35  ;;  %v1733_v53 = vunpack.c.l.b16 %v1276_v38  ;;  %v2245_v43 = vpack.c.b16 %v5465_v16, %v5248_v36  ;;  %v1704_v19 = vsel %vm5113_vm8, %v5215_v7, 0  ;;  %vm6253_vm8 = vmmov %vm6243_vm7 }
 0x22e   : > { %v1277_v24 = vsel %vm6251_vm6, %v3945_v33, 0  ;;  %v2456_v17 = vrot.slane %v2454_v12, 3  ;;  %v2459_v49 = vrot.slane %v2457_v50, 4  ;;  %v2234_v63 = vunpack.c.l.b16 %v1703_v10  ;;  %v3946_v10 = vld [vmem:[#allocation2 + $0x1c] sm:$0xf]  ;;  %vm6260_vm6 = vmmov %vm6253_vm8 }
 0x22f   : > { %v1734_v47 = vunpack.c.l.b16 %v1277_v24  ;;  %v5722_v45 = vor.u32 %v2466_v59, %v2463_v52  ;;  %v2255_v5 = vrot.slane %v2245_v43, 5  ;;  %v2158_v34 = vpack.c.b16 %v2149_v42, %v2149_v42  ;;  %v6259_v59 = vld [vmem:[#allocation27_spill] sm:$0xff] }
 0x230   : > { %v2460_v28 = vor.u32 %v2459_v49, %v2456_v17  ;;  %vm6252_vm13 = vsmask.f32 3328  ;;  %v1655_v25 = vsel %vm5686_vm3, %v5547_v46, 0  ;;  %v2246_v54 = vpack.c.b16 %v5637_v51, %v5467_v44 }
 0x231   : > { %v1748_v35 = vpack.c.b16 %v1734_v47, %v1733_v53  ;;  %v2190_v36 = vsel %vm6252_vm13, %v5600_v27, %v5709_v13  ;;  %vm6254_vm12 = vcmask 1042432   ;;  %vm6255_vm4 = vnez %v6160_v9 }
 0x232   : > { %v2468_v7 = vsel %vm2438_vm2, %v2460_v28, %v5722_v45  ;;  %v2256_v16 = vsel %vm6254_vm12, %v5644_v32, %v2255_v5  ;;  %v1278_v21 = vsel %vm6255_vm4, %v3946_v10, 0  ;;  %vm6256_vm7 = vcmask 523264   ;;  %2175 = vrot.lane.b32.xlu1 %v2158_v34, %s4210_s7  ;;  %vm6261_vm13 = vmmov %vm6254_vm12  ;;  %v2013_v47 = vpop.permute.xlu2 %2012 }
 0x233   : > { %v2278_v3 = vsel %vm6253_vm8, %v1748_v35, %v5668_v58  ;;  %2866 = vmatmul.bf16.vlgmr.msrb.gmra.mxu1 %v2468_v7  ;;  %v2503_v39 = vshrl.u32 %v2256_v16, 16  ;;  %v2506_v2 = vshll.u32 %v2256_v16, 16  ;;  %vm6257_vm9 = vnez %v6162_v8  ;;  %2205 = vrot.lane.b32.xlu2 %v2190_v36, %s4211_s17  ;;  %v1873_v8 = vpop.permute.xlu0 %1872  ;;  %v2164_v35 = vpop.permute.xlu1 %2163  ;;  %vm6262_vm8 = vmmov %vm6256_vm7 }
 0x234   : > { %v2303_v14 = vsel %vm6256_vm7, %v2278_v3, %v1950_v23  ;;  %v1279_v44 = vsel %vm6257_vm9, %v3947_v22, 0  ;;  %v2235_v51 = vunpack.c.l.b16 %v1704_v19  ;;  %vm6258_vm14 = vcmask 785408   ;;  %vm6263_vm12 = vmmov %vm6260_vm6 }
 0x235   : > { %v2322_v58 = vsel %vm6258_vm14, %v2303_v14, %v2011_v30  ;;  %v1996_v31 = vunpack.c.l.b16 %v1655_v25  ;;  %v2257_v32 = vrot.slane %v2246_v54, 5  ;;  %v2505_v38 = vrot.slane %v2503_v39, 3  ;;  %vm6264_vm4 = vmmov %vm6258_vm14 }
 0x236   : > { %v2486_v9 = vshrl.u32 %v2322_v58, 16  ;;  %v2489_v56 = vshll.u32 %v2322_v58, 16  ;;  %v2508_v52 = vrot.slane %v2506_v2, 4  ;;  %v2343_v12 = vsel %vm6260_vm6, %v6259_v59, %v2103_v29  ;;  %vm6265_vm7 = vmmov %vm6261_vm13 }
 0x237   : > { %v1735_v50 = vunpack.c.l.b16 %v1278_v21  ;;  %v1736_v42 = vunpack.c.l.b16 %v1279_v44  ;;  %v2258_v33 = vsel %vm6261_vm13, %v2255_v5, %v2257_v32  ;;  %v2005_v49 = vpack.c.b16 %v1996_v31, %v1996_v31  ;;  %vm6266_vm9 = vmmov %vm6260_vm6 }
 0x238   : > { %v2488_v24 = vrot.slane %v2486_v9, 3  ;;  %v2491_v53 = vrot.slane %v2489_v56, 4  ;;  %v2509_v17 = vor.u32 %v2508_v52, %v2505_v38  ;;  %v2528_v30 = vshrl.u32 %v2258_v33, 16  ;;  %v6267_v9 = vld [vmem:[#allocation31_spill] sm:$0xff]  ;;  %vm6271_vm13 = vmmov %vm6262_vm8 }
 0x239   : > { %v2531_v43 = vshll.u32 %v2258_v33, 16  ;;  %v2247_v19 = vpack.c.b16 %v2235_v51, %v2234_v63  ;;  %v2367_v29 = vsel %vm6262_vm8, %v2343_v12, %v2164_v35  ;;  %v1749_v3 = vpack.c.b16 %v1736_v42, %v1735_v50  ;;  %vm6272_vm8 = vmmov %vm6264_vm4 }
 0x23a   : > { %v2510_v23 = vsel %vm2438_vm2, %v5684_v61, %v2509_v17  ;;  %v2492_v28 = vor.u32 %v2491_v53, %v2488_v24  ;;  %v2530_v34 = vrot.slane %v2528_v30, 3  ;;  %v2385_v5 = vsel %vm6264_vm4, %v2367_v29, %v2196_v4  ;;  %v2198_v12 = vpop.permute.xlu2 %2197  ;;  %v3948_v53 = vld [vmem:[#allocation2 + $0x24] sm:$0xf]  ;;  %v3949_v30 = vld [vmem:[#allocation2 + $0x28] sm:$0xf] }
 0x23b   : > { %v2533_v36 = vrot.slane %v2531_v43, 4  ;;  %v2259_v25 = vrot.slane %v2247_v19, 5  ;;  %3609 = vmatmul.msk.bf16.gmra.mxu2 %vm6263_vm12, %v2510_v23  ;;  %2022 = vrot.lane.b32.xlu2 %v2005_v49, %s4211_s17  ;;  %v2494_v63 = vshrl.u32 %v2385_v5, 16  ;;  %v2497_v7 = vshll.u32 %v2385_v5, 16  ;;  %v2105_v22 = vpop.permute.xlu0 %2104  ;;  %v1952_v58 = vpop.permute.xlu1 %1951  ;;  %v6275_v49 = vld [vmem:[#allocation32_spill] sm:$0xff] }
 0x23c   : > { %v2493_v54 = vsel %vm2438_vm2, %v5631_v18, %v2492_v28  ;;  %v2281_v4 = vsel %vm6266_vm9, %v1749_v3, %v1873_v8  ;;  %vm6268_vm14 = vnez %v6267_v9  ;;  %vm6276_vm4 = vnez %v6275_v49  ;;  %v6277_v19 = vld [vmem:[#allocation28_spill] sm:$0xff] }
 0x23d   : > { %2822 = vmatmul.bf16.gmra.mxu3 %v2493_v54  ;;  %v2534_v61 = vor.u32 %v2533_v36, %v2530_v34  ;;  %v2260_v16 = vsel %vm6265_vm7, %v2257_v32, %v2259_v25  ;;  %v2496_v14 = vrot.slane %v2494_v63, 3  ;;  %v2499_v39 = vrot.slane %v2497_v7, 4  ;;  %v6269_v32 = vld [vmem:[#allocation33_spill] sm:$0xff]  ;;  %vm6278_vm7 = vmmov %vm6266_vm9 }
 0x23e   : > { %v2553_v10 = vshrl.u32 %v2260_v16, 16  ;;  %v2556_v21 = vshll.u32 %v2260_v16, 16  ;;  %v1705_v56 = vsel %vm6268_vm14, %v5289_v37, 0  ;;  %vm6270_vm6 = vnez %v6269_v32  ;;  %vm6279_vm9 = vmmov %vm6271_vm13 }
 0x23f   : > { %v2535_v2 = vsel %vm2438_vm2, %v2509_v17, %v2534_v61  ;;  %v2500_v51 = vor.u32 %v2499_v39, %v2496_v14  ;;  %v1706_v38 = vsel %vm6270_vm6, %v5353_v57, 0  ;;  %v2305_v52 = vsel %vm6271_vm13, %v2281_v4, %v1952_v58  ;;  %v6273_v57 = vld [vmem:[#allocation29_spill] sm:$0xff]  ;;  %vm6280_vm14 = vmmov %vm6278_vm7 }
 0x240   : > { %v2555_v44 = vrot.slane %v2553_v10, 3  ;;  %v2558_v18 = vrot.slane %v2556_v21, 4  ;;  %v2324_v50 = vsel %vm6272_vm8, %v2305_v52, %v2013_v47  ;;  %v2236_v33 = vunpack.c.l.b16 %v1705_v56  ;;  %vm6281_vm6 = vmmov %vm6272_vm8 }
 0x241   : > { %v2501_v59 = vsel %vm2438_vm2, %v5722_v45, %v2500_v51  ;;  %v2511_v8 = vshrl.u32 %v2324_v50, 16  ;;  %v2514_v37 = vshll.u32 %v2324_v50, 16  ;;  %v2237_v24 = vunpack.c.l.b16 %v1706_v38  ;;  %vm6283_vm8 = vmmov %vm6278_vm7 }
 0x242   : > { %v2559_v31 = vor.u32 %v2558_v18, %v2555_v44  ;;  %vm6274_vm12 = vnez %v6273_v57  ;;  %v1281_v45 = vsel %vm6276_vm4, %v3949_v30, 0  ;;  %v2346_v23 = vsel %vm6278_vm7, %v6277_v19, %v2105_v22  ;;  %v2015_v21 = vpop.permute.xlu2 %2014  ;;  %vm6285_vm4 = vmmov %vm6281_vm6 }
 0x243   : > { %2871 = vmatmul.bf16.gmra.mxu1 %v2501_v59  ;;  %2207 = vrot.lane.b32.xlu2 %v5709_v13, %s4211_s17  ;;  %v1280_v17 = vsel %vm6274_vm12, %v3948_v53, 0  ;;  %v2513_v43 = vrot.slane %v2511_v8, 3  ;;  %v2516_v47 = vrot.slane %v2514_v37, 4  ;;  %v1738_v13 = vunpack.c.l.b16 %v1281_v45  ;;  %v1875_v29 = vpop.permute.xlu0 %1874  ;;  %v2166_v36 = vpop.permute.xlu1 %2165  ;;  %vm6284_vm12 = vmmov %vm6279_vm9 }
 0x244   : > { %v2560_v42 = vsel %vm2438_vm2, %v2534_v61, %v2559_v31  ;;  %v1737_v34 = vunpack.c.l.b16 %v1280_v17  ;;  %v2248_v5 = vpack.c.b16 %v2237_v24, %v2236_v33  ;;  %v2369_v54 = vsel %vm6279_vm9, %v2346_v23, %v2166_v36  ;;  %v3950_v17 = vld [vmem:[#allocation2 + $0x2c] sm:$0xf]  ;;  %v6291_v23 = vld [vmem:[#allocation30_spill] sm:$0xff]  ;;  %vm6292_vm9 = vmmov %vm6283_vm8 }
 0x245   : > { %v2517_v35 = vor.u32 %v2516_v47, %v2513_v43  ;;  %v2387_v63 = vsel %vm6281_vm6, %v2369_v54, %v2198_v12  ;;  %vm6282_vm13 = vcmask 1042432   ;;  %v6287_v50 = vsel %vm5293_vm11, %v5324_v55, 0  ;;  %vm6290_vm11 = vmmov %vm6283_vm8 }
 0x246   : > { %v2261_v7 = vrot.slane %v2248_v5, 5  ;;  %v2519_v61 = vshrl.u32 %v2387_v63, 16  ;;  %v2522_v16 = vshll.u32 %v2387_v63, 16  ;;  %v1750_v10 = vpack.c.b16 %v1738_v13, %v1737_v34  ;;  %vm6296_vm6 = vmmov %vm6283_vm8 }
 0x247   : > { %v2518_v3 = vsel %vm2438_vm2, %v2492_v28, %v2517_v35  ;;  %v2238_v8 = vunpack.c.l.b16 %v6287_v50  ;;  %v1282_v49 = vsel %vm5301_vm5, %v3950_v17, 0  ;;  %vm6289_vm7 = vnez %v6203_v6  ;;  %vm6293_vm5 = vmmov %vm6282_vm13 }
 0x248   : > { %v2262_v14 = vsel %vm6282_vm13, %v2259_v25, %v2261_v7  ;;  %v2521_v39 = vrot.slane %v2519_v61, 3  ;;  %v2524_v4 = vrot.slane %v2522_v16, 4  ;;  %v2284_v18 = vsel %vm6283_vm8, %v1750_v10, %v1875_v29  ;;  %vm6298_vm8 = vmmov %vm6285_vm4 }
 0x249   : > { %v2578_v22 = vshrl.u32 %v2262_v14, 16  ;;  %v2581_v44 = vshll.u32 %v2262_v14, 16  ;;  %v1739_v19 = vunpack.c.l.b16 %v1282_v49 }
 0x24a   : > { %v2525_v58 = vor.u32 %v2524_v4, %v2521_v39  ;;  %v2200_v24 = vpop.permute.xlu2 %2199 }
 0x24b   : > { %3610 = vmatmul.msk.bf16.gmra.mxu2 %vm6280_vm14, %v2535_v2  ;;  %v2580_v28 = vrot.slane %v2578_v22, 3  ;;  %v2583_v9 = vrot.slane %v2581_v44, 4  ;;  %v1954_v2 = vpop.permute.xlu1 %1953  ;;  %v2107_v32 = vpop.permute.xlu0 %2106  ;;  %vm6295_vm14 = vmmov %vm6285_vm4 }
 0x24c   : > { %v2526_v56 = vsel %vm2438_vm2, %v2500_v51, %v2525_v58  ;;  %v2307_v52 = vsel %vm6284_vm12, %v2284_v18, %v1954_v2  ;;  %v1708_v51 = vsel %vm5363_vm1, %v5547_v46, 0  ;;  %v2349_v48 = vsel %vm6292_vm9, %v6291_v23, %v2107_v32  ;;  %vm6294_vm1 = vmmov %vm6284_vm12 }
 0x24d   : > { %2827 = vmatmul.bf16.gmra.mxu3 %v2518_v3  ;;  %v2584_v38 = vor.u32 %v2583_v9, %v2580_v28  ;;  %v2326_v59 = vsel %vm6285_vm4, %v2307_v52, %v2015_v21  ;;  %v2239_v45 = vunpack.c.l.b16 %v1708_v51  ;;  %vm6297_vm13 = vmmov %vm6294_vm1  ;;  %vm6299_vm12 = vnez %v6209_v26 }
 0x24e   : > { %v2536_v37 = vshrl.u32 %v2326_v59, 16  ;;  %v2539_v33 = vshll.u32 %v2326_v59, 16  ;;  %v2265_v59 = vrot.slane %v2250_v1, 5  ;;  %vm6300_vm4 = vnez %v6213_v11  ;;  %vm6304_vm9 = vmmov %vm6293_vm5 }
 0x24f   : > { %v2585_v25 = vsel %vm2438_vm2, %v2559_v31, %v2584_v38  ;;  %v3951_v31 = vld [vmem:[#allocation2 + $0x30] sm:$0xf]  ;;  %v2249_v47 = vpack.c.b16 %v2239_v45, %v2238_v8 }
 0x250   : > { %v2538_v53 = vrot.slane %v2536_v37, 3  ;;  %v2541_v57 = vrot.slane %v2539_v33, 4  ;;  %v1283_v43 = vsel %vm6289_vm7, %v3951_v31, 0  ;;  %v3952_v37 = vld [vmem:[#allocation2 + $0x34] sm:$0xf]  ;;  %vm6301_vm7 = vmmov %vm6296_vm6 }
 0x251   : > { %v1740_v34 = vunpack.c.l.b16 %v1283_v43  ;;  %v2263_v13 = vrot.slane %v2249_v47, 5  ;;  %v3953_v33 = vld [vmem:[#allocation2 + $0x38] sm:$0xf] }
 0x252   : > { %v2542_v55 = vor.u32 %v2541_v57, %v2538_v53  ;;  %v6302_v53 = vld [vmem:[#allocation36_spill] sm:$0xff] }
 0x253   : > { %2876 = vmatmul.bf16.gmra.mxu1 %v2526_v56  ;;  %v1877_v29 = vpop.permute.xlu0 %1876  ;;  %v2264_v5 = vsel %vm6293_vm5, %v2261_v7, %v2263_v13  ;;  %v1751_v61 = vpack.c.b16 %v1740_v34, %v1739_v19  ;;  %v2017_v10 = vpop.permute.xlu2 %2016  ;;  %v2266_v1 = vsel %vm6304_vm9, %v2263_v13, %v2265_v59  ;;  %vm6305_vm5 = vmmov %vm6294_vm1 }
 0x254   : > { %v2543_v46 = vsel %vm2438_vm2, %v2517_v35, %v2542_v55  ;;  %v2603_v54 = vshrl.u32 %v2264_v5, 16  ;;  %v2606_v3 = vshll.u32 %v2264_v5, 16  ;;  %v2628_v30 = vshrl.u32 %v2266_v1, 16 }
 0x255   : > { %v2168_v36 = vpop.permute.xlu1 %2167  ;;  %v2287_v22 = vsel %vm6296_vm6, %v1751_v61, %v1877_v29  ;;  %v2631_v49 = vshll.u32 %v2266_v1, 16 }
 0x256   : > { %v2371_v6 = vsel %vm6294_vm1, %v2349_v48, %v2168_v36  ;;  %v2605_v21 = vrot.slane %v2603_v54, 3  ;;  %v2608_v14 = vrot.slane %v2606_v3, 4  ;;  %v2630_v31 = vrot.slane %v2628_v30, 3  ;;  %vm6306_vm1 = vmmov %vm6298_vm8 }
 0x257   : > { %v2389_v63 = vsel %vm6295_vm14, %v2371_v6, %v2200_v24  ;;  %v1694_v24 = vld [vmem:[#allocation2 + $0x58] sm:$0x1]  ;;  %v2633_v43 = vrot.slane %v2631_v49, 4  ;;  %vm6308_vm14 = vmmov %vm6305_vm5 }
 0x258   : > { %v2547_v16 = vshll.u32 %v2389_v63, 16  ;;  %v2609_v4 = vor.u32 %v2608_v14, %v2605_v21  ;;  %v1711_v17 = vsel %vm5594_vm15, %v1694_v24, 0  ;;  %vm6307_vm15 = vmmov %vm6296_vm6 }
 0x259   : > { %v2242_v47 = vunpack.c.l.b16 %v1711_v17  ;;  %v2634_v34 = vor.u32 %v2633_v43, %v2630_v31 }
 0x25a   : > { %v2549_v39 = vrot.slane %v2547_v16, 4  ;;  %v2610_v7 = vsel %vm2438_vm2, %v2584_v38, %v2609_v4  ;;  %v1284_v38 = vsel %vm6299_vm12, %v3952_v37, 0  ;;  %vm6313_vm12 = vmmov %vm6304_vm9  ;;  %v3954_v37 = vld [vmem:[#allocation2 + $0x3c] sm:$0xf] }
 0x25b   : > { %3611 = vmatmul.msk.bf16.gmra.mxu2 %vm6290_vm11, %v2560_v42  ;;  %v2544_v42 = vshrl.u32 %v2389_v63, 16  ;;  %vm6303_vm11 = vmmov %vm6296_vm6  ;;  %v1741_v41 = vunpack.c.l.b16 %v1284_v38  ;;  %v2251_v36 = vpack.c.b16 %v2242_v47, %v2242_v47  ;;  %v3955_v38 = vld [vmem:[#allocation2 + $0x40] sm:$0xf]  ;;  %v3956_v47 = vld [vmem:[#allocation2 + $0x44] sm:$0xf] }
 0x25c   : > { %vm6309_vm6 = vmmov %vm6306_vm1 }
 0x25d   : > { %2832 = vmatmul.bf16.gmra.mxu3 %v2543_v46  ;;  %v2546_v35 = vrot.slane %v2544_v42, 3  ;;  %v1956_v18 = vpop.permute.xlu1 %1955  ;;  %v2109_v2 = vpop.permute.xlu0 %2108  ;;  %v2267_v61 = vrot.slane %v2251_v36, 5  ;;  %vm6319_vm9 = vmmov %vm6306_vm1 }
 0x25e   : > { %v2309_v28 = vsel %vm6297_vm13, %v2287_v22, %v1956_v18  ;;  %v2202_v8 = vpop.permute.xlu2 %2201  ;;  %v2352_v57 = vsel %vm6303_vm11, %v6302_v53, %v2109_v2  ;;  %vm6310_vm13 = vmmov %vm6301_vm7 }
 0x25f   : > { %v2550_v44 = vor.u32 %v2549_v39, %v2546_v35  ;;  %v2328_v56 = vsel %vm6298_vm8, %v2309_v28, %v2017_v10  ;;  %v6311_v39 = vld [vmem:[#allocation37_spill] sm:$0xff]  ;;  %vm6312_vm8 = vmmov %vm6301_vm7  ;;  %v2268_v22 = vsel %vm6313_vm12, %v2265_v59, %v2267_v61  ;;  %v1286_v59 = vsel %vm5582_vm0, %v3954_v37, 0 }
 0x260   : > { %v2561_v32 = vshrl.u32 %v2328_v56, 16  ;;  %v2564_v52 = vshll.u32 %v2328_v56, 16  ;;  %vm6316_vm11 = vmmov %vm6312_vm8 }
 0x261   : > { %v2551_v9 = vsel %vm2438_vm2, %v2525_v58, %v2550_v44  ;;  %v1285_v58 = vsel %vm6300_vm4, %v3953_v33, 0  ;;  %vm6314_vm4 = vmmov %vm6305_vm5  ;;  %v1287_v33 = vsel %vm5611_vm10, %v3955_v38, 0 }
 0x262   : > { %v2563_v12 = vrot.slane %v2561_v32, 3  ;;  %v2566_v50 = vrot.slane %v2564_v52, 4  ;;  %v1742_v20 = vunpack.c.l.b16 %v1285_v58  ;;  %vm6317_vm0 = vmmov %vm6312_vm8 }
 0x263   : > { %2881 = vmatmul.bf16.gmra.mxu1 %v2551_v9  ;;  %v2653_v9 = vshrl.u32 %v2268_v22, 16  ;;  %vm6318_vm10 = vmmov %vm6314_vm4 }
 0x264   : > { %v2567_v51 = vor.u32 %v2566_v50, %v2563_v12  ;;  %v1752_v23 = vpack.c.b16 %v1742_v20, %v1741_v41 }
 0x265   : > { %v2655_v52 = vrot.slane %v2653_v9, 3 }
 0x266   : > { %v2568_v26 = vsel %vm2438_vm2, %v2542_v55, %v2567_v51  ;;  %v2019_v29 = vpop.permute.xlu2 %2018  ;;  %v2635_v55 = vsel %vm2438_vm2, %v2609_v4, %v2634_v34 }
 0x269   : > { %v2170_v11 = vpop.permute.xlu1 %2169 }
 0x26a   : > { %v2373_v45 = vsel %vm6305_vm5, %v2352_v57, %v2170_v11  ;;  %v1743_v57 = vunpack.c.l.b16 %v1286_v59  ;;  %vm6320_vm5 = vmmov %vm6317_vm0 }
 0x26b   : > { %3612 = vmatmul.msk.bf16.gmra.mxu2 %vm6301_vm7, %v2585_v25  ;;  %v1879_v25 = vpop.permute.xlu0 %1878  ;;  %v2391_v19 = vsel %vm6306_vm1, %v2373_v45, %v2202_v8  ;;  %vm6315_vm7 = vmmov %vm6306_vm1 }
 0x26c   : > { %v2569_v48 = vshrl.u32 %v2391_v19, 16  ;;  %v2572_v46 = vshll.u32 %v2391_v19, 16  ;;  %v2290_v5 = vsel %vm6307_vm15, %v1752_v23, %v1879_v25  ;;  %v1288_v19 = vsel %vm5686_vm3, %v3956_v47, 0  ;;  %vm6321_vm1 = vmmov %vm6314_vm4 }
 0x26d   : > { %2837 = vmatmul.bf16.gmra.mxu3 %v2568_v26  ;;  %vm6322_vm15 = vmmov %vm6309_vm6 }
 0x26e   : > { %v2571_v15 = vrot.slane %v2569_v48, 3  ;;  %v2574_v13 = vrot.slane %v2572_v46, 4  ;;  %vm6323_vm3 = vmmov %vm6317_vm0 }
 0x26f   : > { %vm6329_vm12 = vmmov %vm6321_vm1 }
 0x270   : > { %v2575_v6 = vor.u32 %v2574_v13, %v2571_v15 }
 0x272   : > { %v2576_v63 = vsel %vm2438_vm2, %v2550_v44, %v2575_v6  ;;  %v2656_v44 = vshll.u32 %v2268_v22, 16 }
 0x273   : > { %v1958_v54 = vpop.permute.xlu1 %1957  ;;  %2886 = vmatmul.bf16.gmra.mxu1 %v2576_v63 }
 0x274   : > { %v2311_v3 = vsel %vm6308_vm14, %v2290_v5, %v1958_v54  ;;  %v2111_v21 = vpop.permute.xlu0 %2110  ;;  %vm6324_vm14 = vmmov %vm6317_vm0 }
 0x275   : > { %v2330_v42 = vsel %vm6309_vm6, %v2311_v3, %v2019_v29  ;;  %v2355_v4 = vsel %vm6312_vm8, %v6311_v39, %v2111_v21  ;;  %vm6326_vm6 = vmmov %vm6321_vm1 }
 0x276   : > { %v2586_v16 = vshrl.u32 %v2330_v42, 16  ;;  %v2589_v10 = vshll.u32 %v2330_v42, 16  ;;  %v2204_v18 = vpop.permute.xlu2 %2203  ;;  %vm6328_vm8 = vmmov %vm6317_vm0 }
 0x278   : > { %v2588_v14 = vrot.slane %v2586_v16, 3  ;;  %v2591_v35 = vrot.slane %v2589_v10, 4  ;;  %v3691_v16 = vld [vmem:[%s6325_s23 + $0x8] sm:$0xff] }
 0x279   : > { %3062 = vmatpush.bf16.msrb.mxu0 %v3691_v16 }
 0x27a   : > { %v2592_v28 = vor.u32 %v2591_v35, %v2588_v14  ;;  %v3690_v35 = vld [vmem:[%s6325_s23] sm:$0xff] }
 0x27b   : > { %3613 = vmatmul.msk.bf16.gmra.mxu2 %vm6310_vm13, %v2610_v7  ;;  %v2172_v2 = vpop.permute.xlu1 %2171  ;;  %v2658_v7 = vrot.slane %v2656_v44, 4  ;;  %vm6327_vm13 = vmmov %vm6315_vm7 }
 0x27c   : > { %v2375_v56 = vsel %vm6314_vm4, %v2355_v4, %v2172_v2  ;;  %v2593_v32 = vsel %vm2438_vm2, %v2567_v51, %v2592_v28  ;;  %v1744_v51 = vunpack.c.l.b16 %v1287_v33  ;;  %v1881_v41 = vpop.permute.xlu0 %1880  ;;  %vm6330_vm4 = vmmov %vm6315_vm7  ;;  %v5876_v33 = vld [vmem:[%s6331_s18] ss:$0 sm:$0xff] }
 0x27d   : > { %v2393_v12 = vsel %vm6315_vm7, %v2375_v56, %v2204_v18  ;;  %2842 = vmatmul.bf16.gmra.mxu3 %v2593_v32  ;;  %v2659_v58 = vor.u32 %v2658_v7, %v2655_v52  ;;  %3063 = vmatpush.bf16.msrb.mxu0 %v3690_v35 }
 0x27e   : > { %v2594_v50 = vshrl.u32 %v2393_v12, 16  ;;  %v2597_v8 = vshll.u32 %v2393_v12, 16  ;;  %v1753_v30 = vpack.c.b16 %v1744_v51, %v1743_v57 }
 0x27f   : > { %v2660_v20 = vsel %vm2438_vm2, %v2634_v34, %v2659_v58  ;;  %v1745_v34 = vunpack.c.l.b16 %v1288_v19 }
 0x280   : > { %v2596_v24 = vrot.slane %v2594_v50, 3  ;;  %v2599_v53 = vrot.slane %v2597_v8, 4  ;;  %v2293_v0 = vsel %vm6317_vm0, %v1753_v30, %v1881_v41 }
 0x282   : > { %v2600_v1 = vor.u32 %v2599_v53, %v2596_v24 }
 0x284   : > { %v2601_v26 = vsel %vm2438_vm2, %v2575_v6, %v2600_v1  ;;  %v1754_v6 = vpack.c.b16 %v1745_v34, %v1745_v34 }
 0x285   : > { %v2021_v17 = vpop.permute.xlu2 %2020  ;;  %2891 = vmatmul.bf16.gmra.mxu1 %v2601_v26 }
 0x28b   : > { %3614 = vmatmul.msk.bf16.gmra.mxu2 %vm6316_vm11, %v2635_v55 }
 0x28c   : > { %v1960_v60 = vpop.permute.xlu1 %1959 }
 0x28d   : > { %v2113_v49 = vpop.permute.xlu0 %2112  ;;  %v2313_v11 = vsel %vm6318_vm10, %v2293_v0, %v1960_v60  ;;  %v2206_v43 = vpop.permute.xlu2 %2205 }
 0x28e   : > { %v2332_v45 = vsel %vm6319_vm9, %v2313_v11, %v2021_v17  ;;  %v2358_v46 = vsel %vm6320_vm5, %v5624_v62, %v2113_v49 }
 0x28f   : > { %v2611_v25 = vshrl.u32 %v2332_v45, 16  ;;  %v2614_v31 = vshll.u32 %v2332_v45, 16 }
 0x291   : > { %v2613_v23 = vrot.slane %v2611_v25, 3  ;;  %v2616_v48 = vrot.slane %v2614_v31, 4 }
 0x293   : > { %v2617_v15 = vor.u32 %v2616_v48, %v2613_v23 }
 0x294   : > { %v2174_v13 = vpop.permute.xlu1 %2173 }
 0x295   : > { %v2377_v29 = vsel %vm6321_vm1, %v2358_v46, %v2174_v13  ;;  %v2618_v55 = vsel %vm2438_vm2, %v2592_v28, %v2617_v15  ;;  %v1883_v36 = vpop.permute.xlu0 %1882  ;;  %v2023_v61 = vpop.permute.xlu2 %2022 }
 0x296   : > { %v2395_v5 = vsel %vm6322_vm15, %v2377_v29, %v2206_v43  ;;  %2847 = vmatmul.bf16.gmra.mxu3 %v2618_v55  ;;  %v2296_v62 = vsel %vm6324_vm14, %v1754_v6, %v1883_v36 }
 0x297   : > { %v2619_v54 = vshrl.u32 %v2395_v5, 16  ;;  %v2622_v40 = vshll.u32 %v2395_v5, 16 }
 0x299   : > { %v2621_v3 = vrot.slane %v2619_v54, 3  ;;  %v2624_v63 = vrot.slane %v2622_v40, 4 }
 0x29b   : > { %3615 = vmatmul.msk.bf16.gmra.mxu2 %vm6323_vm3, %v2660_v20  ;;  %v2625_v42 = vor.u32 %v2624_v63, %v2621_v3 }
 0x29c   : > { %v1962_v10 = vpop.permute.xlu1 %1961 }
 0x29d   : > { %v2315_v21 = vsel %vm6326_vm6, %v2296_v62, %v1962_v10  ;;  %v2626_v14 = vsel %vm2438_vm2, %v2600_v1, %v2625_v42  ;;  %v2115_v18 = vpop.permute.xlu0 %2114  ;;  %v2208_v2 = vpop.permute.xlu2 %2207 }
 0x29e   : > { %v2334_v39 = vsel %vm6327_vm13, %v2315_v21, %v2023_v61  ;;  %2896 = vmatmul.bf16.gmra.mxu1 %v2626_v14  ;;  %v2361_v44 = vsel %vm6328_vm8, %v5600_v27, %v2115_v18 }
 0x29f   : > { %v2636_v4 = vshrl.u32 %v2334_v39, 16  ;;  %v2639_v22 = vshll.u32 %v2334_v39, 16 }
 0x2a1   : > { %v2638_v28 = vrot.slane %v2636_v4, 3  ;;  %v2641_v9 = vrot.slane %v2639_v22, 4 }
 0x2a3   : > { %v2642_v56 = vor.u32 %v2641_v9, %v2638_v28  ;;  %v2818_v37 = vpop.f32.mrf.mxu3 }
 0x2a4   : > { %v2176_v32 = vpop.permute.xlu1 %2175  ;;  %v2819_v57 = vadd.f32 %v5876_v33, %v2818_v37 }
 0x2a5   : > { %v2379_v52 = vsel %vm6329_vm12, %v2361_v44, %v2176_v32  ;;  %v2643_v12 = vsel %vm2438_vm2, %v2617_v15, %v2642_v56 }
 0x2a6   : > { %v2397_v7 = vsel %vm6330_vm4, %v2379_v52, %v2208_v2  ;;  %2852 = vmatmul.bf16.gmra.mxu3 %v2643_v12 }
 0x2a7   : > { %v2644_v50 = vshrl.u32 %v2397_v7, 16  ;;  %v2647_v8 = vshll.u32 %v2397_v7, 16 }
 0x2a9   : > { %v2646_v59 = vrot.slane %v2644_v50, 3  ;;  %v2649_v38 = vrot.slane %v2647_v8, 4 }
 0x2ab   : > { %v2650_v27 = vor.u32 %v2649_v38, %v2646_v59  ;;  %v2820_v41 = vpop.f32.mrf.mxu3 }
 0x2ac   : > { %v2821_v1 = vadd.f32 %v5876_v33, %v2820_v41 }
 0x2ad   : > { %v2916_v58 = vpop.f32.mrf.mxu2  ;;  %v2651_v24 = vsel %vm2438_vm2, %v2625_v42, %v2650_v27  ;;  %vm6332_vm2 = vmmov %vm6317_vm0 }
 0x2ae   : > { %2901 = vmatmul.bf16.gmra.mxu1 %v2651_v24  ;;  %vm6333_vm9 = vmmov %vm6332_vm2 }
 0x2af   : > { %vm6334_vm15 = vmmov %vm6332_vm2 }
 0x2b0   : > { %v2867_v53 = vpop.f32.mrf.mxu1  ;;  %vm6335_vm6 = vmmov %vm6332_vm2 }
 0x2b1   : > { %v2868_v51 = vadd.f32 %v2867_v53, %v2819_v57  ;;  %vm6336_vm12 = vmmov %vm6332_vm2 }
 0x2b3   : > { %v2917_v17 = vadd.f32 %v2916_v58, %v2868_v51 }
 0x2b5   : > { %v2918_v20 = vpop.f32.mrf.mxu2  ;;  %v2972_v0 = vmul.f32 0.01, %v2917_v17  ;;  %vm2956_vm7 = vcmp.ge.f32.partialorder %v2917_v17, 0.0 }
 0x2b7   : > { %v2988_v25 = vsel %vm2956_vm7, %v2917_v17, %v2972_v0 }
 0x2b8   : > { %v2869_v26 = vpop.f32.mrf.mxu1 }
 0x2b9   : > { %v2870_v30 = vadd.f32 %v2869_v26, %v2821_v1 }
 0x2bb   : > { %v2919_v60 = vadd.f32 %v2918_v20, %v2870_v30 }
 0x2bd   : > { %vm2957_vm11 = vcmp.ge.f32.partialorder %v2919_v60, 0.0  ;;  %v2973_v49 = vmul.f32 0.01, %v2919_v60 }
 0x2be   : > { %v2921_v11 = vpop.f32.mrf.mxu2 }
 0x2bf   : > { %v2989_v31 = vsel %vm2957_vm11, %v2919_v60, %v2973_v49  ;;  %vm6337_vm11 = vmmov %vm6332_vm2 }
 0x2c0   : > { %v2823_v45 = vpop.f32.mrf.mxu3  ;;  %v2872_v47 = vpop.f32.mrf.mxu1  ;;  %v3004_v19 = vpack.c.bf16 %v2989_v31, %v2988_v25 }
 0x2c1   : > { %v2824_v43 = vadd.f32 %v5876_v33, %v2823_v45 }
 0x2c2   : > { %3624 = vmatmul.msk.bf16.vlgmr.msrb.gmra.mxu0 %vm6332_vm2, %v3004_v19 }
 0x2c3   : > { %v2873_v23 = vadd.f32 %v2872_v47, %v2824_v43 }
 0x2c5   : > { %v2922_v34 = vadd.f32 %v2921_v11, %v2873_v23 }
 0x2c6   : > { %v2923_v48 = vpop.f32.mrf.mxu2 }
 0x2c7   : > { %v2974_v55 = vmul.f32 0.01, %v2922_v34  ;;  %vm2958_vm0 = vcmp.ge.f32.partialorder %v2922_v34, 0.0 }
 0x2c8   : > { %v2825_v46 = vpop.f32.mrf.mxu3  ;;  %v2874_v13 = vpop.f32.mrf.mxu1 }
 0x2c9   : > { %v2826_v15 = vadd.f32 %v5876_v33, %v2825_v46  ;;  %v2990_v63 = vsel %vm2958_vm0, %v2922_v34, %v2974_v55 }
 0x2cb   : > { %v2875_v29 = vadd.f32 %v2874_v13, %v2826_v15 }
 0x2cd   : > { %v2924_v36 = vadd.f32 %v2923_v48, %v2875_v29 }
 0x2ce   : > { %v2926_v6 = vpop.f32.mrf.mxu2 }
 0x2cf   : > { %vm2959_vm10 = vcmp.ge.f32.partialorder %v2924_v36, 0.0  ;;  %v2975_v5 = vmul.f32 0.01, %v2924_v36 }
 0x2d0   : > { %v2828_v54 = vpop.f32.mrf.mxu3  ;;  %v2877_v3 = vpop.f32.mrf.mxu1 }
 0x2d1   : > { %v2829_v40 = vadd.f32 %v5876_v33, %v2828_v54  ;;  %v2991_v61 = vsel %vm2959_vm10, %v2924_v36, %v2975_v5  ;;  %vm6338_vm10 = vmmov %vm6335_vm6 }
 0x2d2   : > { %v3005_v62 = vpack.c.bf16 %v2991_v61, %v2990_v63 }
 0x2d3   : > { %v2878_v42 = vadd.f32 %v2877_v3, %v2829_v40 }
 0x2d4   : > { %3625 = vmatmul.msk.bf16.gmra.mxu0 %vm6333_vm9, %v3005_v62 }
 0x2d5   : > { %v2927_v21 = vadd.f32 %v2926_v6, %v2878_v42 }
 0x2d6   : > { %v2928_v16 = vpop.f32.mrf.mxu2 }
 0x2d7   : > { %v2976_v4 = vmul.f32 0.01, %v2927_v21  ;;  %vm2960_vm5 = vcmp.ge.f32.partialorder %v2927_v21, 0.0 }
 0x2d8   : > { %v2830_v10 = vpop.f32.mrf.mxu3  ;;  %v2879_v35 = vpop.f32.mrf.mxu1 }
 0x2d9   : > { %v2831_v14 = vadd.f32 %v5876_v33, %v2830_v10  ;;  %v2992_v44 = vsel %vm2960_vm5, %v2927_v21, %v2976_v4 }
 0x2db   : > { %v2880_v39 = vadd.f32 %v2879_v35, %v2831_v14 }
 0x2dd   : > { %v2929_v22 = vadd.f32 %v2928_v16, %v2880_v39 }
 0x2de   : > { %v2931_v28 = vpop.f32.mrf.mxu2 }
 0x2df   : > { %vm2961_vm1 = vcmp.ge.f32.partialorder %v2929_v22, 0.0  ;;  %v2977_v18 = vmul.f32 0.01, %v2929_v22 }
 0x2e0   : > { %v2833_v9 = vpop.f32.mrf.mxu3  ;;  %v2882_v52 = vpop.f32.mrf.mxu1 }
 0x2e1   : > { %v2993_v2 = vsel %vm2961_vm1, %v2929_v22, %v2977_v18  ;;  %v2834_v32 = vadd.f32 %v5876_v33, %v2833_v9  ;;  %vm6340_vm1 = vmmov %vm6335_vm6 }
 0x2e2   : > { %v3006_v56 = vpack.c.bf16 %v2993_v2, %v2992_v44 }
 0x2e3   : > { %v2883_v12 = vadd.f32 %v2882_v52, %v2834_v32 }
 0x2e4   : > { %3626 = vmatmul.msk.bf16.gmra.mxu0 %vm6334_vm15, %v3006_v56 }
 0x2e5   : > { %v2932_v37 = vadd.f32 %v2931_v28, %v2883_v12 }
 0x2e6   : > { %v2933_v50 = vpop.f32.mrf.mxu2 }
 0x2e7   : > { %v2978_v27 = vmul.f32 0.01, %v2932_v37  ;;  %vm2962_vm3 = vcmp.ge.f32.partialorder %v2932_v37, 0.0 }
 0x2e8   : > { %v2835_v7 = vpop.f32.mrf.mxu3  ;;  %v2884_v59 = vpop.f32.mrf.mxu1 }
 0x2e9   : > { %v2836_v8 = vadd.f32 %v5876_v33, %v2835_v7  ;;  %v2994_v51 = vsel %vm2962_vm3, %v2932_v37, %v2978_v27 }
 0x2eb   : > { %v2885_v38 = vadd.f32 %v2884_v59, %v2836_v8 }
 0x2ed   : > { %v2934_v58 = vadd.f32 %v2933_v50, %v2885_v38 }
 0x2ee   : > { %v2936_v53 = vpop.f32.mrf.mxu2 }
 0x2ef   : > { %vm2963_vm14 = vcmp.ge.f32.partialorder %v2934_v58, 0.0  ;;  %v2979_v24 = vmul.f32 0.01, %v2934_v58 }
 0x2f0   : > { %v2838_v57 = vpop.f32.mrf.mxu3  ;;  %v2887_v17 = vpop.f32.mrf.mxu1 }
 0x2f1   : > { %v2995_v41 = vsel %vm2963_vm14, %v2934_v58, %v2979_v24  ;;  %v2839_v1 = vadd.f32 %v5876_v33, %v2838_v57 }
 0x2f2   : > { %v3007_v20 = vpack.c.bf16 %v2995_v41, %v2994_v51 }
 0x2f3   : > { %v2888_v26 = vadd.f32 %v2887_v17, %v2839_v1 }
 0x2f4   : > { %3627 = vmatmul.msk.bf16.gmra.mxu0 %vm6335_vm6, %v3007_v20 }
 0x2f5   : > { %v2937_v49 = vadd.f32 %v2936_v53, %v2888_v26 }
 0x2f6   : > { %v2938_v60 = vpop.f32.mrf.mxu2 }
 0x2f7   : > { %v2980_v25 = vmul.f32 0.01, %v2937_v49  ;;  %vm2964_vm13 = vcmp.ge.f32.partialorder %v2937_v49, 0.0 }
 0x2f8   : > { %v2840_v30 = vpop.f32.mrf.mxu3  ;;  %v2889_v11 = vpop.f32.mrf.mxu1 }
 0x2f9   : > { %v2841_v0 = vadd.f32 %v5876_v33, %v2840_v30  ;;  %v2996_v23 = vsel %vm2964_vm13, %v2937_v49, %v2980_v25  ;;  %v5905_v30 = vld [vmem:[%s6339_s6] ss:$0 sm:$0xff] }
 0x2fb   : > { %v2890_v45 = vadd.f32 %v2889_v11, %v2841_v0 }
 0x2fd   : > { %v2939_v31 = vadd.f32 %v2938_v60, %v2890_v45  ;;  %v3693_v60 = vld [vmem:[%s4504_s26] sm:$0xff]  }
 0x2fe   : > { %v2941_v46 = vpop.f32.mrf.mxu2  ;;  %v3694_v49 = vunpack.c.l.bf16 %v3693_v60  ;;  %v3695_v45 = vunpack.c.h.bf16 %v3693_v60 }
 0x2ff   : > { %vm2965_vm8 = vcmp.ge.f32.partialorder %v2939_v31, 0.0  ;;  %v2981_v43 = vmul.f32 0.01, %v2939_v31 }
 0x300   : > { %v2843_v47 = vpop.f32.mrf.mxu3 }
 0x301   : > { %v2844_v19 = vadd.f32 %v5876_v33, %v2843_v47  ;;  %v2997_v48 = vsel %vm2965_vm8, %v2939_v31, %v2981_v43 }
 0x302   : > { %v2892_v34 = vpop.f32.mrf.mxu1  ;;  %v3008_v15 = vpack.c.bf16 %v2997_v48, %v2996_v23 }
 0x303   : > { %v2893_v13 = vadd.f32 %v2892_v34, %v2844_v19 }
 0x304   : > { %3628 = vmatmul.msk.bf16.gmra.mxu0 %vm6336_vm12, %v3008_v15  ;;  %v3764_v15 = vld [vmem:[%s4504_s26 + $0x8] sm:$0xff]  }
 0x305   : > { %v2942_v55 = vadd.f32 %v2941_v46, %v2893_v13 }
 0x306   : > { %v2943_v54 = vpop.f32.mrf.mxu2 }
 0x307   : > { %v2982_v40 = vmul.f32 0.01, %v2942_v55  ;;  %vm2966_vm4 = vcmp.ge.f32.partialorder %v2942_v55, 0.0 }
 0x308   : > { %v2845_v29 = vpop.f32.mrf.mxu3 }
 0x309   : > { %v2846_v36 = vadd.f32 %v5876_v33, %v2845_v29  ;;  %v2998_v61 = vsel %vm2966_vm4, %v2942_v55, %v2982_v40  ;;  %v3698_v29 = vunpack.c.l.bf16 %v3764_v15 }
 0x30a   : > { %v2894_v5 = vpop.f32.mrf.mxu1 }
 0x30b   : > { %v2895_v6 = vadd.f32 %v2894_v5, %v2846_v36  ;;  %v3699_v36 = vunpack.c.h.bf16 %v3764_v15 }
 0x30d   : > { %v2944_v3 = vadd.f32 %v2943_v54, %v2895_v6 }
 0x30e   : > { %v2946_v16 = vpop.f32.mrf.mxu2 }
 0x30f   : > { %vm2967_vm7 = vcmp.ge.f32.partialorder %v2944_v3, 0.0  ;;  %v2983_v63 = vmul.f32 0.01, %v2944_v3 }
 0x311   : > { %v2999_v62 = vsel %vm2967_vm7, %v2944_v3, %v2983_v63 }
 0x312   : > { %v3009_v42 = vpack.c.bf16 %v2999_v62, %v2998_v61 }
 0x314   : > { %3629 = vmatmul.msk.bf16.gmra.mxu0 %vm6337_vm11, %v3009_v42 }
 0x316   : > { %v2948_v39 = vpop.f32.mrf.mxu2 }
 0x319   : > { %v2848_v10 = vpop.f32.mrf.mxu3 }
 0x31a   : > { %v2849_v21 = vadd.f32 %v5876_v33, %v2848_v10 }
 0x31b   : > { %v2897_v14 = vpop.f32.mrf.mxu1 }
 0x31c   : > { %v2898_v35 = vadd.f32 %v2897_v14, %v2849_v21 }
 0x31e   : > { %v2947_v22 = vadd.f32 %v2946_v16, %v2898_v35  ;;  %v2951_v50 = vpop.f32.mrf.mxu2  ;;  %v3765_v16 = vld [vmem:[%s4504_s26 + $0x10] sm:$0xff]  }
 0x31f   : > { %v3702_v21 = vunpack.c.l.bf16 %v3765_v16  ;;  %v3703_v35 = vunpack.c.h.bf16 %v3765_v16 }
 0x320   : > { %v2984_v44 = vmul.f32 0.01, %v2947_v22  ;;  %vm2968_vm2 = vcmp.ge.f32.partialorder %v2947_v22, 0.0 }
 0x321   : > { %v2850_v4 = vpop.f32.mrf.mxu3 }
 0x322   : > { %v2851_v18 = vadd.f32 %v5876_v33, %v2850_v4  ;;  %v3000_v12 = vsel %vm2968_vm2, %v2947_v22, %v2984_v44 }
 0x323   : > { %v2899_v28 = vpop.f32.mrf.mxu1 }
 0x324   : > { %v2900_v9 = vadd.f32 %v2899_v28, %v2851_v18 }
 0x326   : > { %v2949_v2 = vadd.f32 %v2948_v39, %v2900_v9  ;;  %v2953_v57 = vpop.f32.mrf.mxu2 }
 0x328   : > { %vm2969_vm0 = vcmp.ge.f32.partialorder %v2949_v2, 0.0  ;;  %v2985_v56 = vmul.f32 0.01, %v2949_v2 }
 0x329   : > { %v2853_v32 = vpop.f32.mrf.mxu3 }
 0x32a   : > { %v2854_v52 = vadd.f32 %v5876_v33, %v2853_v32  ;;  %v3001_v7 = vsel %vm2969_vm0, %v2949_v2, %v2985_v56  ;;  %v3766_v32 = vld [vmem:[%s4504_s26 + $0x18] sm:$0xff]  }
 0x32b   : > { %v2902_v8 = vpop.f32.mrf.mxu1  ;;  %v3010_v37 = vpack.c.bf16 %v3001_v7, %v3000_v12  ;;  %v3706_v12 = vunpack.c.l.bf16 %v3766_v32 }
 0x32c   : > { %v2903_v59 = vadd.f32 %v2902_v8, %v2854_v52 }
 0x32d   : > { %3630 = vmatmul.msk.bf16.gmra.mxu0 %vm6338_vm10, %v3010_v37 }
 0x32e   : > { %v2952_v27 = vadd.f32 %v2951_v50, %v2903_v59  ;;  %v3707_v50 = vunpack.c.h.bf16 %v3766_v32 }
 0x330   : > { %v2986_v51 = vmul.f32 0.01, %v2952_v27  ;;  %vm2970_vm9 = vcmp.ge.f32.partialorder %v2952_v27, 0.0 }
 0x331   : > { %v2855_v38 = vpop.f32.mrf.mxu3 }
 0x332   : > { %v2856_v58 = vadd.f32 %v5876_v33, %v2855_v38  ;;  %v3002_v1 = vsel %vm2970_vm9, %v2952_v27, %v2986_v51  ;;  %v3767_v51 = vld [vmem:[%s4504_s26 + $0x20] sm:$0xff]  }
 0x333   : > { %v2904_v24 = vpop.f32.mrf.mxu1 }
 0x334   : > { %v2905_v53 = vadd.f32 %v2904_v24, %v2856_v58 }
 0x336   : > { %v2954_v41 = vadd.f32 %v2953_v57, %v2905_v53 }
 0x338   : > { %vm2971_vm5 = vcmp.ge.f32.partialorder %v2954_v41, 0.0  ;;  %v2987_v20 = vmul.f32 0.01, %v2954_v41 }
 0x33a   : > { %v3003_v17 = vsel %vm2971_vm5, %v2954_v41, %v2987_v20  ;;  %v3710_v20 = vunpack.c.l.bf16 %v3767_v51 }
 0x33b   : > { %v3011_v26 = vpack.c.bf16 %v3003_v17, %v3002_v1  ;;  %v3711_v17 = vunpack.c.h.bf16 %v3767_v51 }
 0x33d   : > { %3631 = vmatmul.msk.bf16.gmra.mxu0 %vm6340_vm1, %v3011_v26 }
 0x33f   : > { %v3065_v0 = vpop.f32.mrf.mxu0 }
 0x340   : > { %v3066_v33 = vadd.f32 %v5905_v30, %v3065_v0 }
 0x342   : > { %v3137_v11 = vadd.f32 %v3694_v49, %v3066_v33 }
 0x344   : > { %v3169_v43 = vmul.f32 0.01, %v3137_v11  ;;  %vm3153_vm15 = vcmp.ge.f32.partialorder %v3137_v11, 0.0 }
 0x346   : > { %v3185_v23 = vsel %vm3153_vm15, %v3137_v11, %v3169_v43  ;;  %v3768_v43 = vld [vmem:[%s4504_s26 + $0x28] sm:$0xff]  }
 0x347   : > { %v3067_v25 = vpop.f32.mrf.mxu0 }
 0x348   : > { %v3068_v31 = vadd.f32 %v5905_v30, %v3067_v25 }
 0x34a   : > { %v3138_v47 = vadd.f32 %v3695_v45, %v3068_v31 }
 0x34c   : > { %vm3154_vm3 = vcmp.ge.f32.partialorder %v3138_v47, 0.0  ;;  %v3170_v19 = vmul.f32 0.01, %v3138_v47 }
 0x34e   : > { %v3186_v48 = vsel %vm3154_vm3, %v3138_v47, %v3170_v19  ;;  %v3714_v19 = vunpack.c.l.bf16 %v3768_v43 }
 0x34f   : > { %v3727_v46 = vpack.c.bf16 %v3186_v48, %v3185_v23  ;;  %v3715_v48 = vunpack.c.h.bf16 %v3768_v43 }
 0x351   : > { %v3070_v34 = vpop.f32.mrf.mxu0  ;;  %3728 = vst [vmem:[%s4610_s5] sm:$0xff] %v3727_v46  }
 0x352   : > { %v3071_v13 = vadd.f32 %v5905_v30, %v3070_v34 }
 0x354   : > { %v3139_v55 = vadd.f32 %v3698_v29, %v3071_v13 }
 0x356   : > { %v3171_v54 = vmul.f32 0.01, %v3139_v55  ;;  %vm3155_vm14 = vcmp.ge.f32.partialorder %v3139_v55, 0.0 }
 0x358   : > { %v3187_v63 = vsel %vm3155_vm14, %v3139_v55, %v3171_v54  ;;  %v3769_v54 = vld [vmem:[%s4504_s26 + $0x30] sm:$0xff]  }
 0x359   : > { %v3072_v5 = vpop.f32.mrf.mxu0 }
 0x35a   : > { %v3073_v6 = vadd.f32 %v5905_v30, %v3072_v5 }
 0x35c   : > { %v3140_v40 = vadd.f32 %v3699_v36, %v3073_v6 }
 0x35e   : > { %vm3156_vm6 = vcmp.ge.f32.partialorder %v3140_v40, 0.0  ;;  %v3172_v3 = vmul.f32 0.01, %v3140_v40 }
 0x360   : > { %v3188_v61 = vsel %vm3156_vm6, %v3140_v40, %v3172_v3  ;;  %v3718_v3 = vunpack.c.l.bf16 %v3769_v54 }
 0x361   : > { %v3732_v62 = vpack.c.bf16 %v3188_v61, %v3187_v63  ;;  %v3075_v42 = vpop.f32.mrf.mxu0  ;;  %v3719_v61 = vunpack.c.h.bf16 %v3769_v54 }
 0x362   : > { %v3076_v10 = vadd.f32 %v5905_v30, %v3075_v42 }
 0x363   : > { %3771 = vst [vmem:[%s4610_s5 + $0x8] sm:$0xff] %v3732_v62  }
 0x364   : > { %v3141_v14 = vadd.f32 %v3702_v21, %v3076_v10 }
 0x366   : > { %v3173_v22 = vmul.f32 0.01, %v3141_v14  ;;  %vm3157_vm13 = vcmp.ge.f32.partialorder %v3141_v14, 0.0 }
 0x368   : > { %v3189_v9 = vsel %vm3157_vm13, %v3141_v14, %v3173_v22  ;;  %v3770_v22 = vld [vmem:[%s4504_s26 + $0x38] sm:$0xff]   ;;  %s3247_s26 = scalar_lea.hbm %s6343_s27, %s3635_s19 }
 0x369   : > { %v3077_v39 = vpop.f32.mrf.mxu0  ;;  %s3250_s14 = sshll.u32 %s3247_s26, 4  ;;  %s3251_s14 = int_to_ptr.hbm [resolvable:$true] %s3250_s14 }
 0x36a   : > { %v3078_v4 = vadd.f32 %v5905_v30, %v3077_v39  ;;  %s4061_s18 = sshra.s32 %s3251_s14, 4  ;;  %s4062_s18 = int_to_ptr.hbm [resolvable:$true] %s4061_s18 }
 0x36b   : > { %s4063_s12 = scalar_lea.hbm %s4062_s18, 64  ;;  %p4068_p10 = scmp.lt.s32.totalorder %s4062_s18, %s6343_s27 }
 0x36c   : > { %v3142_v18 = vadd.f32 %v3703_v35, %v3078_v4  ;;  %p4064_p5 = scmp.ne.s32.totalorder %s4062_s18, %s4063_s12  ;;  %p4069_p12 = scmp.lt.s32.totalorder %s4067_s3, %s4063_s12 }
 0x36e   : > { %vm3158_vm8 = vcmp.ge.f32.partialorder %v3142_v18, 0.0  ;;  %v3174_v28 = vmul.f32 0.01, %v3142_v18  ;;  %p4065_p8 = pnand %p4064_p5, %p4434_p4  ;;  %p4070_p13 = por %p4069_p12, %p4068_p10 }
 0x370   : > { %v3190_v44 = vsel %vm3158_vm8, %v3142_v18, %v3174_v28  ;;  %v3722_v28 = vunpack.c.l.bf16 %v3770_v22  ;;  %p4066_p9 = pneg %p4065_p8 }
 0x371   : > { %v3737_v2 = vpack.c.bf16 %v3190_v44, %v3189_v9  ;;  %v3080_v56 = vpop.f32.mrf.mxu0  ;;  %v3723_v44 = vunpack.c.h.bf16 %v3770_v22 }
 0x372   : > { %v3081_v52 = vadd.f32 %v5905_v30, %v3080_v56  ;;  %p4071_p1 = pnand %p4070_p13, %p4066_p9 }
 0x373   : > { %3772 = vst [vmem:[%s4610_s5 + $0x10] sm:$0xff] %v3737_v2  }
 0x374   : > { %v3143_v7 = vadd.f32 %v3706_v12, %v3081_v52 }
 0x376   : > { %v3175_v59 = vmul.f32 0.01, %v3143_v7  ;;  %vm3159_vm12 = vcmp.ge.f32.partialorder %v3143_v7, 0.0 }
 0x378   : > { %v3191_v58 = vsel %vm3159_vm12, %v3143_v7, %v3175_v59 }
 0x379   : > { %v3082_v8 = vpop.f32.mrf.mxu0 }
 0x37a   : > { %v3083_v37 = vadd.f32 %v5905_v30, %v3082_v8 }
 0x37c   : > { %v3144_v38 = vadd.f32 %v3707_v50, %v3083_v37 }
 0x37e   : > { %vm3160_vm4 = vcmp.ge.f32.partialorder %v3144_v38, 0.0  ;;  %v3176_v27 = vmul.f32 0.01, %v3144_v38 }
 0x380   : > { %v3192_v24 = vsel %vm3160_vm4, %v3144_v38, %v3176_v27 }
 0x381   : > { %v3742_v53 = vpack.c.bf16 %v3192_v24, %v3191_v58  ;;  %v3085_v57 = vpop.f32.mrf.mxu0 }
 0x382   : > { %v3086_v41 = vadd.f32 %v5905_v30, %v3085_v57 }
 0x383   : > { %3773 = vst [vmem:[%s4610_s5 + $0x18] sm:$0xff] %v3742_v53  }
 0x384   : > { %v3145_v1 = vadd.f32 %v3710_v20, %v3086_v41 }
 0x386   : > { %v3177_v60 = vmul.f32 0.01, %v3145_v1  ;;  %vm3161_vm7 = vcmp.ge.f32.partialorder %v3145_v1, 0.0 }
 0x388   : > { %v3193_v11 = vsel %vm3161_vm7, %v3145_v1, %v3177_v60 }
 0x389   : > { %v3087_v26 = vpop.f32.mrf.mxu0 }
 0x38a   : > { %v3088_v0 = vadd.f32 %v5905_v30, %v3087_v26 }
 0x38c   : > { %v3146_v33 = vadd.f32 %v3711_v17, %v3088_v0 }
 0x38e   : > { %vm3162_vm11 = vcmp.ge.f32.partialorder %v3146_v33, 0.0  ;;  %v3178_v49 = vmul.f32 0.01, %v3146_v33 }
 0x390   : > { %v3194_v45 = vsel %vm3162_vm11, %v3146_v33, %v3178_v49 }
 0x391   : > { %v3747_v25 = vpack.c.bf16 %v3194_v45, %v3193_v11  ;;  %v3090_v31 = vpop.f32.mrf.mxu0 }
 0x392   : > { %v3091_v47 = vadd.f32 %v5905_v30, %v3090_v31 }
 0x393   : > { %3774 = vst [vmem:[%s4610_s5 + $0x20] sm:$0xff] %v3747_v25  }
 0x394   : > { %v3147_v23 = vadd.f32 %v3714_v19, %v3091_v47 }
 0x396   : > { %v3179_v15 = vmul.f32 0.01, %v3147_v23  ;;  %vm3163_vm2 = vcmp.ge.f32.partialorder %v3147_v23, 0.0 }
 0x398   : > { %v3195_v55 = vsel %vm3163_vm2, %v3147_v23, %v3179_v15 }
 0x399   : > { %v3092_v46 = vpop.f32.mrf.mxu0 }
 0x39a   : > { %v3093_v34 = vadd.f32 %v5905_v30, %v3092_v46 }
 0x39c   : > { %v3148_v13 = vadd.f32 %v3715_v48, %v3093_v34 }
 0x39e   : > { %vm3164_vm0 = vcmp.ge.f32.partialorder %v3148_v13, 0.0  ;;  %v3180_v29 = vmul.f32 0.01, %v3148_v13 }
 0x3a0   : > { %v3196_v36 = vsel %vm3164_vm0, %v3148_v13, %v3180_v29 }
 0x3a1   : > { %v3752_v5 = vpack.c.bf16 %v3196_v36, %v3195_v55 }
 0x3a3   : > { %3775 = vst [vmem:[%s4610_s5 + $0x28] sm:$0xff] %v3752_v5  }
 0x3aa   : > { %v3095_v6 = vpop.f32.mrf.mxu0 }
 0x3ab   : > { %v3096_v40 = vadd.f32 %v5905_v30, %v3095_v6 }
 0x3ad   : > { %v3149_v63 = vadd.f32 %v3718_v3, %v3096_v40 }
 0x3af   : > { %v3181_v16 = vmul.f32 0.01, %v3149_v63  ;;  %vm3165_vm10 = vcmp.ge.f32.partialorder %v3149_v63, 0.0 }
 0x3b1   : > { %v3197_v14 = vsel %vm3165_vm10, %v3149_v63, %v3181_v16 }
 0x3b2   : > { %v3097_v62 = vpop.f32.mrf.mxu0 }
 0x3b3   : > { %v3098_v42 = vadd.f32 %v5905_v30, %v3097_v62 }
 0x3b5   : > { %v3150_v10 = vadd.f32 %v3719_v61, %v3098_v42 }
 0x3b7   : > { %vm3166_vm9 = vcmp.ge.f32.partialorder %v3150_v10, 0.0  ;;  %v3182_v21 = vmul.f32 0.01, %v3150_v10 }
 0x3b9   : > { %v3198_v35 = vsel %vm3166_vm9, %v3150_v10, %v3182_v21 }
 0x3ba   : > { %v3757_v39 = vpack.c.bf16 %v3198_v35, %v3197_v14  ;;  %v3100_v4 = vpop.f32.mrf.mxu0 }
 0x3bb   : > { %v3101_v18 = vadd.f32 %v5905_v30, %v3100_v4 }
 0x3bc   : > { %3776 = vst [vmem:[%s4610_s5 + $0x30] sm:$0xff] %v3757_v39  }
 0x3bd   : > { %v3151_v9 = vadd.f32 %v3722_v28, %v3101_v18 }
 0x3bf   : > { %v3183_v32 = vmul.f32 0.01, %v3151_v9  ;;  %vm3167_vm5 = vcmp.ge.f32.partialorder %v3151_v9, 0.0 }
 0x3c1   : > { %v3199_v7 = vsel %vm3167_vm5, %v3151_v9, %v3183_v32 }
 0x3c2   : > { %v3102_v2 = vpop.f32.mrf.mxu0 }
 0x3c3   : > { %v3103_v56 = vadd.f32 %v5905_v30, %v3102_v2 }
 0x3c5   : > { %v3152_v52 = vadd.f32 %v3723_v44, %v3103_v56 }
 0x3c7   : > { %vm3168_vm1 = vcmp.ge.f32.partialorder %v3152_v52, 0.0  ;;  %v3184_v12 = vmul.f32 0.01, %v3152_v52 }
 0x3c9   : > { %v3200_v50 = vsel %vm3168_vm1, %v3152_v52, %v3184_v12 }
 0x3ca   : > { %v3762_v8 = vpack.c.bf16 %v3200_v50, %v3199_v7 }
 0x3cc   : > { %3777 = vst [vmem:[%s4610_s5 + $0x38] sm:$0xff] %v3762_v8  }
 0x3cd   : > { %4074 = shalt.err (!%p4071_p1)
}
 0x3ce   : > { %s4212_s25 = smov 4  }
 0x3cf   : > { %3800 = dma.vmem_to_hbm [thread:$0]  (%p4434_p4), %s3249_s4, 1024, %s3251_s14, %s3234_s30, %s4210_s7, %s4210_s7, %s4212_s25  }
 0x3d0 PF: > { %s6344_s5 = sld [smem:[#allocation15_spill]]  ;;  %p3817_p2 = scmp.ge.s32.totalorder %s4201_s22, 2 }
 0x3d2   : > { %p3813_p11 = pnand %p3817_p2, %p4438_p6 }
 0x3d4   : > { %p3814_p0 = pneg %p3813_p11 }
 0x3d6   : > { %s3265_s21 = sand.u32 1, %s6344_s5  }
 0x3d7   : > { %s3266_s19 = scalar_lea.sflag [#allocation5], %s3265_s21 }
 0x3d8   : > { %4144 = dma.done.wait (%p3814_p0), %s3266_s19, 1024  }
 0x3d9   : > { %4146 = vsyncadd (%p3814_p0), %s3266_s19, 4294966272  ;;  %s28_s22 = sadd.s32 1, %s4201_s22   ;;  %s6347_s8 = sld [smem:[#allocation14_spill]] }
 0x3da   : > { %p5964_p7 = scmp.ge.s32.totalorder %s28_s22, 6   ;;  %s6348_s14 = sld [smem:[#allocation24_spill]] }
 0x3db   : > { %s6349_s7 = sld [smem:[#allocation16_spill]]  ;;  %s6355_s30 = smov %s4153_s10 }
 0x3dc   : > { %s6350_s17 = sld [smem:[#allocation25_spill]]  ;;  %s6356_s10 = smov %s4157_s11 }
 0x3dd   : > { %s6351_s18 = sld [smem:[#allocation19_spill]]  ;;  %s6357_s11 = smov %s4481_s29 }
 0x3de   : > { %s6352_s19 = sld [smem:[#allocation20_spill]]  ;;  %s6358_s12 = smov %s4165_s13 }
 0x3df   : > { %s6353_s20 = sld [smem:[#allocation21_spill]]  ;;  %s6359_s13 = smov %s6347_s8 }
 0x3e0   : > { %s6354_s21 = sld [smem:[#allocation22_spill]]  ;;  %s6360_s15 = smov %s4177_s16 }
 0x3e1   : > { %s6361_s16 = smov %s6349_s7  ;;  %27 = sbr.rel (!%p5964_p7) target bundleno = 22 (0x16), region = 141 }
 0x3e6   :  { %3272 = vsyncpa [#allocation4], 1 }
 0x3e7   :  { %3274 = vsyncpa [#allocation4 + $0x1], 1 }
 0x3e8   :  { %3275 = vsyncpa [#allocation7], 1 }
 0x3e9   :  { %3277 = vsyncpa [#allocation7 + $0x1], 1 }
 0x3ea   :  { %3278 = vsyncpa [#allocation5], 1 }
 0x3eb   :  { %3280 = vsyncpa [#allocation5 + $0x1], 1 }

</bundles_post_ra>
